<compile_context>
chip_gen: v7x
topology: tpu7x:2x2x1
jax: 0.10.0
libtpu: 0.0.40
codegen_flags: <defaults>
</compile_context>

<pallas_src>
import functools
import math

import jax
import jax.numpy as jnp
import numpy as np
from jax.experimental import pallas as pl
from jax.experimental.pallas import tpu as pltpu

F32 = jnp.float32
LANES = 128  # lane width of the packed weight slab (one vreg lane tile)


def block_layout(d_model, d_inner, d_state, d_conv):
    """Row offsets of each tensor inside one block's region of the packed slab."""
    offs = {}
    r = 0
    offs["Win"] = r;    r += d_model    # (d_model, 2*d_inner)  in_proj (x|z fused)
    offs["Wxproj"] = r; r += d_inner    # (d_inner, d_inner+2*d_state) [W_delta|W_B|W_C]
    offs["Wout"] = r;   r += d_inner    # (d_inner, d_model)    out_proj
    offs["Aneg"] = r;   r += d_state    # (d_state, d_inner)    -exp(A_log)^T
    offs["convw"] = r;  r += d_conv     # (d_conv, d_inner)
    offs["convb"] = r;  r += 1
    offs["bdelta"] = r; r += 1
    offs["D"] = r;      r += 1
    total = ((r + 7) // 8) * 8          # 8-sublane aligned block stride
    return offs, total


def _silu(x):
    # x * sigmoid(x) with sigmoid(x) = 0.5*(1 + tanh(x/2)): one EUP push, no overflow.
    return x * (0.5 * (1.0 + jnp.tanh(0.5 * x)))


def _softplus(x):
    # numerically stable softplus
    return jnp.maximum(x, 0.0) + jnp.log(1.0 + jnp.exp(-jnp.abs(x)))


# ----------------------------------------------------------------------------
# Fused forward kernel: the whole AgnosticContinuousQNetwork in one launch.
# ----------------------------------------------------------------------------
def fused_q_kernel(xcol_ref, acol_ref, w_ref, out_ref, pad_ref, y_ref, *,
                   batch, obs_dim, act_dim, num_blocks,
                   d_model, d_state, d_conv, d_inner):
    B = batch
    offs, blk_rows = block_layout(d_model, d_inner, d_state, d_conv)
    emb_off = 3 * num_blocks * blk_rows
    pad_top = ((d_conv - 1) * B + 7) // 8 * 8

    # Zero the causal-conv left pad once (8-aligned store); blocks only ever write
    # rows >= pad_top, so these rows stay zero for the whole forward.
    pad_ref[0:pad_top, :] = jnp.zeros((pad_top, d_inner), F32)

    def mamba_block(u2, blk_idx, L, apply_act):
        # u2: (B*L, d_model), rows are t-major (row = t*B + b).
        o = blk_idx * blk_rows
        BL = B * L

        # in_proj: one MXU push, lane-split into x / z halves.
        Win = w_ref[o + offs["Win"]:o + offs["Win"] + d_model, :]
        xz2 = jnp.dot(u2, Win, preferred_element_type=F32)              # (BL, 2*d_inner)
        xm2 = xz2[:, :d_inner]
        z2 = xz2[:, d_inner:2 * d_inner]

        # Causal depthwise conv1d + SiLU.  With t-major rows, tap s is a shift by
        # s*B rows for the whole batch at once (single 8-aligned padded segment).
        cw = w_ref[o + offs["convw"]:o + offs["convw"] + d_conv, :][:, :d_inner]
        cb = w_ref[o + offs["convb"]:o + offs["convb"] + 1, :][:, :d_inner]
        if L == 1:
            xc2 = _silu(xm2 * cw[d_conv - 1:d_conv, :] + cb)             # only tap 0 is live
        else:
            pad_ref[pad_top:pad_top + BL, :] = xm2
            acc = pad_ref[pad_top:pad_top + BL, :] * cw[d_conv - 1:d_conv, :]
            for s in range(1, d_conv):
                acc = acc + (pad_ref[pad_top - s * B:pad_top - s * B + BL, :]
                             * cw[d_conv - 1 - s:d_conv - s, :])
            xc2 = _silu(acc + cb)

        # x_proj fused (delta | B | C) in one MXU push; dt_proj pre-folded into W_delta.
        Wxp = w_ref[o + offs["Wxproj"]:o + offs["Wxproj"] + d_inner, :]
        xp = jnp.dot(xc2, Wxp, preferred_element_type=F32)              # (BL, LANES)
        b_delta = w_ref[o + offs["bdelta"]:o + offs["bdelta"] + 1, :][:, :d_inner]
        delta2 = _softplus(xp[:, :d_inner] + b_delta)                    # (BL, d_inner)
        Bm2 = xp[:, d_inner:d_inner + d_state]                           # (BL, d_state)
        Cm2 = xp[:, d_inner + d_state:d_inner + 2 * d_state]             # (BL, d_state)
        du2 = delta2 * xc2

        # Hoisted scan pre-compute (fully parallel, off the serial chain):
        # per-row dA = exp(delta*A), dBu = (delta*u) x B, and C tiles.
        A_neg = w_ref[o + offs["Aneg"]:o + offs["Aneg"] + d_state, :][:, :d_inner]
        A_neg3 = A_neg[None, :, :]                                       # (1, s, i)
        dA_r, dBu_r, C_r = [], [], []
        for r in range(BL):
            dlt = delta2[r:r + 1, :][:, None, :]                         # (1, 1, i)
            dA_r.append(jnp.exp(dlt * A_neg3))                           # (1, s, i)
            dBu_r.append(du2[r:r + 1, :][:, None, :] * Bm2[r:r + 1, :][:, :, None])
            C_r.append(Cm2[r:r + 1, :][:, :, None])                      # (1, s, 1)

        def group(lst, t):
            # (B, s, .) tile for step t — leading-dim concat only (no relayout).
            parts = lst[t * B:(t + 1) * B]
            return parts[0] if B == 1 else jnp.concatenate(parts, axis=0)

        # Batch-vectorized selective scan: state is (B, d_state, d_inner); serial
        # length is L and the per-step dependent work is just one mul + one add.
        state = group(dBu_r, 0)                                          # t = 0: 0*dA + dBu
        y_ref[0:B, :] = jnp.sum(state * group(C_r, 0), axis=1)
        for t in range(1, L):
            state = state * group(dA_r, t) + group(dBu_r, t)
            y_ref[t * B:(t + 1) * B, :] = jnp.sum(state * group(C_r, t), axis=1)
        y2 = y_ref[0:BL, :]                                              # (BL, d_inner)

        Dw = w_ref[o + offs["D"]:o + offs["D"] + 1, :][:, :d_inner]
        y2 = (y2 + Dw * xc2) * _silu(z2)
        Wout = w_ref[o + offs["Wout"]:o + offs["Wout"] + d_inner, :]     # zero-padded lanes
        out2 = jnp.dot(y2, Wout, preferred_element_type=F32)[:, :d_model]
        if apply_act:                                                    # nn.Tanh
            out2 = jnp.tanh(out2)
        return out2

    emb_row = w_ref[emb_off:emb_off + 1, :]
    ew = emb_row[:, :d_model]                                            # Linear(1, d_model).weight[:, 0]
    eb = emb_row[:, d_model:2 * d_model]                                 # bias

    # obs_encoder_1d (MambaEncoder): Linear(1, d_model) embedding, then [Mamba, Tanh]*N.
    h2 = xcol_ref[...] * ew + eb                                         # (B*obs_dim, d_model)
    for i in range(num_blocks):
        h2 = mamba_block(h2, i, obs_dim, apply_act=True)

    # act_encoder_1d (MambaDecoder blocks, last activation popped).
    # TODO(synk): source calls self.act_encoder_1d(a) against MambaDecoder's
    # (out_dim, hidden) signature (type mismatch); each action component is broadcast
    # to d_model channels (the decoder has no embedding) and run through its blocks.
    ah2 = acol_ref[...] * jnp.ones((1, d_model), F32)                    # (B*act_dim, d_model)
    for i in range(num_blocks):
        ah2 = mamba_block(ah2, num_blocks + i, act_dim, apply_act=(i < num_blocks - 1))

    # encoding tail: mean over the sequence dim of both streams, add, tanh (use_mlp=False).
    hm = h2[0:B, :]
    for t in range(1, obs_dim):
        hm = hm + h2[t * B:(t + 1) * B, :]
    am = ah2[0:B, :]
    for t in range(1, act_dim):
        am = am + ah2[t * B:(t + 1) * B, :]
    v2 = jnp.tanh(hm * (1.0 / obs_dim) + am * (1.0 / act_dim))           # (B, d_model)

    # decoding: value = value_decoder(1, h) -> (B, 1, d_model); mean over dim=2.
    # TODO(synk): decoding() reads self.use_transformer which the source never defines;
    # treated as False (no value_transformer branch).
    for i in range(num_blocks):
        v2 = mamba_block(v2, 2 * num_blocks + i, 1, apply_act=(i < num_blocks - 1))
    out_ref[...] = jnp.mean(v2, axis=1, keepdims=True)                   # (B, 1)


# ----------------------------------------------------------------------------
# Parameter init (deterministic, synthetic, module-shaped) + packed-slab prep.
# ----------------------------------------------------------------------------
def init_mamba_params(key, d_model, d_state, d_conv, expand):
    d_inner = expand * d_model
    dt_rank = math.ceil(d_model / 16)
    ks = jax.random.split(key, 6)

    def lin(k, fan_in, shape):
        return (jax.random.normal(k, shape, F32) / np.sqrt(fan_in)).astype(F32)

    dt0 = jax.random.uniform(ks[5], (1, d_inner), F32, 1e-3, 1e-1)
    return {
        "Win": lin(ks[0], d_model, (d_model, 2 * d_inner)),
        "conv_w": lin(ks[1], d_conv, (d_conv, d_inner)),
        "conv_b": jnp.zeros((1, d_inner), F32),
        "Wx": lin(ks[2], d_inner, (d_inner, dt_rank + 2 * d_state)),
        "Wdt": lin(ks[3], dt_rank, (dt_rank, d_inner)),
        "bdt": jnp.log(jnp.expm1(dt0)),                      # inverse-softplus dt init
        "A_log": jnp.log(jnp.broadcast_to(
            jnp.arange(1, d_state + 1, dtype=F32), (d_inner, d_state))),
        "D": jnp.ones((1, d_inner), F32),
        "Wout": lin(ks[4], d_inner, (d_inner, d_model)),
    }


def pack_block(p, d_model, d_inner, d_state, d_conv):
    """Weight prep: fold dt_proj into x_proj, fuse x_proj columns, pre-negate/transpose
    A, and lay everything out as one lane-dense (rows, 128) f32 region."""
    dt_rank = p["Wdt"].shape[0]
    Wx = p["Wx"]
    W_delta = jnp.dot(Wx[:, :dt_rank], p["Wdt"])                 # (d_inner, d_inner)
    W_BC = Wx[:, dt_rank:dt_rank + 2 * d_state]                  # (d_inner, 2*d_state)
    xproj = jnp.concatenate([W_delta, W_BC], axis=1)

    def padl(m):
        return jnp.pad(m.astype(F32), ((0, 0), (0, LANES - m.shape[1])))

    rows = [padl(p["Win"]), padl(xproj), padl(p["Wout"]),
            padl(-jnp.exp(p["A_log"]).T), padl(p["conv_w"]),
            padl(p["conv_b"]), padl(p["bdt"]), padl(p["D"])]
    blk = jnp.concatenate(rows, axis=0)
    offs, total = block_layout(d_model, d_inner, d_state, d_conv)
    assert blk.shape[0] == offs["D"] + 1
    pad_rows = total - blk.shape[0]
    if pad_rows:
        blk = jnp.concatenate([blk, jnp.zeros((pad_rows, LANES), F32)], axis=0)
    return blk


def init_params(key, d_model, d_state, d_conv, expand, num_blocks):
    d_inner = expand * d_model
    assert 2 * d_inner <= LANES and d_inner + 2 * d_state <= LANES
    k_emb, k_enc, k_act, k_val = jax.random.split(key, 4)

    def stream(k):
        return [pack_block(init_mamba_params(kk, d_model, d_state, d_conv, expand),
                           d_model, d_inner, d_state, d_conv)
                for kk in jax.random.split(k, num_blocks)]

    # MambaEncoder.embedding = nn.Linear(1, d_model): weight[:, 0] and bias.
    emb_w = jax.random.normal(k_emb, (1, d_model), F32)
    emb_b = jnp.zeros((1, d_model), F32)
    emb_row = jnp.concatenate(
        [emb_w, emb_b, jnp.zeros((1, LANES - 2 * d_model), F32)], axis=1)
    emb_slab = jnp.concatenate([emb_row, jnp.zeros((7, LANES), F32)], axis=0)

    return jnp.concatenate(
        stream(k_enc) + stream(k_act) + stream(k_val) + [emb_slab], axis=0)


# ----------------------------------------------------------------------------
# Forward pass of AgnosticContinuousQNetwork: a single fused pallas_call.
# ----------------------------------------------------------------------------
def agnostic_continuous_q_forward(w_slab, x, a, *, d_model, d_state, d_conv,
                                  d_inner, num_blocks):
    B, obs_dim = x.shape
    act_dim = a.shape[1]
    L_max = max(obs_dim, act_dim, 1)
    pad_top = ((d_conv - 1) * B + 7) // 8 * 8

    # Layout-only input prep (outside the kernel): t-major (row = t*B + b) columns.
    x_col = x.astype(F32).T.reshape(obs_dim * B, 1)
    a_col = a.astype(F32).T.reshape(act_dim * B, 1)

    kernel = functools.partial(
        fused_q_kernel, batch=B, obs_dim=obs_dim, act_dim=act_dim,
        num_blocks=num_blocks, d_model=d_model, d_state=d_state,
        d_conv=d_conv, d_inner=d_inner)

    return pl.pallas_call(
        kernel,
        out_shape=jax.ShapeDtypeStruct((B, 1), F32),
        scratch_shapes=[
            pltpu.VMEM((pad_top + B * L_max, d_inner), F32),  # causal-conv padded segment
            pltpu.VMEM((B * L_max, d_inner), F32),            # per-step scan outputs y
        ],
    )(x_col, a_col, w_slab)


if __name__ == "__main__":
    B, obs_dim, act_dim = 2, 8, 4
    d_model, d_state, d_conv, expand, num_blocks = 32, 8, 4, 2, 2
    d_inner = expand * d_model

    key = jax.random.PRNGKey(0)
    kx, ka, kp = jax.random.split(key, 3)
    x = jax.random.normal(kx, (B, obs_dim), F32)
    a = jax.random.normal(ka, (B, act_dim), F32)
    w_slab = init_params(kp, d_model, d_state, d_conv, expand, num_blocks)

    value = agnostic_continuous_q_forward(
        w_slab, x, a, d_model=d_model, d_state=d_state, d_conv=d_conv,
        d_inner=d_inner, num_blocks=num_blocks)
    value = jax.block_until_ready(value)
    assert value.shape == (B, 1) and value.dtype == F32
    assert bool(jnp.all(jnp.isfinite(value)))
    print("KERNEL_OK")
</pallas_src>

<mosaic_0001>
module attributes {stable_mosaic.version = 11 : i64} {
  func.func @fused_q_kernel(%arg0: memref<16x1xf32, #tpu.memory_space<vmem>>, %arg1: memref<8x1xf32, #tpu.memory_space<vmem>>, %arg2: memref<1064x128xf32, #tpu.memory_space<vmem>>, %arg3: memref<2x1xf32, #tpu.memory_space<vmem>>, %arg4: memref<24x64xf32, #tpu.memory_space<vmem>>, %arg5: memref<16x64xf32, #tpu.memory_space<vmem>>) attributes {dimension_semantics = [], scalar_prefetch = 0 : i64, scratch_operands = 2 : i64, tpu.core_type = #tpu.core_type<tc>} {
    %cst = arith.constant 0.000000e+00 : f32
    %0 = vector.broadcast %cst : f32 to vector<8x64xf32>
    %c0 = arith.constant 0 : index
    %c0_0 = arith.constant 0 : index
    %1 = vector.load %arg4[%c0, %c0_0] : memref<24x64xf32, #tpu.memory_space<vmem>>, vector<8x64xf32>
    tpu.vector_store %arg4[%c0, %c0_0], %0 {strides = array<i32>} : memref<24x64xf32, #tpu.memory_space<vmem>>, vector<8x64xf32>,
    %c1056 = arith.constant 1056 : index
    %c0_1 = arith.constant 0 : index
    %2 = vector.load %arg2[%c1056, %c0_1] : memref<1064x128xf32, #tpu.memory_space<vmem>>, vector<1x128xf32>
    %3 = vector.extract_strided_slice %2 {offsets = [0, 0], sizes = [1, 32], strides = [1, 1]} : vector<1x128xf32> to vector<1x32xf32>
    %4 = vector.extract_strided_slice %2 {offsets = [0, 32], sizes = [1, 32], strides = [1, 1]} : vector<1x128xf32> to vector<1x32xf32>
    %c0_2 = arith.constant 0 : index
    %c0_3 = arith.constant 0 : index
    %5 = vector.load %arg0[%c0_2, %c0_3] : memref<16x1xf32, #tpu.memory_space<vmem>>, vector<16x1xf32>
    %6 = vector.broadcast %5 : vector<16x1xf32> to vector<16x32xf32>
    %7 = vector.broadcast %3 : vector<1x32xf32> to vector<16x32xf32>
    %8 = arith.mulf %6, %7 : vector<16x32xf32>
    %9 = vector.broadcast %4 : vector<1x32xf32> to vector<16x32xf32>
    %10 = arith.addf %8, %9 : vector<16x32xf32>
    %c0_4 = arith.constant 0 : index
    %c0_5 = arith.constant 0 : index
    %11 = vector.load %arg2[%c0_4, %c0_5] : memref<1064x128xf32, #tpu.memory_space<vmem>>, vector<32x128xf32>
    %cst_6 = arith.constant dense<0.000000e+00> : vector<16x128xf32>
    %12 = tpu.matmul %10, %11, %cst_6 {dimension_numbers = #tpu.dot_dimension_numbers<[1], [0], [0], [1], [0, 0, 1, 1], [], []>} : vector<16x32xf32>, vector<32x128xf32>, vector<16x128xf32> -> vector<16x128xf32>
    %13 = vector.extract_strided_slice %12 {offsets = [0, 0], sizes = [16, 64], strides = [1, 1]} : vector<16x128xf32> to vector<16x64xf32>
    %14 = vector.extract_strided_slice %12 {offsets = [0, 64], sizes = [16, 64], strides = [1, 1]} : vector<16x128xf32> to vector<16x64xf32>
    %c168 = arith.constant 168 : index
    %c0_7 = arith.constant 0 : index
    %15 = vector.load %arg2[%c168, %c0_7] : memref<1064x128xf32, #tpu.memory_space<vmem>>, vector<4x128xf32>
    %16 = vector.extract_strided_slice %15 {offsets = [0, 0], sizes = [4, 64], strides = [1, 1]} : vector<4x128xf32> to vector<4x64xf32>
    %c172 = arith.constant 172 : index
    %c0_8 = arith.constant 0 : index
    %17 = vector.load %arg2[%c172, %c0_8] : memref<1064x128xf32, #tpu.memory_space<vmem>>, vector<1x128xf32>
    %18 = vector.extract_strided_slice %17 {offsets = [0, 0], sizes = [1, 64], strides = [1, 1]} : vector<1x128xf32> to vector<1x64xf32>
    %c8 = arith.constant 8 : index
    %c0_9 = arith.constant 0 : index
    %19 = vector.load %arg4[%c8, %c0_9] : memref<24x64xf32, #tpu.memory_space<vmem>>, vector<16x64xf32>
    tpu.vector_store %arg4[%c8, %c0_9], %13 {strides = array<i32>} : memref<24x64xf32, #tpu.memory_space<vmem>>, vector<16x64xf32>,
    %c8_10 = arith.constant 8 : index
    %c0_11 = arith.constant 0 : index
    %20 = vector.load %arg4[%c8_10, %c0_11] : memref<24x64xf32, #tpu.memory_space<vmem>>, vector<16x64xf32>
    %21 = vector.extract_strided_slice %16 {offsets = [3, 0], sizes = [1, 64], strides = [1, 1]} : vector<4x64xf32> to vector<1x64xf32>
    %22 = vector.broadcast %21 : vector<1x64xf32> to vector<16x64xf32>
    %23 = arith.mulf %20, %22 : vector<16x64xf32>
    %c6 = arith.constant 6 : index
    %c0_12 = arith.constant 0 : index
    %24 = vector.load %arg4[%c6, %c0_12] : memref<24x64xf32, #tpu.memory_space<vmem>>, vector<16x64xf32>
    %25 = vector.extract_strided_slice %16 {offsets = [2, 0], sizes = [1, 64], strides = [1, 1]} : vector<4x64xf32> to vector<1x64xf32>
    %26 = vector.broadcast %25 : vector<1x64xf32> to vector<16x64xf32>
    %27 = arith.mulf %24, %26 : vector<16x64xf32>
    %28 = arith.addf %23, %27 : vector<16x64xf32>
    %c4 = arith.constant 4 : index
    %c0_13 = arith.constant 0 : index
    %29 = vector.load %arg4[%c4, %c0_13] : memref<24x64xf32, #tpu.memory_space<vmem>>, vector<16x64xf32>
    %30 = vector.extract_strided_slice %16 {offsets = [1, 0], sizes = [1, 64], strides = [1, 1]} : vector<4x64xf32> to vector<1x64xf32>
    %31 = vector.broadcast %30 : vector<1x64xf32> to vector<16x64xf32>
    %32 = arith.mulf %29, %31 : vector<16x64xf32>
    %33 = arith.addf %28, %32 : vector<16x64xf32>
    %c2 = arith.constant 2 : index
    %c0_14 = arith.constant 0 : index
    %34 = vector.load %arg4[%c2, %c0_14] : memref<24x64xf32, #tpu.memory_space<vmem>>, vector<16x64xf32>
    %35 = vector.extract_strided_slice %16 {offsets = [0, 0], sizes = [1, 64], strides = [1, 1]} : vector<4x64xf32> to vector<1x64xf32>
    %36 = vector.broadcast %35 : vector<1x64xf32> to vector<16x64xf32>
    %37 = arith.mulf %34, %36 : vector<16x64xf32>
    %38 = arith.addf %33, %37 : vector<16x64xf32>
    %39 = vector.broadcast %18 : vector<1x64xf32> to vector<16x64xf32>
    %40 = arith.addf %38, %39 : vector<16x64xf32>
    %cst_15 = arith.constant 5.000000e-01 : f32
    %41 = vector.broadcast %cst_15 : f32 to vector<16x64xf32>
    %42 = arith.mulf %41, %40 : vector<16x64xf32>
    %43 = math.tanh %42 : vector<16x64xf32>
    %cst_16 = arith.constant 1.000000e+00 : f32
    %44 = vector.broadcast %cst_16 : f32 to vector<16x64xf32>
    %45 = arith.addf %44, %43 : vector<16x64xf32>
    %cst_17 = arith.constant 5.000000e-01 : f32
    %46 = vector.broadcast %cst_17 : f32 to vector<16x64xf32>
    %47 = arith.mulf %46, %45 : vector<16x64xf32>
    %48 = arith.mulf %40, %47 : vector<16x64xf32>
    %c32 = arith.constant 32 : index
    %c0_18 = arith.constant 0 : index
    %49 = vector.load %arg2[%c32, %c0_18] : memref<1064x128xf32, #tpu.memory_space<vmem>>, vector<64x128xf32>
    %cst_19 = arith.constant dense<0.000000e+00> : vector<16x128xf32>
    %50 = tpu.matmul %48, %49, %cst_19 {dimension_numbers = #tpu.dot_dimension_numbers<[1], [0], [0], [1], [0, 0, 1, 1], [], []>} : vector<16x64xf32>, vector<64x128xf32>, vector<16x128xf32> -> vector<16x128xf32>
    %c173 = arith.constant 173 : index
    %c0_20 = arith.constant 0 : index
    %51 = vector.load %arg2[%c173, %c0_20] : memref<1064x128xf32, #tpu.memory_space<vmem>>, vector<1x128xf32>
    %52 = vector.extract_strided_slice %51 {offsets = [0, 0], sizes = [1, 64], strides = [1, 1]} : vector<1x128xf32> to vector<1x64xf32>
    %53 = vector.extract_strided_slice %50 {offsets = [0, 0], sizes = [16, 64], strides = [1, 1]} : vector<16x128xf32> to vector<16x64xf32>
    %54 = vector.broadcast %52 : vector<1x64xf32> to vector<16x64xf32>
    %55 = arith.addf %53, %54 : vector<16x64xf32>
    %cst_21 = arith.constant 0.000000e+00 : f32
    %56 = vector.broadcast %cst_21 : f32 to vector<16x64xf32>
    %57 = arith.maximumf %55, %56 : vector<16x64xf32>
    %58 = math.absf %55 : vector<16x64xf32>
    %cst_22 = arith.constant 0.000000e+00 : f32
    %59 = vector.broadcast %cst_22 : f32 to vector<16x64xf32>
    %60 = arith.subf %59, %58 : vector<16x64xf32>
    %61 = math.exp %60 : vector<16x64xf32>
    %cst_23 = arith.constant 1.000000e+00 : f32
    %62 = vector.broadcast %cst_23 : f32 to vector<16x64xf32>
    %63 = arith.addf %62, %61 : vector<16x64xf32>
    %64 = math.log %63 : vector<16x64xf32>
    %65 = arith.addf %57, %64 : vector<16x64xf32>
    %66 = vector.extract_strided_slice %50 {offsets = [0, 64], sizes = [16, 8], strides = [1, 1]} : vector<16x128xf32> to vector<16x8xf32>
    %67 = vector.extract_strided_slice %50 {offsets = [0, 72], sizes = [16, 8], strides = [1, 1]} : vector<16x128xf32> to vector<16x8xf32>
    %68 = arith.mulf %65, %48 : vector<16x64xf32>
    %c160 = arith.constant 160 : index
    %c0_24 = arith.constant 0 : index
    %69 = vector.load %arg2[%c160, %c0_24] : memref<1064x128xf32, #tpu.memory_space<vmem>>, vector<8x128xf32>
    %70 = vector.extract_strided_slice %69 {offsets = [0, 0], sizes = [8, 64], strides = [1, 1]} : vector<8x128xf32> to vector<8x64xf32>
    %71 = vector.shape_cast %70 : vector<8x64xf32> to vector<1x8x64xf32>
    %72 = vector.extract_strided_slice %68 {offsets = [0, 0], sizes = [1, 64], strides = [1, 1]} : vector<16x64xf32> to vector<1x64xf32>
    %73 = vector.shape_cast %72 : vector<1x64xf32> to vector<1x1x64xf32>
    %74 = vector.extract_strided_slice %66 {offsets = [0, 0], sizes = [1, 8], strides = [1, 1]} : vector<16x8xf32> to vector<1x8xf32>
    %75 = vector.shape_cast %74 : vector<1x8xf32> to vector<1x8x1xf32>
    %76 = vector.broadcast %73 : vector<1x1x64xf32> to vector<1x8x64xf32>
    %77 = vector.broadcast %75 : vector<1x8x1xf32> to vector<1x8x64xf32>
    %78 = arith.mulf %76, %77 : vector<1x8x64xf32>
    %79 = vector.extract_strided_slice %67 {offsets = [0, 0], sizes = [1, 8], strides = [1, 1]} : vector<16x8xf32> to vector<1x8xf32>
    %80 = vector.shape_cast %79 : vector<1x8xf32> to vector<1x8x1xf32>
    %81 = vector.extract_strided_slice %68 {offsets = [1, 0], sizes = [1, 64], strides = [1, 1]} : vector<16x64xf32> to vector<1x64xf32>
    %82 = vector.shape_cast %81 : vector<1x64xf32> to vector<1x1x64xf32>
    %83 = vector.extract_strided_slice %66 {offsets = [1, 0], sizes = [1, 8], strides = [1, 1]} : vector<16x8xf32> to vector<1x8xf32>
    %84 = vector.shape_cast %83 : vector<1x8xf32> to vector<1x8x1xf32>
    %85 = vector.broadcast %82 : vector<1x1x64xf32> to vector<1x8x64xf32>
    %86 = vector.broadcast %84 : vector<1x8x1xf32> to vector<1x8x64xf32>
    %87 = arith.mulf %85, %86 : vector<1x8x64xf32>
    %88 = vector.extract_strided_slice %67 {offsets = [1, 0], sizes = [1, 8], strides = [1, 1]} : vector<16x8xf32> to vector<1x8xf32>
    %89 = vector.shape_cast %88 : vector<1x8xf32> to vector<1x8x1xf32>
    %90 = vector.extract_strided_slice %65 {offsets = [2, 0], sizes = [1, 64], strides = [1, 1]} : vector<16x64xf32> to vector<1x64xf32>
    %91 = vector.shape_cast %90 : vector<1x64xf32> to vector<1x1x64xf32>
    %92 = vector.broadcast %91 : vector<1x1x64xf32> to vector<1x8x64xf32>
    %93 = arith.mulf %92, %71 : vector<1x8x64xf32>
    %94 = math.exp %93 : vector<1x8x64xf32>
    %95 = vector.extract_strided_slice %68 {offsets = [2, 0], sizes = [1, 64], strides = [1, 1]} : vector<16x64xf32> to vector<1x64xf32>
    %96 = vector.shape_cast %95 : vector<1x64xf32> to vector<1x1x64xf32>
    %97 = vector.extract_strided_slice %66 {offsets = [2, 0], sizes = [1, 8], strides = [1, 1]} : vector<16x8xf32> to vector<1x8xf32>
    %98 = vector.shape_cast %97 : vector<1x8xf32> to vector<1x8x1xf32>
    %99 = vector.broadcast %96 : vector<1x1x64xf32> to vector<1x8x64xf32>
    %100 = vector.broadcast %98 : vector<1x8x1xf32> to vector<1x8x64xf32>
    %101 = arith.mulf %99, %100 : vector<1x8x64xf32>
    %102 = vector.extract_strided_slice %67 {offsets = [2, 0], sizes = [1, 8], strides = [1, 1]} : vector<16x8xf32> to vector<1x8xf32>
    %103 = vector.shape_cast %102 : vector<1x8xf32> to vector<1x8x1xf32>
    %104 = vector.extract_strided_slice %65 {offsets = [3, 0], sizes = [1, 64], strides = [1, 1]} : vector<16x64xf32> to vector<1x64xf32>
    %105 = vector.shape_cast %104 : vector<1x64xf32> to vector<1x1x64xf32>
    %106 = vector.broadcast %105 : vector<1x1x64xf32> to vector<1x8x64xf32>
    %107 = arith.mulf %106, %71 : vector<1x8x64xf32>
    %108 = math.exp %107 : vector<1x8x64xf32>
    %109 = vector.extract_strided_slice %68 {offsets = [3, 0], sizes = [1, 64], strides = [1, 1]} : vector<16x64xf32> to vector<1x64xf32>
    %110 = vector.shape_cast %109 : vector<1x64xf32> to vector<1x1x64xf32>
    %111 = vector.extract_strided_slice %66 {offsets = [3, 0], sizes = [1, 8], strides = [1, 1]} : vector<16x8xf32> to vector<1x8xf32>
    %112 = vector.shape_cast %111 : vector<1x8xf32> to vector<1x8x1xf32>
    %113 = vector.broadcast %110 : vector<1x1x64xf32> to vector<1x8x64xf32>
    %114 = vector.broadcast %112 : vector<1x8x1xf32> to vector<1x8x64xf32>
    %115 = arith.mulf %113, %114 : vector<1x8x64xf32>
    %116 = vector.extract_strided_slice %67 {offsets = [3, 0], sizes = [1, 8], strides = [1, 1]} : vector<16x8xf32> to vector<1x8xf32>
    %117 = vector.shape_cast %116 : vector<1x8xf32> to vector<1x8x1xf32>
    %118 = vector.extract_strided_slice %65 {offsets = [4, 0], sizes = [1, 64], strides = [1, 1]} : vector<16x64xf32> to vector<1x64xf32>
    %119 = vector.shape_cast %118 : vector<1x64xf32> to vector<1x1x64xf32>
    %120 = vector.broadcast %119 : vector<1x1x64xf32> to vector<1x8x64xf32>
    %121 = arith.mulf %120, %71 : vector<1x8x64xf32>
    %122 = math.exp %121 : vector<1x8x64xf32>
    %123 = vector.extract_strided_slice %68 {offsets = [4, 0], sizes = [1, 64], strides = [1, 1]} : vector<16x64xf32> to vector<1x64xf32>
    %124 = vector.shape_cast %123 : vector<1x64xf32> to vector<1x1x64xf32>
    %125 = vector.extract_strided_slice %66 {offsets = [4, 0], sizes = [1, 8], strides = [1, 1]} : vector<16x8xf32> to vector<1x8xf32>
    %126 = vector.shape_cast %125 : vector<1x8xf32> to vector<1x8x1xf32>
    %127 = vector.broadcast %124 : vector<1x1x64xf32> to vector<1x8x64xf32>
    %128 = vector.broadcast %126 : vector<1x8x1xf32> to vector<1x8x64xf32>
    %129 = arith.mulf %127, %128 : vector<1x8x64xf32>
    %130 = vector.extract_strided_slice %67 {offsets = [4, 0], sizes = [1, 8], strides = [1, 1]} : vector<16x8xf32> to vector<1x8xf32>
    %131 = vector.shape_cast %130 : vector<1x8xf32> to vector<1x8x1xf32>
    %132 = vector.extract_strided_slice %65 {offsets = [5, 0], sizes = [1, 64], strides = [1, 1]} : vector<16x64xf32> to vector<1x64xf32>
    %133 = vector.shape_cast %132 : vector<1x64xf32> to vector<1x1x64xf32>
    %134 = vector.broadcast %133 : vector<1x1x64xf32> to vector<1x8x64xf32>
    %135 = arith.mulf %134, %71 : vector<1x8x64xf32>
    %136 = math.exp %135 : vector<1x8x64xf32>
    %137 = vector.extract_strided_slice %68 {offsets = [5, 0], sizes = [1, 64], strides = [1, 1]} : vector<16x64xf32> to vector<1x64xf32>
    %138 = vector.shape_cast %137 : vector<1x64xf32> to vector<1x1x64xf32>
    %139 = vector.extract_strided_slice %66 {offsets = [5, 0], sizes = [1, 8], strides = [1, 1]} : vector<16x8xf32> to vector<1x8xf32>
    %140 = vector.shape_cast %139 : vector<1x8xf32> to vector<1x8x1xf32>
    %141 = vector.broadcast %138 : vector<1x1x64xf32> to vector<1x8x64xf32>
    %142 = vector.broadcast %140 : vector<1x8x1xf32> to vector<1x8x64xf32>
    %143 = arith.mulf %141, %142 : vector<1x8x64xf32>
    %144 = vector.extract_strided_slice %67 {offsets = [5, 0], sizes = [1, 8], strides = [1, 1]} : vector<16x8xf32> to vector<1x8xf32>
    %145 = vector.shape_cast %144 : vector<1x8xf32> to vector<1x8x1xf32>
    %146 = vector.extract_strided_slice %65 {offsets = [6, 0], sizes = [1, 64], strides = [1, 1]} : vector<16x64xf32> to vector<1x64xf32>
    %147 = vector.shape_cast %146 : vector<1x64xf32> to vector<1x1x64xf32>
    %148 = vector.broadcast %147 : vector<1x1x64xf32> to vector<1x8x64xf32>
    %149 = arith.mulf %148, %71 : vector<1x8x64xf32>
    %150 = math.exp %149 : vector<1x8x64xf32>
    %151 = vector.extract_strided_slice %68 {offsets = [6, 0], sizes = [1, 64], strides = [1, 1]} : vector<16x64xf32> to vector<1x64xf32>
    %152 = vector.shape_cast %151 : vector<1x64xf32> to vector<1x1x64xf32>
    %153 = vector.extract_strided_slice %66 {offsets = [6, 0], sizes = [1, 8], strides = [1, 1]} : vector<16x8xf32> to vector<1x8xf32>
    %154 = vector.shape_cast %153 : vector<1x8xf32> to vector<1x8x1xf32>
    %155 = vector.broadcast %152 : vector<1x1x64xf32> to vector<1x8x64xf32>
    %156 = vector.broadcast %154 : vector<1x8x1xf32> to vector<1x8x64xf32>
    %157 = arith.mulf %155, %156 : vector<1x8x64xf32>
    %158 = vector.extract_strided_slice %67 {offsets = [6, 0], sizes = [1, 8], strides = [1, 1]} : vector<16x8xf32> to vector<1x8xf32>
    %159 = vector.shape_cast %158 : vector<1x8xf32> to vector<1x8x1xf32>
    %160 = vector.extract_strided_slice %65 {offsets = [7, 0], sizes = [1, 64], strides = [1, 1]} : vector<16x64xf32> to vector<1x64xf32>
    %161 = vector.shape_cast %160 : vector<1x64xf32> to vector<1x1x64xf32>
    %162 = vector.broadcast %161 : vector<1x1x64xf32> to vector<1x8x64xf32>
    %163 = arith.mulf %162, %71 : vector<1x8x64xf32>
    %164 = math.exp %163 : vector<1x8x64xf32>
    %165 = vector.extract_strided_slice %68 {offsets = [7, 0], sizes = [1, 64], strides = [1, 1]} : vector<16x64xf32> to vector<1x64xf32>
    %166 = vector.shape_cast %165 : vector<1x64xf32> to vector<1x1x64xf32>
    %167 = vector.extract_strided_slice %66 {offsets = [7, 0], sizes = [1, 8], strides = [1, 1]} : vector<16x8xf32> to vector<1x8xf32>
    %168 = vector.shape_cast %167 : vector<1x8xf32> to vector<1x8x1xf32>
    %169 = vector.broadcast %166 : vector<1x1x64xf32> to vector<1x8x64xf32>
    %170 = vector.broadcast %168 : vector<1x8x1xf32> to vector<1x8x64xf32>
    %171 = arith.mulf %169, %170 : vector<1x8x64xf32>
    %172 = vector.extract_strided_slice %67 {offsets = [7, 0], sizes = [1, 8], strides = [1, 1]} : vector<16x8xf32> to vector<1x8xf32>
    %173 = vector.shape_cast %172 : vector<1x8xf32> to vector<1x8x1xf32>
    %174 = vector.extract_strided_slice %65 {offsets = [8, 0], sizes = [1, 64], strides = [1, 1]} : vector<16x64xf32> to vector<1x64xf32>
    %175 = vector.shape_cast %174 : vector<1x64xf32> to vector<1x1x64xf32>
    %176 = vector.broadcast %175 : vector<1x1x64xf32> to vector<1x8x64xf32>
    %177 = arith.mulf %176, %71 : vector<1x8x64xf32>
    %178 = math.exp %177 : vector<1x8x64xf32>
    %179 = vector.extract_strided_slice %68 {offsets = [8, 0], sizes = [1, 64], strides = [1, 1]} : vector<16x64xf32> to vector<1x64xf32>
    %180 = vector.shape_cast %179 : vector<1x64xf32> to vector<1x1x64xf32>
    %181 = vector.extract_strided_slice %66 {offsets = [8, 0], sizes = [1, 8], strides = [1, 1]} : vector<16x8xf32> to vector<1x8xf32>
    %182 = vector.shape_cast %181 : vector<1x8xf32> to vector<1x8x1xf32>
    %183 = vector.broadcast %180 : vector<1x1x64xf32> to vector<1x8x64xf32>
    %184 = vector.broadcast %182 : vector<1x8x1xf32> to vector<1x8x64xf32>
    %185 = arith.mulf %183, %184 : vector<1x8x64xf32>
    %186 = vector.extract_strided_slice %67 {offsets = [8, 0], sizes = [1, 8], strides = [1, 1]} : vector<16x8xf32> to vector<1x8xf32>
    %187 = vector.shape_cast %186 : vector<1x8xf32> to vector<1x8x1xf32>
    %188 = vector.extract_strided_slice %65 {offsets = [9, 0], sizes = [1, 64], strides = [1, 1]} : vector<16x64xf32> to vector<1x64xf32>
    %189 = vector.shape_cast %188 : vector<1x64xf32> to vector<1x1x64xf32>
    %190 = vector.broadcast %189 : vector<1x1x64xf32> to vector<1x8x64xf32>
    %191 = arith.mulf %190, %71 : vector<1x8x64xf32>
    %192 = math.exp %191 : vector<1x8x64xf32>
    %193 = vector.extract_strided_slice %68 {offsets = [9, 0], sizes = [1, 64], strides = [1, 1]} : vector<16x64xf32> to vector<1x64xf32>
    %194 = vector.shape_cast %193 : vector<1x64xf32> to vector<1x1x64xf32>
    %195 = vector.extract_strided_slice %66 {offsets = [9, 0], sizes = [1, 8], strides = [1, 1]} : vector<16x8xf32> to vector<1x8xf32>
    %196 = vector.shape_cast %195 : vector<1x8xf32> to vector<1x8x1xf32>
    %197 = vector.broadcast %194 : vector<1x1x64xf32> to vector<1x8x64xf32>
    %198 = vector.broadcast %196 : vector<1x8x1xf32> to vector<1x8x64xf32>
    %199 = arith.mulf %197, %198 : vector<1x8x64xf32>
    %200 = vector.extract_strided_slice %67 {offsets = [9, 0], sizes = [1, 8], strides = [1, 1]} : vector<16x8xf32> to vector<1x8xf32>
    %201 = vector.shape_cast %200 : vector<1x8xf32> to vector<1x8x1xf32>
    %202 = vector.extract_strided_slice %65 {offsets = [10, 0], sizes = [1, 64], strides = [1, 1]} : vector<16x64xf32> to vector<1x64xf32>
    %203 = vector.shape_cast %202 : vector<1x64xf32> to vector<1x1x64xf32>
    %204 = vector.broadcast %203 : vector<1x1x64xf32> to vector<1x8x64xf32>
    %205 = arith.mulf %204, %71 : vector<1x8x64xf32>
    %206 = math.exp %205 : vector<1x8x64xf32>
    %207 = vector.extract_strided_slice %68 {offsets = [10, 0], sizes = [1, 64], strides = [1, 1]} : vector<16x64xf32> to vector<1x64xf32>
    %208 = vector.shape_cast %207 : vector<1x64xf32> to vector<1x1x64xf32>
    %209 = vector.extract_strided_slice %66 {offsets = [10, 0], sizes = [1, 8], strides = [1, 1]} : vector<16x8xf32> to vector<1x8xf32>
    %210 = vector.shape_cast %209 : vector<1x8xf32> to vector<1x8x1xf32>
    %211 = vector.broadcast %208 : vector<1x1x64xf32> to vector<1x8x64xf32>
    %212 = vector.broadcast %210 : vector<1x8x1xf32> to vector<1x8x64xf32>
    %213 = arith.mulf %211, %212 : vector<1x8x64xf32>
    %214 = vector.extract_strided_slice %67 {offsets = [10, 0], sizes = [1, 8], strides = [1, 1]} : vector<16x8xf32> to vector<1x8xf32>
    %215 = vector.shape_cast %214 : vector<1x8xf32> to vector<1x8x1xf32>
    %216 = vector.extract_strided_slice %65 {offsets = [11, 0], sizes = [1, 64], strides = [1, 1]} : vector<16x64xf32> to vector<1x64xf32>
    %217 = vector.shape_cast %216 : vector<1x64xf32> to vector<1x1x64xf32>
    %218 = vector.broadcast %217 : vector<1x1x64xf32> to vector<1x8x64xf32>
    %219 = arith.mulf %218, %71 : vector<1x8x64xf32>
    %220 = math.exp %219 : vector<1x8x64xf32>
    %221 = vector.extract_strided_slice %68 {offsets = [11, 0], sizes = [1, 64], strides = [1, 1]} : vector<16x64xf32> to vector<1x64xf32>
    %222 = vector.shape_cast %221 : vector<1x64xf32> to vector<1x1x64xf32>
    %223 = vector.extract_strided_slice %66 {offsets = [11, 0], sizes = [1, 8], strides = [1, 1]} : vector<16x8xf32> to vector<1x8xf32>
    %224 = vector.shape_cast %223 : vector<1x8xf32> to vector<1x8x1xf32>
    %225 = vector.broadcast %222 : vector<1x1x64xf32> to vector<1x8x64xf32>
    %226 = vector.broadcast %224 : vector<1x8x1xf32> to vector<1x8x64xf32>
    %227 = arith.mulf %225, %226 : vector<1x8x64xf32>
    %228 = vector.extract_strided_slice %67 {offsets = [11, 0], sizes = [1, 8], strides = [1, 1]} : vector<16x8xf32> to vector<1x8xf32>
    %229 = vector.shape_cast %228 : vector<1x8xf32> to vector<1x8x1xf32>
    %230 = vector.extract_strided_slice %65 {offsets = [12, 0], sizes = [1, 64], strides = [1, 1]} : vector<16x64xf32> to vector<1x64xf32>
    %231 = vector.shape_cast %230 : vector<1x64xf32> to vector<1x1x64xf32>
    %232 = vector.broadcast %231 : vector<1x1x64xf32> to vector<1x8x64xf32>
    %233 = arith.mulf %232, %71 : vector<1x8x64xf32>
    %234 = math.exp %233 : vector<1x8x64xf32>
    %235 = vector.extract_strided_slice %68 {offsets = [12, 0], sizes = [1, 64], strides = [1, 1]} : vector<16x64xf32> to vector<1x64xf32>
    %236 = vector.shape_cast %235 : vector<1x64xf32> to vector<1x1x64xf32>
    %237 = vector.extract_strided_slice %66 {offsets = [12, 0], sizes = [1, 8], strides = [1, 1]} : vector<16x8xf32> to vector<1x8xf32>
    %238 = vector.shape_cast %237 : vector<1x8xf32> to vector<1x8x1xf32>
    %239 = vector.broadcast %236 : vector<1x1x64xf32> to vector<1x8x64xf32>
    %240 = vector.broadcast %238 : vector<1x8x1xf32> to vector<1x8x64xf32>
    %241 = arith.mulf %239, %240 : vector<1x8x64xf32>
    %242 = vector.extract_strided_slice %67 {offsets = [12, 0], sizes = [1, 8], strides = [1, 1]} : vector<16x8xf32> to vector<1x8xf32>
    %243 = vector.shape_cast %242 : vector<1x8xf32> to vector<1x8x1xf32>
    %244 = vector.extract_strided_slice %65 {offsets = [13, 0], sizes = [1, 64], strides = [1, 1]} : vector<16x64xf32> to vector<1x64xf32>
    %245 = vector.shape_cast %244 : vector<1x64xf32> to vector<1x1x64xf32>
    %246 = vector.broadcast %245 : vector<1x1x64xf32> to vector<1x8x64xf32>
    %247 = arith.mulf %246, %71 : vector<1x8x64xf32>
    %248 = math.exp %247 : vector<1x8x64xf32>
    %249 = vector.extract_strided_slice %68 {offsets = [13, 0], sizes = [1, 64], strides = [1, 1]} : vector<16x64xf32> to vector<1x64xf32>
    %250 = vector.shape_cast %249 : vector<1x64xf32> to vector<1x1x64xf32>
    %251 = vector.extract_strided_slice %66 {offsets = [13, 0], sizes = [1, 8], strides = [1, 1]} : vector<16x8xf32> to vector<1x8xf32>
    %252 = vector.shape_cast %251 : vector<1x8xf32> to vector<1x8x1xf32>
    %253 = vector.broadcast %250 : vector<1x1x64xf32> to vector<1x8x64xf32>
    %254 = vector.broadcast %252 : vector<1x8x1xf32> to vector<1x8x64xf32>
    %255 = arith.mulf %253, %254 : vector<1x8x64xf32>
    %256 = vector.extract_strided_slice %67 {offsets = [13, 0], sizes = [1, 8], strides = [1, 1]} : vector<16x8xf32> to vector<1x8xf32>
    %257 = vector.shape_cast %256 : vector<1x8xf32> to vector<1x8x1xf32>
    %258 = vector.extract_strided_slice %65 {offsets = [14, 0], sizes = [1, 64], strides = [1, 1]} : vector<16x64xf32> to vector<1x64xf32>
    %259 = vector.shape_cast %258 : vector<1x64xf32> to vector<1x1x64xf32>
    %260 = vector.broadcast %259 : vector<1x1x64xf32> to vector<1x8x64xf32>
    %261 = arith.mulf %260, %71 : vector<1x8x64xf32>
    %262 = math.exp %261 : vector<1x8x64xf32>
    %263 = vector.extract_strided_slice %68 {offsets = [14, 0], sizes = [1, 64], strides = [1, 1]} : vector<16x64xf32> to vector<1x64xf32>
    %264 = vector.shape_cast %263 : vector<1x64xf32> to vector<1x1x64xf32>
    %265 = vector.extract_strided_slice %66 {offsets = [14, 0], sizes = [1, 8], strides = [1, 1]} : vector<16x8xf32> to vector<1x8xf32>
    %266 = vector.shape_cast %265 : vector<1x8xf32> to vector<1x8x1xf32>
    %267 = vector.broadcast %264 : vector<1x1x64xf32> to vector<1x8x64xf32>
    %268 = vector.broadcast %266 : vector<1x8x1xf32> to vector<1x8x64xf32>
    %269 = arith.mulf %267, %268 : vector<1x8x64xf32>
    %270 = vector.extract_strided_slice %67 {offsets = [14, 0], sizes = [1, 8], strides = [1, 1]} : vector<16x8xf32> to vector<1x8xf32>
    %271 = vector.shape_cast %270 : vector<1x8xf32> to vector<1x8x1xf32>
    %272 = vector.extract_strided_slice %65 {offsets = [15, 0], sizes = [1, 64], strides = [1, 1]} : vector<16x64xf32> to vector<1x64xf32>
    %273 = vector.shape_cast %272 : vector<1x64xf32> to vector<1x1x64xf32>
    %274 = vector.broadcast %273 : vector<1x1x64xf32> to vector<1x8x64xf32>
    %275 = arith.mulf %274, %71 : vector<1x8x64xf32>
    %276 = math.exp %275 : vector<1x8x64xf32>
    %277 = vector.extract_strided_slice %68 {offsets = [15, 0], sizes = [1, 64], strides = [1, 1]} : vector<16x64xf32> to vector<1x64xf32>
    %278 = vector.shape_cast %277 : vector<1x64xf32> to vector<1x1x64xf32>
    %279 = vector.extract_strided_slice %66 {offsets = [15, 0], sizes = [1, 8], strides = [1, 1]} : vector<16x8xf32> to vector<1x8xf32>
    %280 = vector.shape_cast %279 : vector<1x8xf32> to vector<1x8x1xf32>
    %281 = vector.broadcast %278 : vector<1x1x64xf32> to vector<1x8x64xf32>
    %282 = vector.broadcast %280 : vector<1x8x1xf32> to vector<1x8x64xf32>
    %283 = arith.mulf %281, %282 : vector<1x8x64xf32>
    %284 = vector.extract_strided_slice %67 {offsets = [15, 0], sizes = [1, 8], strides = [1, 1]} : vector<16x8xf32> to vector<1x8xf32>
    %285 = vector.shape_cast %284 : vector<1x8xf32> to vector<1x8x1xf32>
    %286 = tpu.concatenate %78, %87 in 0 : vector<1x8x64xf32>, vector<1x8x64xf32> -> vector<2x8x64xf32>
    %287 = tpu.concatenate %80, %89 in 0 : vector<1x8x1xf32>, vector<1x8x1xf32> -> vector<2x8x1xf32>
    %288 = vector.broadcast %287 : vector<2x8x1xf32> to vector<2x8x64xf32>
    %289 = arith.mulf %286, %288 : vector<2x8x64xf32>
    %cst_25 = arith.constant dense<0.000000e+00> : vector<2x64xf32>
    %290 = vector.multi_reduction <add>, %289, %cst_25 [1] : vector<2x8x64xf32> to vector<2x64xf32>
    %c0_26 = arith.constant 0 : index
    %c0_27 = arith.constant 0 : index
    %291 = vector.load %arg5[%c0_26, %c0_27] : memref<16x64xf32, #tpu.memory_space<vmem>>, vector<2x64xf32>
    tpu.vector_store %arg5[%c0_26, %c0_27], %290 {strides = array<i32>} : memref<16x64xf32, #tpu.memory_space<vmem>>, vector<2x64xf32>,
    %292 = tpu.concatenate %94, %108 in 0 : vector<1x8x64xf32>, vector<1x8x64xf32> -> vector<2x8x64xf32>
    %293 = arith.mulf %286, %292 : vector<2x8x64xf32>
    %294 = tpu.concatenate %101, %115 in 0 : vector<1x8x64xf32>, vector<1x8x64xf32> -> vector<2x8x64xf32>
    %295 = arith.addf %293, %294 : vector<2x8x64xf32>
    %296 = tpu.concatenate %103, %117 in 0 : vector<1x8x1xf32>, vector<1x8x1xf32> -> vector<2x8x1xf32>
    %297 = vector.broadcast %296 : vector<2x8x1xf32> to vector<2x8x64xf32>
    %298 = arith.mulf %295, %297 : vector<2x8x64xf32>
    %cst_28 = arith.constant dense<0.000000e+00> : vector<2x64xf32>
    %299 = vector.multi_reduction <add>, %298, %cst_28 [1] : vector<2x8x64xf32> to vector<2x64xf32>
    %c2_29 = arith.constant 2 : index
    %c0_30 = arith.constant 0 : index
    %300 = vector.load %arg5[%c2_29, %c0_30] : memref<16x64xf32, #tpu.memory_space<vmem>>, vector<2x64xf32>
    tpu.vector_store %arg5[%c2_29, %c0_30], %299 {strides = array<i32>} : memref<16x64xf32, #tpu.memory_space<vmem>>, vector<2x64xf32>,
    %301 = tpu.concatenate %122, %136 in 0 : vector<1x8x64xf32>, vector<1x8x64xf32> -> vector<2x8x64xf32>
    %302 = arith.mulf %295, %301 : vector<2x8x64xf32>
    %303 = tpu.concatenate %129, %143 in 0 : vector<1x8x64xf32>, vector<1x8x64xf32> -> vector<2x8x64xf32>
    %304 = arith.addf %302, %303 : vector<2x8x64xf32>
    %305 = tpu.concatenate %131, %145 in 0 : vector<1x8x1xf32>, vector<1x8x1xf32> -> vector<2x8x1xf32>
    %306 = vector.broadcast %305 : vector<2x8x1xf32> to vector<2x8x64xf32>
    %307 = arith.mulf %304, %306 : vector<2x8x64xf32>
    %cst_31 = arith.constant dense<0.000000e+00> : vector<2x64xf32>
    %308 = vector.multi_reduction <add>, %307, %cst_31 [1] : vector<2x8x64xf32> to vector<2x64xf32>
    %c4_32 = arith.constant 4 : index
    %c0_33 = arith.constant 0 : index
    %309 = vector.load %arg5[%c4_32, %c0_33] : memref<16x64xf32, #tpu.memory_space<vmem>>, vector<2x64xf32>
    tpu.vector_store %arg5[%c4_32, %c0_33], %308 {strides = array<i32>} : memref<16x64xf32, #tpu.memory_space<vmem>>, vector<2x64xf32>,
    %310 = tpu.concatenate %150, %164 in 0 : vector<1x8x64xf32>, vector<1x8x64xf32> -> vector<2x8x64xf32>
    %311 = arith.mulf %304, %310 : vector<2x8x64xf32>
    %312 = tpu.concatenate %157, %171 in 0 : vector<1x8x64xf32>, vector<1x8x64xf32> -> vector<2x8x64xf32>
    %313 = arith.addf %311, %312 : vector<2x8x64xf32>
    %314 = tpu.concatenate %159, %173 in 0 : vector<1x8x1xf32>, vector<1x8x1xf32> -> vector<2x8x1xf32>
    %315 = vector.broadcast %314 : vector<2x8x1xf32> to vector<2x8x64xf32>
    %316 = arith.mulf %313, %315 : vector<2x8x64xf32>
    %cst_34 = arith.constant dense<0.000000e+00> : vector<2x64xf32>
    %317 = vector.multi_reduction <add>, %316, %cst_34 [1] : vector<2x8x64xf32> to vector<2x64xf32>
    %c6_35 = arith.constant 6 : index
    %c0_36 = arith.constant 0 : index
    %318 = vector.load %arg5[%c6_35, %c0_36] : memref<16x64xf32, #tpu.memory_space<vmem>>, vector<2x64xf32>
    tpu.vector_store %arg5[%c6_35, %c0_36], %317 {strides = array<i32>} : memref<16x64xf32, #tpu.memory_space<vmem>>, vector<2x64xf32>,
    %319 = tpu.concatenate %178, %192 in 0 : vector<1x8x64xf32>, vector<1x8x64xf32> -> vector<2x8x64xf32>
    %320 = arith.mulf %313, %319 : vector<2x8x64xf32>
    %321 = tpu.concatenate %185, %199 in 0 : vector<1x8x64xf32>, vector<1x8x64xf32> -> vector<2x8x64xf32>
    %322 = arith.addf %320, %321 : vector<2x8x64xf32>
    %323 = tpu.concatenate %187, %201 in 0 : vector<1x8x1xf32>, vector<1x8x1xf32> -> vector<2x8x1xf32>
    %324 = vector.broadcast %323 : vector<2x8x1xf32> to vector<2x8x64xf32>
    %325 = arith.mulf %322, %324 : vector<2x8x64xf32>
    %cst_37 = arith.constant dense<0.000000e+00> : vector<2x64xf32>
    %326 = vector.multi_reduction <add>, %325, %cst_37 [1] : vector<2x8x64xf32> to vector<2x64xf32>
    %c8_38 = arith.constant 8 : index
    %c0_39 = arith.constant 0 : index
    %327 = vector.load %arg5[%c8_38, %c0_39] : memref<16x64xf32, #tpu.memory_space<vmem>>, vector<2x64xf32>
    tpu.vector_store %arg5[%c8_38, %c0_39], %326 {strides = array<i32>} : memref<16x64xf32, #tpu.memory_space<vmem>>, vector<2x64xf32>,
    %328 = tpu.concatenate %206, %220 in 0 : vector<1x8x64xf32>, vector<1x8x64xf32> -> vector<2x8x64xf32>
    %329 = arith.mulf %322, %328 : vector<2x8x64xf32>
    %330 = tpu.concatenate %213, %227 in 0 : vector<1x8x64xf32>, vector<1x8x64xf32> -> vector<2x8x64xf32>
    %331 = arith.addf %329, %330 : vector<2x8x64xf32>
    %332 = tpu.concatenate %215, %229 in 0 : vector<1x8x1xf32>, vector<1x8x1xf32> -> vector<2x8x1xf32>
    %333 = vector.broadcast %332 : vector<2x8x1xf32> to vector<2x8x64xf32>
    %334 = arith.mulf %331, %333 : vector<2x8x64xf32>
    %cst_40 = arith.constant dense<0.000000e+00> : vector<2x64xf32>
    %335 = vector.multi_reduction <add>, %334, %cst_40 [1] : vector<2x8x64xf32> to vector<2x64xf32>
    %c10 = arith.constant 10 : index
    %c0_41 = arith.constant 0 : index
    %336 = vector.load %arg5[%c10, %c0_41] : memref<16x64xf32, #tpu.memory_space<vmem>>, vector<2x64xf32>
    tpu.vector_store %arg5[%c10, %c0_41], %335 {strides = array<i32>} : memref<16x64xf32, #tpu.memory_space<vmem>>, vector<2x64xf32>,
    %337 = tpu.concatenate %234, %248 in 0 : vector<1x8x64xf32>, vector<1x8x64xf32> -> vector<2x8x64xf32>
    %338 = arith.mulf %331, %337 : vector<2x8x64xf32>
    %339 = tpu.concatenate %241, %255 in 0 : vector<1x8x64xf32>, vector<1x8x64xf32> -> vector<2x8x64xf32>
    %340 = arith.addf %338, %339 : vector<2x8x64xf32>
    %341 = tpu.concatenate %243, %257 in 0 : vector<1x8x1xf32>, vector<1x8x1xf32> -> vector<2x8x1xf32>
    %342 = vector.broadcast %341 : vector<2x8x1xf32> to vector<2x8x64xf32>
    %343 = arith.mulf %340, %342 : vector<2x8x64xf32>
    %cst_42 = arith.constant dense<0.000000e+00> : vector<2x64xf32>
    %344 = vector.multi_reduction <add>, %343, %cst_42 [1] : vector<2x8x64xf32> to vector<2x64xf32>
    %c12 = arith.constant 12 : index
    %c0_43 = arith.constant 0 : index
    %345 = vector.load %arg5[%c12, %c0_43] : memref<16x64xf32, #tpu.memory_space<vmem>>, vector<2x64xf32>
    tpu.vector_store %arg5[%c12, %c0_43], %344 {strides = array<i32>} : memref<16x64xf32, #tpu.memory_space<vmem>>, vector<2x64xf32>,
    %346 = tpu.concatenate %262, %276 in 0 : vector<1x8x64xf32>, vector<1x8x64xf32> -> vector<2x8x64xf32>
    %347 = arith.mulf %340, %346 : vector<2x8x64xf32>
    %348 = tpu.concatenate %269, %283 in 0 : vector<1x8x64xf32>, vector<1x8x64xf32> -> vector<2x8x64xf32>
    %349 = arith.addf %347, %348 : vector<2x8x64xf32>
    %350 = tpu.concatenate %271, %285 in 0 : vector<1x8x1xf32>, vector<1x8x1xf32> -> vector<2x8x1xf32>
    %351 = vector.broadcast %350 : vector<2x8x1xf32> to vector<2x8x64xf32>
    %352 = arith.mulf %349, %351 : vector<2x8x64xf32>
    %cst_44 = arith.constant dense<0.000000e+00> : vector<2x64xf32>
    %353 = vector.multi_reduction <add>, %352, %cst_44 [1] : vector<2x8x64xf32> to vector<2x64xf32>
    %c14 = arith.constant 14 : index
    %c0_45 = arith.constant 0 : index
    %354 = vector.load %arg5[%c14, %c0_45] : memref<16x64xf32, #tpu.memory_space<vmem>>, vector<2x64xf32>
    tpu.vector_store %arg5[%c14, %c0_45], %353 {strides = array<i32>} : memref<16x64xf32, #tpu.memory_space<vmem>>, vector<2x64xf32>,
    %c0_46 = arith.constant 0 : index
    %c0_47 = arith.constant 0 : index
    %355 = vector.load %arg5[%c0_46, %c0_47] : memref<16x64xf32, #tpu.memory_space<vmem>>, vector<16x64xf32>
    %c174 = arith.constant 174 : index
    %c0_48 = arith.constant 0 : index
    %356 = vector.load %arg2[%c174, %c0_48] : memref<1064x128xf32, #tpu.memory_space<vmem>>, vector<1x128xf32>
    %357 = vector.extract_strided_slice %356 {offsets = [0, 0], sizes = [1, 64], strides = [1, 1]} : vector<1x128xf32> to vector<1x64xf32>
    %358 = vector.broadcast %357 : vector<1x64xf32> to vector<16x64xf32>
    %359 = arith.mulf %358, %48 : vector<16x64xf32>
    %360 = arith.addf %355, %359 : vector<16x64xf32>
    %cst_49 = arith.constant 5.000000e-01 : f32
    %361 = vector.broadcast %cst_49 : f32 to vector<16x64xf32>
    %362 = arith.mulf %361, %14 : vector<16x64xf32>
    %363 = math.tanh %362 : vector<16x64xf32>
    %cst_50 = arith.constant 1.000000e+00 : f32
    %364 = vector.broadcast %cst_50 : f32 to vector<16x64xf32>
    %365 = arith.addf %364, %363 : vector<16x64xf32>
    %cst_51 = arith.constant 5.000000e-01 : f32
    %366 = vector.broadcast %cst_51 : f32 to vector<16x64xf32>
    %367 = arith.mulf %366, %365 : vector<16x64xf32>
    %368 = arith.mulf %14, %367 : vector<16x64xf32>
    %369 = arith.mulf %360, %368 : vector<16x64xf32>
    %c96 = arith.constant 96 : index
    %c0_52 = arith.constant 0 : index
    %370 = vector.load %arg2[%c96, %c0_52] : memref<1064x128xf32, #tpu.memory_space<vmem>>, vector<64x128xf32>
    %cst_53 = arith.constant dense<0.000000e+00> : vector<16x128xf32>
    %371 = tpu.matmul %369, %370, %cst_53 {dimension_numbers = #tpu.dot_dimension_numbers<[1], [0], [0], [1], [0, 0, 1, 1], [], []>} : vector<16x64xf32>, vector<64x128xf32>, vector<16x128xf32> -> vector<16x128xf32>
    %372 = vector.extract_strided_slice %371 {offsets = [0, 0], sizes = [16, 32], strides = [1, 1]} : vector<16x128xf32> to vector<16x32xf32>
    %373 = math.tanh %372 : vector<16x32xf32>
    %c176 = arith.constant 176 : index
    %c0_54 = arith.constant 0 : index
    %374 = vector.load %arg2[%c176, %c0_54] : memref<1064x128xf32, #tpu.memory_space<vmem>>, vector<32x128xf32>
    %cst_55 = arith.constant dense<0.000000e+00> : vector<16x128xf32>
    %375 = tpu.matmul %373, %374, %cst_55 {dimension_numbers = #tpu.dot_dimension_numbers<[1], [0], [0], [1], [0, 0, 1, 1], [], []>} : vector<16x32xf32>, vector<32x128xf32>, vector<16x128xf32> -> vector<16x128xf32>
    %376 = vector.extract_strided_slice %375 {offsets = [0, 0], sizes = [16, 64], strides = [1, 1]} : vector<16x128xf32> to vector<16x64xf32>
    %377 = vector.extract_strided_slice %375 {offsets = [0, 64], sizes = [16, 64], strides = [1, 1]} : vector<16x128xf32> to vector<16x64xf32>
    %c344 = arith.constant 344 : index
    %c0_56 = arith.constant 0 : index
    %378 = vector.load %arg2[%c344, %c0_56] : memref<1064x128xf32, #tpu.memory_space<vmem>>, vector<4x128xf32>
    %379 = vector.extract_strided_slice %378 {offsets = [0, 0], sizes = [4, 64], strides = [1, 1]} : vector<4x128xf32> to vector<4x64xf32>
    %c348 = arith.constant 348 : index
    %c0_57 = arith.constant 0 : index
    %380 = vector.load %arg2[%c348, %c0_57] : memref<1064x128xf32, #tpu.memory_space<vmem>>, vector<1x128xf32>
    %381 = vector.extract_strided_slice %380 {offsets = [0, 0], sizes = [1, 64], strides = [1, 1]} : vector<1x128xf32> to vector<1x64xf32>
    %c8_58 = arith.constant 8 : index
    %c0_59 = arith.constant 0 : index
    %382 = vector.load %arg4[%c8_58, %c0_59] : memref<24x64xf32, #tpu.memory_space<vmem>>, vector<16x64xf32>
    tpu.vector_store %arg4[%c8_58, %c0_59], %376 {strides = array<i32>} : memref<24x64xf32, #tpu.memory_space<vmem>>, vector<16x64xf32>,
    %c8_60 = arith.constant 8 : index
    %c0_61 = arith.constant 0 : index
    %383 = vector.load %arg4[%c8_60, %c0_61] : memref<24x64xf32, #tpu.memory_space<vmem>>, vector<16x64xf32>
    %384 = vector.extract_strided_slice %379 {offsets = [3, 0], sizes = [1, 64], strides = [1, 1]} : vector<4x64xf32> to vector<1x64xf32>
    %385 = vector.broadcast %384 : vector<1x64xf32> to vector<16x64xf32>
    %386 = arith.mulf %383, %385 : vector<16x64xf32>
    %c6_62 = arith.constant 6 : index
    %c0_63 = arith.constant 0 : index
    %387 = vector.load %arg4[%c6_62, %c0_63] : memref<24x64xf32, #tpu.memory_space<vmem>>, vector<16x64xf32>
    %388 = vector.extract_strided_slice %379 {offsets = [2, 0], sizes = [1, 64], strides = [1, 1]} : vector<4x64xf32> to vector<1x64xf32>
    %389 = vector.broadcast %388 : vector<1x64xf32> to vector<16x64xf32>
    %390 = arith.mulf %387, %389 : vector<16x64xf32>
    %391 = arith.addf %386, %390 : vector<16x64xf32>
    %c4_64 = arith.constant 4 : index
    %c0_65 = arith.constant 0 : index
    %392 = vector.load %arg4[%c4_64, %c0_65] : memref<24x64xf32, #tpu.memory_space<vmem>>, vector<16x64xf32>
    %393 = vector.extract_strided_slice %379 {offsets = [1, 0], sizes = [1, 64], strides = [1, 1]} : vector<4x64xf32> to vector<1x64xf32>
    %394 = vector.broadcast %393 : vector<1x64xf32> to vector<16x64xf32>
    %395 = arith.mulf %392, %394 : vector<16x64xf32>
    %396 = arith.addf %391, %395 : vector<16x64xf32>
    %c2_66 = arith.constant 2 : index
    %c0_67 = arith.constant 0 : index
    %397 = vector.load %arg4[%c2_66, %c0_67] : memref<24x64xf32, #tpu.memory_space<vmem>>, vector<16x64xf32>
    %398 = vector.extract_strided_slice %379 {offsets = [0, 0], sizes = [1, 64], strides = [1, 1]} : vector<4x64xf32> to vector<1x64xf32>
    %399 = vector.broadcast %398 : vector<1x64xf32> to vector<16x64xf32>
    %400 = arith.mulf %397, %399 : vector<16x64xf32>
    %401 = arith.addf %396, %400 : vector<16x64xf32>
    %402 = vector.broadcast %381 : vector<1x64xf32> to vector<16x64xf32>
    %403 = arith.addf %401, %402 : vector<16x64xf32>
    %cst_68 = arith.constant 5.000000e-01 : f32
    %404 = vector.broadcast %cst_68 : f32 to vector<16x64xf32>
    %405 = arith.mulf %404, %403 : vector<16x64xf32>
    %406 = math.tanh %405 : vector<16x64xf32>
    %cst_69 = arith.constant 1.000000e+00 : f32
    %407 = vector.broadcast %cst_69 : f32 to vector<16x64xf32>
    %408 = arith.addf %407, %406 : vector<16x64xf32>
    %cst_70 = arith.constant 5.000000e-01 : f32
    %409 = vector.broadcast %cst_70 : f32 to vector<16x64xf32>
    %410 = arith.mulf %409, %408 : vector<16x64xf32>
    %411 = arith.mulf %403, %410 : vector<16x64xf32>
    %c208 = arith.constant 208 : index
    %c0_71 = arith.constant 0 : index
    %412 = vector.load %arg2[%c208, %c0_71] : memref<1064x128xf32, #tpu.memory_space<vmem>>, vector<64x128xf32>
    %cst_72 = arith.constant dense<0.000000e+00> : vector<16x128xf32>
    %413 = tpu.matmul %411, %412, %cst_72 {dimension_numbers = #tpu.dot_dimension_numbers<[1], [0], [0], [1], [0, 0, 1, 1], [], []>} : vector<16x64xf32>, vector<64x128xf32>, vector<16x128xf32> -> vector<16x128xf32>
    %c349 = arith.constant 349 : index
    %c0_73 = arith.constant 0 : index
    %414 = vector.load %arg2[%c349, %c0_73] : memref<1064x128xf32, #tpu.memory_space<vmem>>, vector<1x128xf32>
    %415 = vector.extract_strided_slice %414 {offsets = [0, 0], sizes = [1, 64], strides = [1, 1]} : vector<1x128xf32> to vector<1x64xf32>
    %416 = vector.extract_strided_slice %413 {offsets = [0, 0], sizes = [16, 64], strides = [1, 1]} : vector<16x128xf32> to vector<16x64xf32>
    %417 = vector.broadcast %415 : vector<1x64xf32> to vector<16x64xf32>
    %418 = arith.addf %416, %417 : vector<16x64xf32>
    %cst_74 = arith.constant 0.000000e+00 : f32
    %419 = vector.broadcast %cst_74 : f32 to vector<16x64xf32>
    %420 = arith.maximumf %418, %419 : vector<16x64xf32>
    %421 = math.absf %418 : vector<16x64xf32>
    %cst_75 = arith.constant 0.000000e+00 : f32
    %422 = vector.broadcast %cst_75 : f32 to vector<16x64xf32>
    %423 = arith.subf %422, %421 : vector<16x64xf32>
    %424 = math.exp %423 : vector<16x64xf32>
    %cst_76 = arith.constant 1.000000e+00 : f32
    %425 = vector.broadcast %cst_76 : f32 to vector<16x64xf32>
    %426 = arith.addf %425, %424 : vector<16x64xf32>
    %427 = math.log %426 : vector<16x64xf32>
    %428 = arith.addf %420, %427 : vector<16x64xf32>
    %429 = vector.extract_strided_slice %413 {offsets = [0, 64], sizes = [16, 8], strides = [1, 1]} : vector<16x128xf32> to vector<16x8xf32>
    %430 = vector.extract_strided_slice %413 {offsets = [0, 72], sizes = [16, 8], strides = [1, 1]} : vector<16x128xf32> to vector<16x8xf32>
    %431 = arith.mulf %428, %411 : vector<16x64xf32>
    %c336 = arith.constant 336 : index
    %c0_77 = arith.constant 0 : index
    %432 = vector.load %arg2[%c336, %c0_77] : memref<1064x128xf32, #tpu.memory_space<vmem>>, vector<8x128xf32>
    %433 = vector.extract_strided_slice %432 {offsets = [0, 0], sizes = [8, 64], strides = [1, 1]} : vector<8x128xf32> to vector<8x64xf32>
    %434 = vector.shape_cast %433 : vector<8x64xf32> to vector<1x8x64xf32>
    %435 = vector.extract_strided_slice %431 {offsets = [0, 0], sizes = [1, 64], strides = [1, 1]} : vector<16x64xf32> to vector<1x64xf32>
    %436 = vector.shape_cast %435 : vector<1x64xf32> to vector<1x1x64xf32>
    %437 = vector.extract_strided_slice %429 {offsets = [0, 0], sizes = [1, 8], strides = [1, 1]} : vector<16x8xf32> to vector<1x8xf32>
    %438 = vector.shape_cast %437 : vector<1x8xf32> to vector<1x8x1xf32>
    %439 = vector.broadcast %436 : vector<1x1x64xf32> to vector<1x8x64xf32>
    %440 = vector.broadcast %438 : vector<1x8x1xf32> to vector<1x8x64xf32>
    %441 = arith.mulf %439, %440 : vector<1x8x64xf32>
    %442 = vector.extract_strided_slice %430 {offsets = [0, 0], sizes = [1, 8], strides = [1, 1]} : vector<16x8xf32> to vector<1x8xf32>
    %443 = vector.shape_cast %442 : vector<1x8xf32> to vector<1x8x1xf32>
    %444 = vector.extract_strided_slice %431 {offsets = [1, 0], sizes = [1, 64], strides = [1, 1]} : vector<16x64xf32> to vector<1x64xf32>
    %445 = vector.shape_cast %444 : vector<1x64xf32> to vector<1x1x64xf32>
    %446 = vector.extract_strided_slice %429 {offsets = [1, 0], sizes = [1, 8], strides = [1, 1]} : vector<16x8xf32> to vector<1x8xf32>
    %447 = vector.shape_cast %446 : vector<1x8xf32> to vector<1x8x1xf32>
    %448 = vector.broadcast %445 : vector<1x1x64xf32> to vector<1x8x64xf32>
    %449 = vector.broadcast %447 : vector<1x8x1xf32> to vector<1x8x64xf32>
    %450 = arith.mulf %448, %449 : vector<1x8x64xf32>
    %451 = vector.extract_strided_slice %430 {offsets = [1, 0], sizes = [1, 8], strides = [1, 1]} : vector<16x8xf32> to vector<1x8xf32>
    %452 = vector.shape_cast %451 : vector<1x8xf32> to vector<1x8x1xf32>
    %453 = vector.extract_strided_slice %428 {offsets = [2, 0], sizes = [1, 64], strides = [1, 1]} : vector<16x64xf32> to vector<1x64xf32>
    %454 = vector.shape_cast %453 : vector<1x64xf32> to vector<1x1x64xf32>
    %455 = vector.broadcast %454 : vector<1x1x64xf32> to vector<1x8x64xf32>
    %456 = arith.mulf %455, %434 : vector<1x8x64xf32>
    %457 = math.exp %456 : vector<1x8x64xf32>
    %458 = vector.extract_strided_slice %431 {offsets = [2, 0], sizes = [1, 64], strides = [1, 1]} : vector<16x64xf32> to vector<1x64xf32>
    %459 = vector.shape_cast %458 : vector<1x64xf32> to vector<1x1x64xf32>
    %460 = vector.extract_strided_slice %429 {offsets = [2, 0], sizes = [1, 8], strides = [1, 1]} : vector<16x8xf32> to vector<1x8xf32>
    %461 = vector.shape_cast %460 : vector<1x8xf32> to vector<1x8x1xf32>
    %462 = vector.broadcast %459 : vector<1x1x64xf32> to vector<1x8x64xf32>
    %463 = vector.broadcast %461 : vector<1x8x1xf32> to vector<1x8x64xf32>
    %464 = arith.mulf %462, %463 : vector<1x8x64xf32>
    %465 = vector.extract_strided_slice %430 {offsets = [2, 0], sizes = [1, 8], strides = [1, 1]} : vector<16x8xf32> to vector<1x8xf32>
    %466 = vector.shape_cast %465 : vector<1x8xf32> to vector<1x8x1xf32>
    %467 = vector.extract_strided_slice %428 {offsets = [3, 0], sizes = [1, 64], strides = [1, 1]} : vector<16x64xf32> to vector<1x64xf32>
    %468 = vector.shape_cast %467 : vector<1x64xf32> to vector<1x1x64xf32>
    %469 = vector.broadcast %468 : vector<1x1x64xf32> to vector<1x8x64xf32>
    %470 = arith.mulf %469, %434 : vector<1x8x64xf32>
    %471 = math.exp %470 : vector<1x8x64xf32>
    %472 = vector.extract_strided_slice %431 {offsets = [3, 0], sizes = [1, 64], strides = [1, 1]} : vector<16x64xf32> to vector<1x64xf32>
    %473 = vector.shape_cast %472 : vector<1x64xf32> to vector<1x1x64xf32>
    %474 = vector.extract_strided_slice %429 {offsets = [3, 0], sizes = [1, 8], strides = [1, 1]} : vector<16x8xf32> to vector<1x8xf32>
    %475 = vector.shape_cast %474 : vector<1x8xf32> to vector<1x8x1xf32>
    %476 = vector.broadcast %473 : vector<1x1x64xf32> to vector<1x8x64xf32>
    %477 = vector.broadcast %475 : vector<1x8x1xf32> to vector<1x8x64xf32>
    %478 = arith.mulf %476, %477 : vector<1x8x64xf32>
    %479 = vector.extract_strided_slice %430 {offsets = [3, 0], sizes = [1, 8], strides = [1, 1]} : vector<16x8xf32> to vector<1x8xf32>
    %480 = vector.shape_cast %479 : vector<1x8xf32> to vector<1x8x1xf32>
    %481 = vector.extract_strided_slice %428 {offsets = [4, 0], sizes = [1, 64], strides = [1, 1]} : vector<16x64xf32> to vector<1x64xf32>
    %482 = vector.shape_cast %481 : vector<1x64xf32> to vector<1x1x64xf32>
    %483 = vector.broadcast %482 : vector<1x1x64xf32> to vector<1x8x64xf32>
    %484 = arith.mulf %483, %434 : vector<1x8x64xf32>
    %485 = math.exp %484 : vector<1x8x64xf32>
    %486 = vector.extract_strided_slice %431 {offsets = [4, 0], sizes = [1, 64], strides = [1, 1]} : vector<16x64xf32> to vector<1x64xf32>
    %487 = vector.shape_cast %486 : vector<1x64xf32> to vector<1x1x64xf32>
    %488 = vector.extract_strided_slice %429 {offsets = [4, 0], sizes = [1, 8], strides = [1, 1]} : vector<16x8xf32> to vector<1x8xf32>
    %489 = vector.shape_cast %488 : vector<1x8xf32> to vector<1x8x1xf32>
    %490 = vector.broadcast %487 : vector<1x1x64xf32> to vector<1x8x64xf32>
    %491 = vector.broadcast %489 : vector<1x8x1xf32> to vector<1x8x64xf32>
    %492 = arith.mulf %490, %491 : vector<1x8x64xf32>
    %493 = vector.extract_strided_slice %430 {offsets = [4, 0], sizes = [1, 8], strides = [1, 1]} : vector<16x8xf32> to vector<1x8xf32>
    %494 = vector.shape_cast %493 : vector<1x8xf32> to vector<1x8x1xf32>
    %495 = vector.extract_strided_slice %428 {offsets = [5, 0], sizes = [1, 64], strides = [1, 1]} : vector<16x64xf32> to vector<1x64xf32>
    %496 = vector.shape_cast %495 : vector<1x64xf32> to vector<1x1x64xf32>
    %497 = vector.broadcast %496 : vector<1x1x64xf32> to vector<1x8x64xf32>
    %498 = arith.mulf %497, %434 : vector<1x8x64xf32>
    %499 = math.exp %498 : vector<1x8x64xf32>
    %500 = vector.extract_strided_slice %431 {offsets = [5, 0], sizes = [1, 64], strides = [1, 1]} : vector<16x64xf32> to vector<1x64xf32>
    %501 = vector.shape_cast %500 : vector<1x64xf32> to vector<1x1x64xf32>
    %502 = vector.extract_strided_slice %429 {offsets = [5, 0], sizes = [1, 8], strides = [1, 1]} : vector<16x8xf32> to vector<1x8xf32>
    %503 = vector.shape_cast %502 : vector<1x8xf32> to vector<1x8x1xf32>
    %504 = vector.broadcast %501 : vector<1x1x64xf32> to vector<1x8x64xf32>
    %505 = vector.broadcast %503 : vector<1x8x1xf32> to vector<1x8x64xf32>
    %506 = arith.mulf %504, %505 : vector<1x8x64xf32>
    %507 = vector.extract_strided_slice %430 {offsets = [5, 0], sizes = [1, 8], strides = [1, 1]} : vector<16x8xf32> to vector<1x8xf32>
    %508 = vector.shape_cast %507 : vector<1x8xf32> to vector<1x8x1xf32>
    %509 = vector.extract_strided_slice %428 {offsets = [6, 0], sizes = [1, 64], strides = [1, 1]} : vector<16x64xf32> to vector<1x64xf32>
    %510 = vector.shape_cast %509 : vector<1x64xf32> to vector<1x1x64xf32>
    %511 = vector.broadcast %510 : vector<1x1x64xf32> to vector<1x8x64xf32>
    %512 = arith.mulf %511, %434 : vector<1x8x64xf32>
    %513 = math.exp %512 : vector<1x8x64xf32>
    %514 = vector.extract_strided_slice %431 {offsets = [6, 0], sizes = [1, 64], strides = [1, 1]} : vector<16x64xf32> to vector<1x64xf32>
    %515 = vector.shape_cast %514 : vector<1x64xf32> to vector<1x1x64xf32>
    %516 = vector.extract_strided_slice %429 {offsets = [6, 0], sizes = [1, 8], strides = [1, 1]} : vector<16x8xf32> to vector<1x8xf32>
    %517 = vector.shape_cast %516 : vector<1x8xf32> to vector<1x8x1xf32>
    %518 = vector.broadcast %515 : vector<1x1x64xf32> to vector<1x8x64xf32>
    %519 = vector.broadcast %517 : vector<1x8x1xf32> to vector<1x8x64xf32>
    %520 = arith.mulf %518, %519 : vector<1x8x64xf32>
    %521 = vector.extract_strided_slice %430 {offsets = [6, 0], sizes = [1, 8], strides = [1, 1]} : vector<16x8xf32> to vector<1x8xf32>
    %522 = vector.shape_cast %521 : vector<1x8xf32> to vector<1x8x1xf32>
    %523 = vector.extract_strided_slice %428 {offsets = [7, 0], sizes = [1, 64], strides = [1, 1]} : vector<16x64xf32> to vector<1x64xf32>
    %524 = vector.shape_cast %523 : vector<1x64xf32> to vector<1x1x64xf32>
    %525 = vector.broadcast %524 : vector<1x1x64xf32> to vector<1x8x64xf32>
    %526 = arith.mulf %525, %434 : vector<1x8x64xf32>
    %527 = math.exp %526 : vector<1x8x64xf32>
    %528 = vector.extract_strided_slice %431 {offsets = [7, 0], sizes = [1, 64], strides = [1, 1]} : vector<16x64xf32> to vector<1x64xf32>
    %529 = vector.shape_cast %528 : vector<1x64xf32> to vector<1x1x64xf32>
    %530 = vector.extract_strided_slice %429 {offsets = [7, 0], sizes = [1, 8], strides = [1, 1]} : vector<16x8xf32> to vector<1x8xf32>
    %531 = vector.shape_cast %530 : vector<1x8xf32> to vector<1x8x1xf32>
    %532 = vector.broadcast %529 : vector<1x1x64xf32> to vector<1x8x64xf32>
    %533 = vector.broadcast %531 : vector<1x8x1xf32> to vector<1x8x64xf32>
    %534 = arith.mulf %532, %533 : vector<1x8x64xf32>
    %535 = vector.extract_strided_slice %430 {offsets = [7, 0], sizes = [1, 8], strides = [1, 1]} : vector<16x8xf32> to vector<1x8xf32>
    %536 = vector.shape_cast %535 : vector<1x8xf32> to vector<1x8x1xf32>
    %537 = vector.extract_strided_slice %428 {offsets = [8, 0], sizes = [1, 64], strides = [1, 1]} : vector<16x64xf32> to vector<1x64xf32>
    %538 = vector.shape_cast %537 : vector<1x64xf32> to vector<1x1x64xf32>
    %539 = vector.broadcast %538 : vector<1x1x64xf32> to vector<1x8x64xf32>
    %540 = arith.mulf %539, %434 : vector<1x8x64xf32>
    %541 = math.exp %540 : vector<1x8x64xf32>
    %542 = vector.extract_strided_slice %431 {offsets = [8, 0], sizes = [1, 64], strides = [1, 1]} : vector<16x64xf32> to vector<1x64xf32>
    %543 = vector.shape_cast %542 : vector<1x64xf32> to vector<1x1x64xf32>
    %544 = vector.extract_strided_slice %429 {offsets = [8, 0], sizes = [1, 8], strides = [1, 1]} : vector<16x8xf32> to vector<1x8xf32>
    %545 = vector.shape_cast %544 : vector<1x8xf32> to vector<1x8x1xf32>
    %546 = vector.broadcast %543 : vector<1x1x64xf32> to vector<1x8x64xf32>
    %547 = vector.broadcast %545 : vector<1x8x1xf32> to vector<1x8x64xf32>
    %548 = arith.mulf %546, %547 : vector<1x8x64xf32>
    %549 = vector.extract_strided_slice %430 {offsets = [8, 0], sizes = [1, 8], strides = [1, 1]} : vector<16x8xf32> to vector<1x8xf32>
    %550 = vector.shape_cast %549 : vector<1x8xf32> to vector<1x8x1xf32>
    %551 = vector.extract_strided_slice %428 {offsets = [9, 0], sizes = [1, 64], strides = [1, 1]} : vector<16x64xf32> to vector<1x64xf32>
    %552 = vector.shape_cast %551 : vector<1x64xf32> to vector<1x1x64xf32>
    %553 = vector.broadcast %552 : vector<1x1x64xf32> to vector<1x8x64xf32>
    %554 = arith.mulf %553, %434 : vector<1x8x64xf32>
    %555 = math.exp %554 : vector<1x8x64xf32>
    %556 = vector.extract_strided_slice %431 {offsets = [9, 0], sizes = [1, 64], strides = [1, 1]} : vector<16x64xf32> to vector<1x64xf32>
    %557 = vector.shape_cast %556 : vector<1x64xf32> to vector<1x1x64xf32>
    %558 = vector.extract_strided_slice %429 {offsets = [9, 0], sizes = [1, 8], strides = [1, 1]} : vector<16x8xf32> to vector<1x8xf32>
    %559 = vector.shape_cast %558 : vector<1x8xf32> to vector<1x8x1xf32>
    %560 = vector.broadcast %557 : vector<1x1x64xf32> to vector<1x8x64xf32>
    %561 = vector.broadcast %559 : vector<1x8x1xf32> to vector<1x8x64xf32>
    %562 = arith.mulf %560, %561 : vector<1x8x64xf32>
    %563 = vector.extract_strided_slice %430 {offsets = [9, 0], sizes = [1, 8], strides = [1, 1]} : vector<16x8xf32> to vector<1x8xf32>
    %564 = vector.shape_cast %563 : vector<1x8xf32> to vector<1x8x1xf32>
    %565 = vector.extract_strided_slice %428 {offsets = [10, 0], sizes = [1, 64], strides = [1, 1]} : vector<16x64xf32> to vector<1x64xf32>
    %566 = vector.shape_cast %565 : vector<1x64xf32> to vector<1x1x64xf32>
    %567 = vector.broadcast %566 : vector<1x1x64xf32> to vector<1x8x64xf32>
    %568 = arith.mulf %567, %434 : vector<1x8x64xf32>
    %569 = math.exp %568 : vector<1x8x64xf32>
    %570 = vector.extract_strided_slice %431 {offsets = [10, 0], sizes = [1, 64], strides = [1, 1]} : vector<16x64xf32> to vector<1x64xf32>
    %571 = vector.shape_cast %570 : vector<1x64xf32> to vector<1x1x64xf32>
    %572 = vector.extract_strided_slice %429 {offsets = [10, 0], sizes = [1, 8], strides = [1, 1]} : vector<16x8xf32> to vector<1x8xf32>
    %573 = vector.shape_cast %572 : vector<1x8xf32> to vector<1x8x1xf32>
    %574 = vector.broadcast %571 : vector<1x1x64xf32> to vector<1x8x64xf32>
    %575 = vector.broadcast %573 : vector<1x8x1xf32> to vector<1x8x64xf32>
    %576 = arith.mulf %574, %575 : vector<1x8x64xf32>
    %577 = vector.extract_strided_slice %430 {offsets = [10, 0], sizes = [1, 8], strides = [1, 1]} : vector<16x8xf32> to vector<1x8xf32>
    %578 = vector.shape_cast %577 : vector<1x8xf32> to vector<1x8x1xf32>
    %579 = vector.extract_strided_slice %428 {offsets = [11, 0], sizes = [1, 64], strides = [1, 1]} : vector<16x64xf32> to vector<1x64xf32>
    %580 = vector.shape_cast %579 : vector<1x64xf32> to vector<1x1x64xf32>
    %581 = vector.broadcast %580 : vector<1x1x64xf32> to vector<1x8x64xf32>
    %582 = arith.mulf %581, %434 : vector<1x8x64xf32>
    %583 = math.exp %582 : vector<1x8x64xf32>
    %584 = vector.extract_strided_slice %431 {offsets = [11, 0], sizes = [1, 64], strides = [1, 1]} : vector<16x64xf32> to vector<1x64xf32>
    %585 = vector.shape_cast %584 : vector<1x64xf32> to vector<1x1x64xf32>
    %586 = vector.extract_strided_slice %429 {offsets = [11, 0], sizes = [1, 8], strides = [1, 1]} : vector<16x8xf32> to vector<1x8xf32>
    %587 = vector.shape_cast %586 : vector<1x8xf32> to vector<1x8x1xf32>
    %588 = vector.broadcast %585 : vector<1x1x64xf32> to vector<1x8x64xf32>
    %589 = vector.broadcast %587 : vector<1x8x1xf32> to vector<1x8x64xf32>
    %590 = arith.mulf %588, %589 : vector<1x8x64xf32>
    %591 = vector.extract_strided_slice %430 {offsets = [11, 0], sizes = [1, 8], strides = [1, 1]} : vector<16x8xf32> to vector<1x8xf32>
    %592 = vector.shape_cast %591 : vector<1x8xf32> to vector<1x8x1xf32>
    %593 = vector.extract_strided_slice %428 {offsets = [12, 0], sizes = [1, 64], strides = [1, 1]} : vector<16x64xf32> to vector<1x64xf32>
    %594 = vector.shape_cast %593 : vector<1x64xf32> to vector<1x1x64xf32>
    %595 = vector.broadcast %594 : vector<1x1x64xf32> to vector<1x8x64xf32>
    %596 = arith.mulf %595, %434 : vector<1x8x64xf32>
    %597 = math.exp %596 : vector<1x8x64xf32>
    %598 = vector.extract_strided_slice %431 {offsets = [12, 0], sizes = [1, 64], strides = [1, 1]} : vector<16x64xf32> to vector<1x64xf32>
    %599 = vector.shape_cast %598 : vector<1x64xf32> to vector<1x1x64xf32>
    %600 = vector.extract_strided_slice %429 {offsets = [12, 0], sizes = [1, 8], strides = [1, 1]} : vector<16x8xf32> to vector<1x8xf32>
    %601 = vector.shape_cast %600 : vector<1x8xf32> to vector<1x8x1xf32>
    %602 = vector.broadcast %599 : vector<1x1x64xf32> to vector<1x8x64xf32>
    %603 = vector.broadcast %601 : vector<1x8x1xf32> to vector<1x8x64xf32>
    %604 = arith.mulf %602, %603 : vector<1x8x64xf32>
    %605 = vector.extract_strided_slice %430 {offsets = [12, 0], sizes = [1, 8], strides = [1, 1]} : vector<16x8xf32> to vector<1x8xf32>
    %606 = vector.shape_cast %605 : vector<1x8xf32> to vector<1x8x1xf32>
    %607 = vector.extract_strided_slice %428 {offsets = [13, 0], sizes = [1, 64], strides = [1, 1]} : vector<16x64xf32> to vector<1x64xf32>
    %608 = vector.shape_cast %607 : vector<1x64xf32> to vector<1x1x64xf32>
    %609 = vector.broadcast %608 : vector<1x1x64xf32> to vector<1x8x64xf32>
    %610 = arith.mulf %609, %434 : vector<1x8x64xf32>
    %611 = math.exp %610 : vector<1x8x64xf32>
    %612 = vector.extract_strided_slice %431 {offsets = [13, 0], sizes = [1, 64], strides = [1, 1]} : vector<16x64xf32> to vector<1x64xf32>
    %613 = vector.shape_cast %612 : vector<1x64xf32> to vector<1x1x64xf32>
    %614 = vector.extract_strided_slice %429 {offsets = [13, 0], sizes = [1, 8], strides = [1, 1]} : vector<16x8xf32> to vector<1x8xf32>
    %615 = vector.shape_cast %614 : vector<1x8xf32> to vector<1x8x1xf32>
    %616 = vector.broadcast %613 : vector<1x1x64xf32> to vector<1x8x64xf32>
    %617 = vector.broadcast %615 : vector<1x8x1xf32> to vector<1x8x64xf32>
    %618 = arith.mulf %616, %617 : vector<1x8x64xf32>
    %619 = vector.extract_strided_slice %430 {offsets = [13, 0], sizes = [1, 8], strides = [1, 1]} : vector<16x8xf32> to vector<1x8xf32>
    %620 = vector.shape_cast %619 : vector<1x8xf32> to vector<1x8x1xf32>
    %621 = vector.extract_strided_slice %428 {offsets = [14, 0], sizes = [1, 64], strides = [1, 1]} : vector<16x64xf32> to vector<1x64xf32>
    %622 = vector.shape_cast %621 : vector<1x64xf32> to vector<1x1x64xf32>
    %623 = vector.broadcast %622 : vector<1x1x64xf32> to vector<1x8x64xf32>
    %624 = arith.mulf %623, %434 : vector<1x8x64xf32>
    %625 = math.exp %624 : vector<1x8x64xf32>
    %626 = vector.extract_strided_slice %431 {offsets = [14, 0], sizes = [1, 64], strides = [1, 1]} : vector<16x64xf32> to vector<1x64xf32>
    %627 = vector.shape_cast %626 : vector<1x64xf32> to vector<1x1x64xf32>
    %628 = vector.extract_strided_slice %429 {offsets = [14, 0], sizes = [1, 8], strides = [1, 1]} : vector<16x8xf32> to vector<1x8xf32>
    %629 = vector.shape_cast %628 : vector<1x8xf32> to vector<1x8x1xf32>
    %630 = vector.broadcast %627 : vector<1x1x64xf32> to vector<1x8x64xf32>
    %631 = vector.broadcast %629 : vector<1x8x1xf32> to vector<1x8x64xf32>
    %632 = arith.mulf %630, %631 : vector<1x8x64xf32>
    %633 = vector.extract_strided_slice %430 {offsets = [14, 0], sizes = [1, 8], strides = [1, 1]} : vector<16x8xf32> to vector<1x8xf32>
    %634 = vector.shape_cast %633 : vector<1x8xf32> to vector<1x8x1xf32>
    %635 = vector.extract_strided_slice %428 {offsets = [15, 0], sizes = [1, 64], strides = [1, 1]} : vector<16x64xf32> to vector<1x64xf32>
    %636 = vector.shape_cast %635 : vector<1x64xf32> to vector<1x1x64xf32>
    %637 = vector.broadcast %636 : vector<1x1x64xf32> to vector<1x8x64xf32>
    %638 = arith.mulf %637, %434 : vector<1x8x64xf32>
    %639 = math.exp %638 : vector<1x8x64xf32>
    %640 = vector.extract_strided_slice %431 {offsets = [15, 0], sizes = [1, 64], strides = [1, 1]} : vector<16x64xf32> to vector<1x64xf32>
    %641 = vector.shape_cast %640 : vector<1x64xf32> to vector<1x1x64xf32>
    %642 = vector.extract_strided_slice %429 {offsets = [15, 0], sizes = [1, 8], strides = [1, 1]} : vector<16x8xf32> to vector<1x8xf32>
    %643 = vector.shape_cast %642 : vector<1x8xf32> to vector<1x8x1xf32>
    %644 = vector.broadcast %641 : vector<1x1x64xf32> to vector<1x8x64xf32>
    %645 = vector.broadcast %643 : vector<1x8x1xf32> to vector<1x8x64xf32>
    %646 = arith.mulf %644, %645 : vector<1x8x64xf32>
    %647 = vector.extract_strided_slice %430 {offsets = [15, 0], sizes = [1, 8], strides = [1, 1]} : vector<16x8xf32> to vector<1x8xf32>
    %648 = vector.shape_cast %647 : vector<1x8xf32> to vector<1x8x1xf32>
    %649 = tpu.concatenate %441, %450 in 0 : vector<1x8x64xf32>, vector<1x8x64xf32> -> vector<2x8x64xf32>
    %650 = tpu.concatenate %443, %452 in 0 : vector<1x8x1xf32>, vector<1x8x1xf32> -> vector<2x8x1xf32>
    %651 = vector.broadcast %650 : vector<2x8x1xf32> to vector<2x8x64xf32>
    %652 = arith.mulf %649, %651 : vector<2x8x64xf32>
    %cst_78 = arith.constant dense<0.000000e+00> : vector<2x64xf32>
    %653 = vector.multi_reduction <add>, %652, %cst_78 [1] : vector<2x8x64xf32> to vector<2x64xf32>
    %c0_79 = arith.constant 0 : index
    %c0_80 = arith.constant 0 : index
    %654 = vector.load %arg5[%c0_79, %c0_80] : memref<16x64xf32, #tpu.memory_space<vmem>>, vector<2x64xf32>
    tpu.vector_store %arg5[%c0_79, %c0_80], %653 {strides = array<i32>} : memref<16x64xf32, #tpu.memory_space<vmem>>, vector<2x64xf32>,
    %655 = tpu.concatenate %457, %471 in 0 : vector<1x8x64xf32>, vector<1x8x64xf32> -> vector<2x8x64xf32>
    %656 = arith.mulf %649, %655 : vector<2x8x64xf32>
    %657 = tpu.concatenate %464, %478 in 0 : vector<1x8x64xf32>, vector<1x8x64xf32> -> vector<2x8x64xf32>
    %658 = arith.addf %656, %657 : vector<2x8x64xf32>
    %659 = tpu.concatenate %466, %480 in 0 : vector<1x8x1xf32>, vector<1x8x1xf32> -> vector<2x8x1xf32>
    %660 = vector.broadcast %659 : vector<2x8x1xf32> to vector<2x8x64xf32>
    %661 = arith.mulf %658, %660 : vector<2x8x64xf32>
    %cst_81 = arith.constant dense<0.000000e+00> : vector<2x64xf32>
    %662 = vector.multi_reduction <add>, %661, %cst_81 [1] : vector<2x8x64xf32> to vector<2x64xf32>
    %c2_82 = arith.constant 2 : index
    %c0_83 = arith.constant 0 : index
    %663 = vector.load %arg5[%c2_82, %c0_83] : memref<16x64xf32, #tpu.memory_space<vmem>>, vector<2x64xf32>
    tpu.vector_store %arg5[%c2_82, %c0_83], %662 {strides = array<i32>} : memref<16x64xf32, #tpu.memory_space<vmem>>, vector<2x64xf32>,
    %664 = tpu.concatenate %485, %499 in 0 : vector<1x8x64xf32>, vector<1x8x64xf32> -> vector<2x8x64xf32>
    %665 = arith.mulf %658, %664 : vector<2x8x64xf32>
    %666 = tpu.concatenate %492, %506 in 0 : vector<1x8x64xf32>, vector<1x8x64xf32> -> vector<2x8x64xf32>
    %667 = arith.addf %665, %666 : vector<2x8x64xf32>
    %668 = tpu.concatenate %494, %508 in 0 : vector<1x8x1xf32>, vector<1x8x1xf32> -> vector<2x8x1xf32>
    %669 = vector.broadcast %668 : vector<2x8x1xf32> to vector<2x8x64xf32>
    %670 = arith.mulf %667, %669 : vector<2x8x64xf32>
    %cst_84 = arith.constant dense<0.000000e+00> : vector<2x64xf32>
    %671 = vector.multi_reduction <add>, %670, %cst_84 [1] : vector<2x8x64xf32> to vector<2x64xf32>
    %c4_85 = arith.constant 4 : index
    %c0_86 = arith.constant 0 : index
    %672 = vector.load %arg5[%c4_85, %c0_86] : memref<16x64xf32, #tpu.memory_space<vmem>>, vector<2x64xf32>
    tpu.vector_store %arg5[%c4_85, %c0_86], %671 {strides = array<i32>} : memref<16x64xf32, #tpu.memory_space<vmem>>, vector<2x64xf32>,
    %673 = tpu.concatenate %513, %527 in 0 : vector<1x8x64xf32>, vector<1x8x64xf32> -> vector<2x8x64xf32>
    %674 = arith.mulf %667, %673 : vector<2x8x64xf32>
    %675 = tpu.concatenate %520, %534 in 0 : vector<1x8x64xf32>, vector<1x8x64xf32> -> vector<2x8x64xf32>
    %676 = arith.addf %674, %675 : vector<2x8x64xf32>
    %677 = tpu.concatenate %522, %536 in 0 : vector<1x8x1xf32>, vector<1x8x1xf32> -> vector<2x8x1xf32>
    %678 = vector.broadcast %677 : vector<2x8x1xf32> to vector<2x8x64xf32>
    %679 = arith.mulf %676, %678 : vector<2x8x64xf32>
    %cst_87 = arith.constant dense<0.000000e+00> : vector<2x64xf32>
    %680 = vector.multi_reduction <add>, %679, %cst_87 [1] : vector<2x8x64xf32> to vector<2x64xf32>
    %c6_88 = arith.constant 6 : index
    %c0_89 = arith.constant 0 : index
    %681 = vector.load %arg5[%c6_88, %c0_89] : memref<16x64xf32, #tpu.memory_space<vmem>>, vector<2x64xf32>
    tpu.vector_store %arg5[%c6_88, %c0_89], %680 {strides = array<i32>} : memref<16x64xf32, #tpu.memory_space<vmem>>, vector<2x64xf32>,
    %682 = tpu.concatenate %541, %555 in 0 : vector<1x8x64xf32>, vector<1x8x64xf32> -> vector<2x8x64xf32>
    %683 = arith.mulf %676, %682 : vector<2x8x64xf32>
    %684 = tpu.concatenate %548, %562 in 0 : vector<1x8x64xf32>, vector<1x8x64xf32> -> vector<2x8x64xf32>
    %685 = arith.addf %683, %684 : vector<2x8x64xf32>
    %686 = tpu.concatenate %550, %564 in 0 : vector<1x8x1xf32>, vector<1x8x1xf32> -> vector<2x8x1xf32>
    %687 = vector.broadcast %686 : vector<2x8x1xf32> to vector<2x8x64xf32>
    %688 = arith.mulf %685, %687 : vector<2x8x64xf32>
    %cst_90 = arith.constant dense<0.000000e+00> : vector<2x64xf32>
    %689 = vector.multi_reduction <add>, %688, %cst_90 [1] : vector<2x8x64xf32> to vector<2x64xf32>
    %c8_91 = arith.constant 8 : index
    %c0_92 = arith.constant 0 : index
    %690 = vector.load %arg5[%c8_91, %c0_92] : memref<16x64xf32, #tpu.memory_space<vmem>>, vector<2x64xf32>
    tpu.vector_store %arg5[%c8_91, %c0_92], %689 {strides = array<i32>} : memref<16x64xf32, #tpu.memory_space<vmem>>, vector<2x64xf32>,
    %691 = tpu.concatenate %569, %583 in 0 : vector<1x8x64xf32>, vector<1x8x64xf32> -> vector<2x8x64xf32>
    %692 = arith.mulf %685, %691 : vector<2x8x64xf32>
    %693 = tpu.concatenate %576, %590 in 0 : vector<1x8x64xf32>, vector<1x8x64xf32> -> vector<2x8x64xf32>
    %694 = arith.addf %692, %693 : vector<2x8x64xf32>
    %695 = tpu.concatenate %578, %592 in 0 : vector<1x8x1xf32>, vector<1x8x1xf32> -> vector<2x8x1xf32>
    %696 = vector.broadcast %695 : vector<2x8x1xf32> to vector<2x8x64xf32>
    %697 = arith.mulf %694, %696 : vector<2x8x64xf32>
    %cst_93 = arith.constant dense<0.000000e+00> : vector<2x64xf32>
    %698 = vector.multi_reduction <add>, %697, %cst_93 [1] : vector<2x8x64xf32> to vector<2x64xf32>
    %c10_94 = arith.constant 10 : index
    %c0_95 = arith.constant 0 : index
    %699 = vector.load %arg5[%c10_94, %c0_95] : memref<16x64xf32, #tpu.memory_space<vmem>>, vector<2x64xf32>
    tpu.vector_store %arg5[%c10_94, %c0_95], %698 {strides = array<i32>} : memref<16x64xf32, #tpu.memory_space<vmem>>, vector<2x64xf32>,
    %700 = tpu.concatenate %597, %611 in 0 : vector<1x8x64xf32>, vector<1x8x64xf32> -> vector<2x8x64xf32>
    %701 = arith.mulf %694, %700 : vector<2x8x64xf32>
    %702 = tpu.concatenate %604, %618 in 0 : vector<1x8x64xf32>, vector<1x8x64xf32> -> vector<2x8x64xf32>
    %703 = arith.addf %701, %702 : vector<2x8x64xf32>
    %704 = tpu.concatenate %606, %620 in 0 : vector<1x8x1xf32>, vector<1x8x1xf32> -> vector<2x8x1xf32>
    %705 = vector.broadcast %704 : vector<2x8x1xf32> to vector<2x8x64xf32>
    %706 = arith.mulf %703, %705 : vector<2x8x64xf32>
    %cst_96 = arith.constant dense<0.000000e+00> : vector<2x64xf32>
    %707 = vector.multi_reduction <add>, %706, %cst_96 [1] : vector<2x8x64xf32> to vector<2x64xf32>
    %c12_97 = arith.constant 12 : index
    %c0_98 = arith.constant 0 : index
    %708 = vector.load %arg5[%c12_97, %c0_98] : memref<16x64xf32, #tpu.memory_space<vmem>>, vector<2x64xf32>
    tpu.vector_store %arg5[%c12_97, %c0_98], %707 {strides = array<i32>} : memref<16x64xf32, #tpu.memory_space<vmem>>, vector<2x64xf32>,
    %709 = tpu.concatenate %625, %639 in 0 : vector<1x8x64xf32>, vector<1x8x64xf32> -> vector<2x8x64xf32>
    %710 = arith.mulf %703, %709 : vector<2x8x64xf32>
    %711 = tpu.concatenate %632, %646 in 0 : vector<1x8x64xf32>, vector<1x8x64xf32> -> vector<2x8x64xf32>
    %712 = arith.addf %710, %711 : vector<2x8x64xf32>
    %713 = tpu.concatenate %634, %648 in 0 : vector<1x8x1xf32>, vector<1x8x1xf32> -> vector<2x8x1xf32>
    %714 = vector.broadcast %713 : vector<2x8x1xf32> to vector<2x8x64xf32>
    %715 = arith.mulf %712, %714 : vector<2x8x64xf32>
    %cst_99 = arith.constant dense<0.000000e+00> : vector<2x64xf32>
    %716 = vector.multi_reduction <add>, %715, %cst_99 [1] : vector<2x8x64xf32> to vector<2x64xf32>
    %c14_100 = arith.constant 14 : index
    %c0_101 = arith.constant 0 : index
    %717 = vector.load %arg5[%c14_100, %c0_101] : memref<16x64xf32, #tpu.memory_space<vmem>>, vector<2x64xf32>
    tpu.vector_store %arg5[%c14_100, %c0_101], %716 {strides = array<i32>} : memref<16x64xf32, #tpu.memory_space<vmem>>, vector<2x64xf32>,
    %c0_102 = arith.constant 0 : index
    %c0_103 = arith.constant 0 : index
    %718 = vector.load %arg5[%c0_102, %c0_103] : memref<16x64xf32, #tpu.memory_space<vmem>>, vector<16x64xf32>
    %c350 = arith.constant 350 : index
    %c0_104 = arith.constant 0 : index
    %719 = vector.load %arg2[%c350, %c0_104] : memref<1064x128xf32, #tpu.memory_space<vmem>>, vector<1x128xf32>
    %720 = vector.extract_strided_slice %719 {offsets = [0, 0], sizes = [1, 64], strides = [1, 1]} : vector<1x128xf32> to vector<1x64xf32>
    %721 = vector.broadcast %720 : vector<1x64xf32> to vector<16x64xf32>
    %722 = arith.mulf %721, %411 : vector<16x64xf32>
    %723 = arith.addf %718, %722 : vector<16x64xf32>
    %cst_105 = arith.constant 5.000000e-01 : f32
    %724 = vector.broadcast %cst_105 : f32 to vector<16x64xf32>
    %725 = arith.mulf %724, %377 : vector<16x64xf32>
    %726 = math.tanh %725 : vector<16x64xf32>
    %cst_106 = arith.constant 1.000000e+00 : f32
    %727 = vector.broadcast %cst_106 : f32 to vector<16x64xf32>
    %728 = arith.addf %727, %726 : vector<16x64xf32>
    %cst_107 = arith.constant 5.000000e-01 : f32
    %729 = vector.broadcast %cst_107 : f32 to vector<16x64xf32>
    %730 = arith.mulf %729, %728 : vector<16x64xf32>
    %731 = arith.mulf %377, %730 : vector<16x64xf32>
    %732 = arith.mulf %723, %731 : vector<16x64xf32>
    %c272 = arith.constant 272 : index
    %c0_108 = arith.constant 0 : index
    %733 = vector.load %arg2[%c272, %c0_108] : memref<1064x128xf32, #tpu.memory_space<vmem>>, vector<64x128xf32>
    %cst_109 = arith.constant dense<0.000000e+00> : vector<16x128xf32>
    %734 = tpu.matmul %732, %733, %cst_109 {dimension_numbers = #tpu.dot_dimension_numbers<[1], [0], [0], [1], [0, 0, 1, 1], [], []>} : vector<16x64xf32>, vector<64x128xf32>, vector<16x128xf32> -> vector<16x128xf32>
    %735 = vector.extract_strided_slice %734 {offsets = [0, 0], sizes = [16, 32], strides = [1, 1]} : vector<16x128xf32> to vector<16x32xf32>
    %736 = math.tanh %735 : vector<16x32xf32>
    %c0_110 = arith.constant 0 : index
    %c0_111 = arith.constant 0 : index
    %737 = vector.load %arg1[%c0_110, %c0_111] : memref<8x1xf32, #tpu.memory_space<vmem>>, vector<8x1xf32>
    %cst_112 = arith.constant 1.000000e+00 : f32
    %738 = vector.broadcast %cst_112 : f32 to vector<1x32xf32>
    %739 = vector.broadcast %737 : vector<8x1xf32> to vector<8x32xf32>
    %740 = vector.broadcast %738 : vector<1x32xf32> to vector<8x32xf32>
    %741 = arith.mulf %739, %740 : vector<8x32xf32>
    %c352 = arith.constant 352 : index
    %c0_113 = arith.constant 0 : index
    %742 = vector.load %arg2[%c352, %c0_113] : memref<1064x128xf32, #tpu.memory_space<vmem>>, vector<32x128xf32>
    %cst_114 = arith.constant dense<0.000000e+00> : vector<8x128xf32>
    %743 = tpu.matmul %741, %742, %cst_114 {dimension_numbers = #tpu.dot_dimension_numbers<[1], [0], [0], [1], [0, 0, 1, 1], [], []>} : vector<8x32xf32>, vector<32x128xf32>, vector<8x128xf32> -> vector<8x128xf32>
    %744 = vector.extract_strided_slice %743 {offsets = [0, 0], sizes = [8, 64], strides = [1, 1]} : vector<8x128xf32> to vector<8x64xf32>
    %745 = vector.extract_strided_slice %743 {offsets = [0, 64], sizes = [8, 64], strides = [1, 1]} : vector<8x128xf32> to vector<8x64xf32>
    %c520 = arith.constant 520 : index
    %c0_115 = arith.constant 0 : index
    %746 = vector.load %arg2[%c520, %c0_115] : memref<1064x128xf32, #tpu.memory_space<vmem>>, vector<4x128xf32>
    %747 = vector.extract_strided_slice %746 {offsets = [0, 0], sizes = [4, 64], strides = [1, 1]} : vector<4x128xf32> to vector<4x64xf32>
    %c524 = arith.constant 524 : index
    %c0_116 = arith.constant 0 : index
    %748 = vector.load %arg2[%c524, %c0_116] : memref<1064x128xf32, #tpu.memory_space<vmem>>, vector<1x128xf32>
    %749 = vector.extract_strided_slice %748 {offsets = [0, 0], sizes = [1, 64], strides = [1, 1]} : vector<1x128xf32> to vector<1x64xf32>
    %c8_117 = arith.constant 8 : index
    %c0_118 = arith.constant 0 : index
    %750 = vector.load %arg4[%c8_117, %c0_118] : memref<24x64xf32, #tpu.memory_space<vmem>>, vector<8x64xf32>
    tpu.vector_store %arg4[%c8_117, %c0_118], %744 {strides = array<i32>} : memref<24x64xf32, #tpu.memory_space<vmem>>, vector<8x64xf32>,
    %c8_119 = arith.constant 8 : index
    %c0_120 = arith.constant 0 : index
    %751 = vector.load %arg4[%c8_119, %c0_120] : memref<24x64xf32, #tpu.memory_space<vmem>>, vector<8x64xf32>
    %752 = vector.extract_strided_slice %747 {offsets = [3, 0], sizes = [1, 64], strides = [1, 1]} : vector<4x64xf32> to vector<1x64xf32>
    %753 = vector.broadcast %752 : vector<1x64xf32> to vector<8x64xf32>
    %754 = arith.mulf %751, %753 : vector<8x64xf32>
    %c6_121 = arith.constant 6 : index
    %c0_122 = arith.constant 0 : index
    %755 = vector.load %arg4[%c6_121, %c0_122] : memref<24x64xf32, #tpu.memory_space<vmem>>, vector<8x64xf32>
    %756 = vector.extract_strided_slice %747 {offsets = [2, 0], sizes = [1, 64], strides = [1, 1]} : vector<4x64xf32> to vector<1x64xf32>
    %757 = vector.broadcast %756 : vector<1x64xf32> to vector<8x64xf32>
    %758 = arith.mulf %755, %757 : vector<8x64xf32>
    %759 = arith.addf %754, %758 : vector<8x64xf32>
    %c4_123 = arith.constant 4 : index
    %c0_124 = arith.constant 0 : index
    %760 = vector.load %arg4[%c4_123, %c0_124] : memref<24x64xf32, #tpu.memory_space<vmem>>, vector<8x64xf32>
    %761 = vector.extract_strided_slice %747 {offsets = [1, 0], sizes = [1, 64], strides = [1, 1]} : vector<4x64xf32> to vector<1x64xf32>
    %762 = vector.broadcast %761 : vector<1x64xf32> to vector<8x64xf32>
    %763 = arith.mulf %760, %762 : vector<8x64xf32>
    %764 = arith.addf %759, %763 : vector<8x64xf32>
    %c2_125 = arith.constant 2 : index
    %c0_126 = arith.constant 0 : index
    %765 = vector.load %arg4[%c2_125, %c0_126] : memref<24x64xf32, #tpu.memory_space<vmem>>, vector<8x64xf32>
    %766 = vector.extract_strided_slice %747 {offsets = [0, 0], sizes = [1, 64], strides = [1, 1]} : vector<4x64xf32> to vector<1x64xf32>
    %767 = vector.broadcast %766 : vector<1x64xf32> to vector<8x64xf32>
    %768 = arith.mulf %765, %767 : vector<8x64xf32>
    %769 = arith.addf %764, %768 : vector<8x64xf32>
    %770 = vector.broadcast %749 : vector<1x64xf32> to vector<8x64xf32>
    %771 = arith.addf %769, %770 : vector<8x64xf32>
    %cst_127 = arith.constant 5.000000e-01 : f32
    %772 = vector.broadcast %cst_127 : f32 to vector<8x64xf32>
    %773 = arith.mulf %772, %771 : vector<8x64xf32>
    %774 = math.tanh %773 : vector<8x64xf32>
    %cst_128 = arith.constant 1.000000e+00 : f32
    %775 = vector.broadcast %cst_128 : f32 to vector<8x64xf32>
    %776 = arith.addf %775, %774 : vector<8x64xf32>
    %cst_129 = arith.constant 5.000000e-01 : f32
    %777 = vector.broadcast %cst_129 : f32 to vector<8x64xf32>
    %778 = arith.mulf %777, %776 : vector<8x64xf32>
    %779 = arith.mulf %771, %778 : vector<8x64xf32>
    %c384 = arith.constant 384 : index
    %c0_130 = arith.constant 0 : index
    %780 = vector.load %arg2[%c384, %c0_130] : memref<1064x128xf32, #tpu.memory_space<vmem>>, vector<64x128xf32>
    %cst_131 = arith.constant dense<0.000000e+00> : vector<8x128xf32>
    %781 = tpu.matmul %779, %780, %cst_131 {dimension_numbers = #tpu.dot_dimension_numbers<[1], [0], [0], [1], [0, 0, 1, 1], [], []>} : vector<8x64xf32>, vector<64x128xf32>, vector<8x128xf32> -> vector<8x128xf32>
    %c525 = arith.constant 525 : index
    %c0_132 = arith.constant 0 : index
    %782 = vector.load %arg2[%c525, %c0_132] : memref<1064x128xf32, #tpu.memory_space<vmem>>, vector<1x128xf32>
    %783 = vector.extract_strided_slice %782 {offsets = [0, 0], sizes = [1, 64], strides = [1, 1]} : vector<1x128xf32> to vector<1x64xf32>
    %784 = vector.extract_strided_slice %781 {offsets = [0, 0], sizes = [8, 64], strides = [1, 1]} : vector<8x128xf32> to vector<8x64xf32>
    %785 = vector.broadcast %783 : vector<1x64xf32> to vector<8x64xf32>
    %786 = arith.addf %784, %785 : vector<8x64xf32>
    %cst_133 = arith.constant 0.000000e+00 : f32
    %787 = vector.broadcast %cst_133 : f32 to vector<8x64xf32>
    %788 = arith.maximumf %786, %787 : vector<8x64xf32>
    %789 = math.absf %786 : vector<8x64xf32>
    %cst_134 = arith.constant 0.000000e+00 : f32
    %790 = vector.broadcast %cst_134 : f32 to vector<8x64xf32>
    %791 = arith.subf %790, %789 : vector<8x64xf32>
    %792 = math.exp %791 : vector<8x64xf32>
    %cst_135 = arith.constant 1.000000e+00 : f32
    %793 = vector.broadcast %cst_135 : f32 to vector<8x64xf32>
    %794 = arith.addf %793, %792 : vector<8x64xf32>
    %795 = math.log %794 : vector<8x64xf32>
    %796 = arith.addf %788, %795 : vector<8x64xf32>
    %797 = vector.extract_strided_slice %781 {offsets = [0, 64], sizes = [8, 8], strides = [1, 1]} : vector<8x128xf32> to vector<8x8xf32>
    %798 = vector.extract_strided_slice %781 {offsets = [0, 72], sizes = [8, 8], strides = [1, 1]} : vector<8x128xf32> to vector<8x8xf32>
    %799 = arith.mulf %796, %779 : vector<8x64xf32>
    %c512 = arith.constant 512 : index
    %c0_136 = arith.constant 0 : index
    %800 = vector.load %arg2[%c512, %c0_136] : memref<1064x128xf32, #tpu.memory_space<vmem>>, vector<8x128xf32>
    %801 = vector.extract_strided_slice %800 {offsets = [0, 0], sizes = [8, 64], strides = [1, 1]} : vector<8x128xf32> to vector<8x64xf32>
    %802 = vector.shape_cast %801 : vector<8x64xf32> to vector<1x8x64xf32>
    %803 = vector.extract_strided_slice %799 {offsets = [0, 0], sizes = [1, 64], strides = [1, 1]} : vector<8x64xf32> to vector<1x64xf32>
    %804 = vector.shape_cast %803 : vector<1x64xf32> to vector<1x1x64xf32>
    %805 = vector.extract_strided_slice %797 {offsets = [0, 0], sizes = [1, 8], strides = [1, 1]} : vector<8x8xf32> to vector<1x8xf32>
    %806 = vector.shape_cast %805 : vector<1x8xf32> to vector<1x8x1xf32>
    %807 = vector.broadcast %804 : vector<1x1x64xf32> to vector<1x8x64xf32>
    %808 = vector.broadcast %806 : vector<1x8x1xf32> to vector<1x8x64xf32>
    %809 = arith.mulf %807, %808 : vector<1x8x64xf32>
    %810 = vector.extract_strided_slice %798 {offsets = [0, 0], sizes = [1, 8], strides = [1, 1]} : vector<8x8xf32> to vector<1x8xf32>
    %811 = vector.shape_cast %810 : vector<1x8xf32> to vector<1x8x1xf32>
    %812 = vector.extract_strided_slice %799 {offsets = [1, 0], sizes = [1, 64], strides = [1, 1]} : vector<8x64xf32> to vector<1x64xf32>
    %813 = vector.shape_cast %812 : vector<1x64xf32> to vector<1x1x64xf32>
    %814 = vector.extract_strided_slice %797 {offsets = [1, 0], sizes = [1, 8], strides = [1, 1]} : vector<8x8xf32> to vector<1x8xf32>
    %815 = vector.shape_cast %814 : vector<1x8xf32> to vector<1x8x1xf32>
    %816 = vector.broadcast %813 : vector<1x1x64xf32> to vector<1x8x64xf32>
    %817 = vector.broadcast %815 : vector<1x8x1xf32> to vector<1x8x64xf32>
    %818 = arith.mulf %816, %817 : vector<1x8x64xf32>
    %819 = vector.extract_strided_slice %798 {offsets = [1, 0], sizes = [1, 8], strides = [1, 1]} : vector<8x8xf32> to vector<1x8xf32>
    %820 = vector.shape_cast %819 : vector<1x8xf32> to vector<1x8x1xf32>
    %821 = vector.extract_strided_slice %796 {offsets = [2, 0], sizes = [1, 64], strides = [1, 1]} : vector<8x64xf32> to vector<1x64xf32>
    %822 = vector.shape_cast %821 : vector<1x64xf32> to vector<1x1x64xf32>
    %823 = vector.broadcast %822 : vector<1x1x64xf32> to vector<1x8x64xf32>
    %824 = arith.mulf %823, %802 : vector<1x8x64xf32>
    %825 = math.exp %824 : vector<1x8x64xf32>
    %826 = vector.extract_strided_slice %799 {offsets = [2, 0], sizes = [1, 64], strides = [1, 1]} : vector<8x64xf32> to vector<1x64xf32>
    %827 = vector.shape_cast %826 : vector<1x64xf32> to vector<1x1x64xf32>
    %828 = vector.extract_strided_slice %797 {offsets = [2, 0], sizes = [1, 8], strides = [1, 1]} : vector<8x8xf32> to vector<1x8xf32>
    %829 = vector.shape_cast %828 : vector<1x8xf32> to vector<1x8x1xf32>
    %830 = vector.broadcast %827 : vector<1x1x64xf32> to vector<1x8x64xf32>
    %831 = vector.broadcast %829 : vector<1x8x1xf32> to vector<1x8x64xf32>
    %832 = arith.mulf %830, %831 : vector<1x8x64xf32>
    %833 = vector.extract_strided_slice %798 {offsets = [2, 0], sizes = [1, 8], strides = [1, 1]} : vector<8x8xf32> to vector<1x8xf32>
    %834 = vector.shape_cast %833 : vector<1x8xf32> to vector<1x8x1xf32>
    %835 = vector.extract_strided_slice %796 {offsets = [3, 0], sizes = [1, 64], strides = [1, 1]} : vector<8x64xf32> to vector<1x64xf32>
    %836 = vector.shape_cast %835 : vector<1x64xf32> to vector<1x1x64xf32>
    %837 = vector.broadcast %836 : vector<1x1x64xf32> to vector<1x8x64xf32>
    %838 = arith.mulf %837, %802 : vector<1x8x64xf32>
    %839 = math.exp %838 : vector<1x8x64xf32>
    %840 = vector.extract_strided_slice %799 {offsets = [3, 0], sizes = [1, 64], strides = [1, 1]} : vector<8x64xf32> to vector<1x64xf32>
    %841 = vector.shape_cast %840 : vector<1x64xf32> to vector<1x1x64xf32>
    %842 = vector.extract_strided_slice %797 {offsets = [3, 0], sizes = [1, 8], strides = [1, 1]} : vector<8x8xf32> to vector<1x8xf32>
    %843 = vector.shape_cast %842 : vector<1x8xf32> to vector<1x8x1xf32>
    %844 = vector.broadcast %841 : vector<1x1x64xf32> to vector<1x8x64xf32>
    %845 = vector.broadcast %843 : vector<1x8x1xf32> to vector<1x8x64xf32>
    %846 = arith.mulf %844, %845 : vector<1x8x64xf32>
    %847 = vector.extract_strided_slice %798 {offsets = [3, 0], sizes = [1, 8], strides = [1, 1]} : vector<8x8xf32> to vector<1x8xf32>
    %848 = vector.shape_cast %847 : vector<1x8xf32> to vector<1x8x1xf32>
    %849 = vector.extract_strided_slice %796 {offsets = [4, 0], sizes = [1, 64], strides = [1, 1]} : vector<8x64xf32> to vector<1x64xf32>
    %850 = vector.shape_cast %849 : vector<1x64xf32> to vector<1x1x64xf32>
    %851 = vector.broadcast %850 : vector<1x1x64xf32> to vector<1x8x64xf32>
    %852 = arith.mulf %851, %802 : vector<1x8x64xf32>
    %853 = math.exp %852 : vector<1x8x64xf32>
    %854 = vector.extract_strided_slice %799 {offsets = [4, 0], sizes = [1, 64], strides = [1, 1]} : vector<8x64xf32> to vector<1x64xf32>
    %855 = vector.shape_cast %854 : vector<1x64xf32> to vector<1x1x64xf32>
    %856 = vector.extract_strided_slice %797 {offsets = [4, 0], sizes = [1, 8], strides = [1, 1]} : vector<8x8xf32> to vector<1x8xf32>
    %857 = vector.shape_cast %856 : vector<1x8xf32> to vector<1x8x1xf32>
    %858 = vector.broadcast %855 : vector<1x1x64xf32> to vector<1x8x64xf32>
    %859 = vector.broadcast %857 : vector<1x8x1xf32> to vector<1x8x64xf32>
    %860 = arith.mulf %858, %859 : vector<1x8x64xf32>
    %861 = vector.extract_strided_slice %798 {offsets = [4, 0], sizes = [1, 8], strides = [1, 1]} : vector<8x8xf32> to vector<1x8xf32>
    %862 = vector.shape_cast %861 : vector<1x8xf32> to vector<1x8x1xf32>
    %863 = vector.extract_strided_slice %796 {offsets = [5, 0], sizes = [1, 64], strides = [1, 1]} : vector<8x64xf32> to vector<1x64xf32>
    %864 = vector.shape_cast %863 : vector<1x64xf32> to vector<1x1x64xf32>
    %865 = vector.broadcast %864 : vector<1x1x64xf32> to vector<1x8x64xf32>
    %866 = arith.mulf %865, %802 : vector<1x8x64xf32>
    %867 = math.exp %866 : vector<1x8x64xf32>
    %868 = vector.extract_strided_slice %799 {offsets = [5, 0], sizes = [1, 64], strides = [1, 1]} : vector<8x64xf32> to vector<1x64xf32>
    %869 = vector.shape_cast %868 : vector<1x64xf32> to vector<1x1x64xf32>
    %870 = vector.extract_strided_slice %797 {offsets = [5, 0], sizes = [1, 8], strides = [1, 1]} : vector<8x8xf32> to vector<1x8xf32>
    %871 = vector.shape_cast %870 : vector<1x8xf32> to vector<1x8x1xf32>
    %872 = vector.broadcast %869 : vector<1x1x64xf32> to vector<1x8x64xf32>
    %873 = vector.broadcast %871 : vector<1x8x1xf32> to vector<1x8x64xf32>
    %874 = arith.mulf %872, %873 : vector<1x8x64xf32>
    %875 = vector.extract_strided_slice %798 {offsets = [5, 0], sizes = [1, 8], strides = [1, 1]} : vector<8x8xf32> to vector<1x8xf32>
    %876 = vector.shape_cast %875 : vector<1x8xf32> to vector<1x8x1xf32>
    %877 = vector.extract_strided_slice %796 {offsets = [6, 0], sizes = [1, 64], strides = [1, 1]} : vector<8x64xf32> to vector<1x64xf32>
    %878 = vector.shape_cast %877 : vector<1x64xf32> to vector<1x1x64xf32>
    %879 = vector.broadcast %878 : vector<1x1x64xf32> to vector<1x8x64xf32>
    %880 = arith.mulf %879, %802 : vector<1x8x64xf32>
    %881 = math.exp %880 : vector<1x8x64xf32>
    %882 = vector.extract_strided_slice %799 {offsets = [6, 0], sizes = [1, 64], strides = [1, 1]} : vector<8x64xf32> to vector<1x64xf32>
    %883 = vector.shape_cast %882 : vector<1x64xf32> to vector<1x1x64xf32>
    %884 = vector.extract_strided_slice %797 {offsets = [6, 0], sizes = [1, 8], strides = [1, 1]} : vector<8x8xf32> to vector<1x8xf32>
    %885 = vector.shape_cast %884 : vector<1x8xf32> to vector<1x8x1xf32>
    %886 = vector.broadcast %883 : vector<1x1x64xf32> to vector<1x8x64xf32>
    %887 = vector.broadcast %885 : vector<1x8x1xf32> to vector<1x8x64xf32>
    %888 = arith.mulf %886, %887 : vector<1x8x64xf32>
    %889 = vector.extract_strided_slice %798 {offsets = [6, 0], sizes = [1, 8], strides = [1, 1]} : vector<8x8xf32> to vector<1x8xf32>
    %890 = vector.shape_cast %889 : vector<1x8xf32> to vector<1x8x1xf32>
    %891 = vector.extract_strided_slice %796 {offsets = [7, 0], sizes = [1, 64], strides = [1, 1]} : vector<8x64xf32> to vector<1x64xf32>
    %892 = vector.shape_cast %891 : vector<1x64xf32> to vector<1x1x64xf32>
    %893 = vector.broadcast %892 : vector<1x1x64xf32> to vector<1x8x64xf32>
    %894 = arith.mulf %893, %802 : vector<1x8x64xf32>
    %895 = math.exp %894 : vector<1x8x64xf32>
    %896 = vector.extract_strided_slice %799 {offsets = [7, 0], sizes = [1, 64], strides = [1, 1]} : vector<8x64xf32> to vector<1x64xf32>
    %897 = vector.shape_cast %896 : vector<1x64xf32> to vector<1x1x64xf32>
    %898 = vector.extract_strided_slice %797 {offsets = [7, 0], sizes = [1, 8], strides = [1, 1]} : vector<8x8xf32> to vector<1x8xf32>
    %899 = vector.shape_cast %898 : vector<1x8xf32> to vector<1x8x1xf32>
    %900 = vector.broadcast %897 : vector<1x1x64xf32> to vector<1x8x64xf32>
    %901 = vector.broadcast %899 : vector<1x8x1xf32> to vector<1x8x64xf32>
    %902 = arith.mulf %900, %901 : vector<1x8x64xf32>
    %903 = vector.extract_strided_slice %798 {offsets = [7, 0], sizes = [1, 8], strides = [1, 1]} : vector<8x8xf32> to vector<1x8xf32>
    %904 = vector.shape_cast %903 : vector<1x8xf32> to vector<1x8x1xf32>
    %905 = tpu.concatenate %809, %818 in 0 : vector<1x8x64xf32>, vector<1x8x64xf32> -> vector<2x8x64xf32>
    %906 = tpu.concatenate %811, %820 in 0 : vector<1x8x1xf32>, vector<1x8x1xf32> -> vector<2x8x1xf32>
    %907 = vector.broadcast %906 : vector<2x8x1xf32> to vector<2x8x64xf32>
    %908 = arith.mulf %905, %907 : vector<2x8x64xf32>
    %cst_137 = arith.constant dense<0.000000e+00> : vector<2x64xf32>
    %909 = vector.multi_reduction <add>, %908, %cst_137 [1] : vector<2x8x64xf32> to vector<2x64xf32>
    %c0_138 = arith.constant 0 : index
    %c0_139 = arith.constant 0 : index
    %910 = vector.load %arg5[%c0_138, %c0_139] : memref<16x64xf32, #tpu.memory_space<vmem>>, vector<2x64xf32>
    tpu.vector_store %arg5[%c0_138, %c0_139], %909 {strides = array<i32>} : memref<16x64xf32, #tpu.memory_space<vmem>>, vector<2x64xf32>,
    %911 = tpu.concatenate %825, %839 in 0 : vector<1x8x64xf32>, vector<1x8x64xf32> -> vector<2x8x64xf32>
    %912 = arith.mulf %905, %911 : vector<2x8x64xf32>
    %913 = tpu.concatenate %832, %846 in 0 : vector<1x8x64xf32>, vector<1x8x64xf32> -> vector<2x8x64xf32>
    %914 = arith.addf %912, %913 : vector<2x8x64xf32>
    %915 = tpu.concatenate %834, %848 in 0 : vector<1x8x1xf32>, vector<1x8x1xf32> -> vector<2x8x1xf32>
    %916 = vector.broadcast %915 : vector<2x8x1xf32> to vector<2x8x64xf32>
    %917 = arith.mulf %914, %916 : vector<2x8x64xf32>
    %cst_140 = arith.constant dense<0.000000e+00> : vector<2x64xf32>
    %918 = vector.multi_reduction <add>, %917, %cst_140 [1] : vector<2x8x64xf32> to vector<2x64xf32>
    %c2_141 = arith.constant 2 : index
    %c0_142 = arith.constant 0 : index
    %919 = vector.load %arg5[%c2_141, %c0_142] : memref<16x64xf32, #tpu.memory_space<vmem>>, vector<2x64xf32>
    tpu.vector_store %arg5[%c2_141, %c0_142], %918 {strides = array<i32>} : memref<16x64xf32, #tpu.memory_space<vmem>>, vector<2x64xf32>,
    %920 = tpu.concatenate %853, %867 in 0 : vector<1x8x64xf32>, vector<1x8x64xf32> -> vector<2x8x64xf32>
    %921 = arith.mulf %914, %920 : vector<2x8x64xf32>
    %922 = tpu.concatenate %860, %874 in 0 : vector<1x8x64xf32>, vector<1x8x64xf32> -> vector<2x8x64xf32>
    %923 = arith.addf %921, %922 : vector<2x8x64xf32>
    %924 = tpu.concatenate %862, %876 in 0 : vector<1x8x1xf32>, vector<1x8x1xf32> -> vector<2x8x1xf32>
    %925 = vector.broadcast %924 : vector<2x8x1xf32> to vector<2x8x64xf32>
    %926 = arith.mulf %923, %925 : vector<2x8x64xf32>
    %cst_143 = arith.constant dense<0.000000e+00> : vector<2x64xf32>
    %927 = vector.multi_reduction <add>, %926, %cst_143 [1] : vector<2x8x64xf32> to vector<2x64xf32>
    %c4_144 = arith.constant 4 : index
    %c0_145 = arith.constant 0 : index
    %928 = vector.load %arg5[%c4_144, %c0_145] : memref<16x64xf32, #tpu.memory_space<vmem>>, vector<2x64xf32>
    tpu.vector_store %arg5[%c4_144, %c0_145], %927 {strides = array<i32>} : memref<16x64xf32, #tpu.memory_space<vmem>>, vector<2x64xf32>,
    %929 = tpu.concatenate %881, %895 in 0 : vector<1x8x64xf32>, vector<1x8x64xf32> -> vector<2x8x64xf32>
    %930 = arith.mulf %923, %929 : vector<2x8x64xf32>
    %931 = tpu.concatenate %888, %902 in 0 : vector<1x8x64xf32>, vector<1x8x64xf32> -> vector<2x8x64xf32>
    %932 = arith.addf %930, %931 : vector<2x8x64xf32>
    %933 = tpu.concatenate %890, %904 in 0 : vector<1x8x1xf32>, vector<1x8x1xf32> -> vector<2x8x1xf32>
    %934 = vector.broadcast %933 : vector<2x8x1xf32> to vector<2x8x64xf32>
    %935 = arith.mulf %932, %934 : vector<2x8x64xf32>
    %cst_146 = arith.constant dense<0.000000e+00> : vector<2x64xf32>
    %936 = vector.multi_reduction <add>, %935, %cst_146 [1] : vector<2x8x64xf32> to vector<2x64xf32>
    %c6_147 = arith.constant 6 : index
    %c0_148 = arith.constant 0 : index
    %937 = vector.load %arg5[%c6_147, %c0_148] : memref<16x64xf32, #tpu.memory_space<vmem>>, vector<2x64xf32>
    tpu.vector_store %arg5[%c6_147, %c0_148], %936 {strides = array<i32>} : memref<16x64xf32, #tpu.memory_space<vmem>>, vector<2x64xf32>,
    %c0_149 = arith.constant 0 : index
    %c0_150 = arith.constant 0 : index
    %938 = vector.load %arg5[%c0_149, %c0_150] : memref<16x64xf32, #tpu.memory_space<vmem>>, vector<8x64xf32>
    %c526 = arith.constant 526 : index
    %c0_151 = arith.constant 0 : index
    %939 = vector.load %arg2[%c526, %c0_151] : memref<1064x128xf32, #tpu.memory_space<vmem>>, vector<1x128xf32>
    %940 = vector.extract_strided_slice %939 {offsets = [0, 0], sizes = [1, 64], strides = [1, 1]} : vector<1x128xf32> to vector<1x64xf32>
    %941 = vector.broadcast %940 : vector<1x64xf32> to vector<8x64xf32>
    %942 = arith.mulf %941, %779 : vector<8x64xf32>
    %943 = arith.addf %938, %942 : vector<8x64xf32>
    %cst_152 = arith.constant 5.000000e-01 : f32
    %944 = vector.broadcast %cst_152 : f32 to vector<8x64xf32>
    %945 = arith.mulf %944, %745 : vector<8x64xf32>
    %946 = math.tanh %945 : vector<8x64xf32>
    %cst_153 = arith.constant 1.000000e+00 : f32
    %947 = vector.broadcast %cst_153 : f32 to vector<8x64xf32>
    %948 = arith.addf %947, %946 : vector<8x64xf32>
    %cst_154 = arith.constant 5.000000e-01 : f32
    %949 = vector.broadcast %cst_154 : f32 to vector<8x64xf32>
    %950 = arith.mulf %949, %948 : vector<8x64xf32>
    %951 = arith.mulf %745, %950 : vector<8x64xf32>
    %952 = arith.mulf %943, %951 : vector<8x64xf32>
    %c448 = arith.constant 448 : index
    %c0_155 = arith.constant 0 : index
    %953 = vector.load %arg2[%c448, %c0_155] : memref<1064x128xf32, #tpu.memory_space<vmem>>, vector<64x128xf32>
    %cst_156 = arith.constant dense<0.000000e+00> : vector<8x128xf32>
    %954 = tpu.matmul %952, %953, %cst_156 {dimension_numbers = #tpu.dot_dimension_numbers<[1], [0], [0], [1], [0, 0, 1, 1], [], []>} : vector<8x64xf32>, vector<64x128xf32>, vector<8x128xf32> -> vector<8x128xf32>
    %955 = vector.extract_strided_slice %954 {offsets = [0, 0], sizes = [8, 32], strides = [1, 1]} : vector<8x128xf32> to vector<8x32xf32>
    %956 = math.tanh %955 : vector<8x32xf32>
    %c528 = arith.constant 528 : index
    %c0_157 = arith.constant 0 : index
    %957 = vector.load %arg2[%c528, %c0_157] : memref<1064x128xf32, #tpu.memory_space<vmem>>, vector<32x128xf32>
    %cst_158 = arith.constant dense<0.000000e+00> : vector<8x128xf32>
    %958 = tpu.matmul %956, %957, %cst_158 {dimension_numbers = #tpu.dot_dimension_numbers<[1], [0], [0], [1], [0, 0, 1, 1], [], []>} : vector<8x32xf32>, vector<32x128xf32>, vector<8x128xf32> -> vector<8x128xf32>
    %959 = vector.extract_strided_slice %958 {offsets = [0, 0], sizes = [8, 64], strides = [1, 1]} : vector<8x128xf32> to vector<8x64xf32>
    %960 = vector.extract_strided_slice %958 {offsets = [0, 64], sizes = [8, 64], strides = [1, 1]} : vector<8x128xf32> to vector<8x64xf32>
    %c696 = arith.constant 696 : index
    %c0_159 = arith.constant 0 : index
    %961 = vector.load %arg2[%c696, %c0_159] : memref<1064x128xf32, #tpu.memory_space<vmem>>, vector<4x128xf32>
    %962 = vector.extract_strided_slice %961 {offsets = [0, 0], sizes = [4, 64], strides = [1, 1]} : vector<4x128xf32> to vector<4x64xf32>
    %c700 = arith.constant 700 : index
    %c0_160 = arith.constant 0 : index
    %963 = vector.load %arg2[%c700, %c0_160] : memref<1064x128xf32, #tpu.memory_space<vmem>>, vector<1x128xf32>
    %964 = vector.extract_strided_slice %963 {offsets = [0, 0], sizes = [1, 64], strides = [1, 1]} : vector<1x128xf32> to vector<1x64xf32>
    %c8_161 = arith.constant 8 : index
    %c0_162 = arith.constant 0 : index
    %965 = vector.load %arg4[%c8_161, %c0_162] : memref<24x64xf32, #tpu.memory_space<vmem>>, vector<8x64xf32>
    tpu.vector_store %arg4[%c8_161, %c0_162], %959 {strides = array<i32>} : memref<24x64xf32, #tpu.memory_space<vmem>>, vector<8x64xf32>,
    %c8_163 = arith.constant 8 : index
    %c0_164 = arith.constant 0 : index
    %966 = vector.load %arg4[%c8_163, %c0_164] : memref<24x64xf32, #tpu.memory_space<vmem>>, vector<8x64xf32>
    %967 = vector.extract_strided_slice %962 {offsets = [3, 0], sizes = [1, 64], strides = [1, 1]} : vector<4x64xf32> to vector<1x64xf32>
    %968 = vector.broadcast %967 : vector<1x64xf32> to vector<8x64xf32>
    %969 = arith.mulf %966, %968 : vector<8x64xf32>
    %c6_165 = arith.constant 6 : index
    %c0_166 = arith.constant 0 : index
    %970 = vector.load %arg4[%c6_165, %c0_166] : memref<24x64xf32, #tpu.memory_space<vmem>>, vector<8x64xf32>
    %971 = vector.extract_strided_slice %962 {offsets = [2, 0], sizes = [1, 64], strides = [1, 1]} : vector<4x64xf32> to vector<1x64xf32>
    %972 = vector.broadcast %971 : vector<1x64xf32> to vector<8x64xf32>
    %973 = arith.mulf %970, %972 : vector<8x64xf32>
    %974 = arith.addf %969, %973 : vector<8x64xf32>
    %c4_167 = arith.constant 4 : index
    %c0_168 = arith.constant 0 : index
    %975 = vector.load %arg4[%c4_167, %c0_168] : memref<24x64xf32, #tpu.memory_space<vmem>>, vector<8x64xf32>
    %976 = vector.extract_strided_slice %962 {offsets = [1, 0], sizes = [1, 64], strides = [1, 1]} : vector<4x64xf32> to vector<1x64xf32>
    %977 = vector.broadcast %976 : vector<1x64xf32> to vector<8x64xf32>
    %978 = arith.mulf %975, %977 : vector<8x64xf32>
    %979 = arith.addf %974, %978 : vector<8x64xf32>
    %c2_169 = arith.constant 2 : index
    %c0_170 = arith.constant 0 : index
    %980 = vector.load %arg4[%c2_169, %c0_170] : memref<24x64xf32, #tpu.memory_space<vmem>>, vector<8x64xf32>
    %981 = vector.extract_strided_slice %962 {offsets = [0, 0], sizes = [1, 64], strides = [1, 1]} : vector<4x64xf32> to vector<1x64xf32>
    %982 = vector.broadcast %981 : vector<1x64xf32> to vector<8x64xf32>
    %983 = arith.mulf %980, %982 : vector<8x64xf32>
    %984 = arith.addf %979, %983 : vector<8x64xf32>
    %985 = vector.broadcast %964 : vector<1x64xf32> to vector<8x64xf32>
    %986 = arith.addf %984, %985 : vector<8x64xf32>
    %cst_171 = arith.constant 5.000000e-01 : f32
    %987 = vector.broadcast %cst_171 : f32 to vector<8x64xf32>
    %988 = arith.mulf %987, %986 : vector<8x64xf32>
    %989 = math.tanh %988 : vector<8x64xf32>
    %cst_172 = arith.constant 1.000000e+00 : f32
    %990 = vector.broadcast %cst_172 : f32 to vector<8x64xf32>
    %991 = arith.addf %990, %989 : vector<8x64xf32>
    %cst_173 = arith.constant 5.000000e-01 : f32
    %992 = vector.broadcast %cst_173 : f32 to vector<8x64xf32>
    %993 = arith.mulf %992, %991 : vector<8x64xf32>
    %994 = arith.mulf %986, %993 : vector<8x64xf32>
    %c560 = arith.constant 560 : index
    %c0_174 = arith.constant 0 : index
    %995 = vector.load %arg2[%c560, %c0_174] : memref<1064x128xf32, #tpu.memory_space<vmem>>, vector<64x128xf32>
    %cst_175 = arith.constant dense<0.000000e+00> : vector<8x128xf32>
    %996 = tpu.matmul %994, %995, %cst_175 {dimension_numbers = #tpu.dot_dimension_numbers<[1], [0], [0], [1], [0, 0, 1, 1], [], []>} : vector<8x64xf32>, vector<64x128xf32>, vector<8x128xf32> -> vector<8x128xf32>
    %c701 = arith.constant 701 : index
    %c0_176 = arith.constant 0 : index
    %997 = vector.load %arg2[%c701, %c0_176] : memref<1064x128xf32, #tpu.memory_space<vmem>>, vector<1x128xf32>
    %998 = vector.extract_strided_slice %997 {offsets = [0, 0], sizes = [1, 64], strides = [1, 1]} : vector<1x128xf32> to vector<1x64xf32>
    %999 = vector.extract_strided_slice %996 {offsets = [0, 0], sizes = [8, 64], strides = [1, 1]} : vector<8x128xf32> to vector<8x64xf32>
    %1000 = vector.broadcast %998 : vector<1x64xf32> to vector<8x64xf32>
    %1001 = arith.addf %999, %1000 : vector<8x64xf32>
    %cst_177 = arith.constant 0.000000e+00 : f32
    %1002 = vector.broadcast %cst_177 : f32 to vector<8x64xf32>
    %1003 = arith.maximumf %1001, %1002 : vector<8x64xf32>
    %1004 = math.absf %1001 : vector<8x64xf32>
    %cst_178 = arith.constant 0.000000e+00 : f32
    %1005 = vector.broadcast %cst_178 : f32 to vector<8x64xf32>
    %1006 = arith.subf %1005, %1004 : vector<8x64xf32>
    %1007 = math.exp %1006 : vector<8x64xf32>
    %cst_179 = arith.constant 1.000000e+00 : f32
    %1008 = vector.broadcast %cst_179 : f32 to vector<8x64xf32>
    %1009 = arith.addf %1008, %1007 : vector<8x64xf32>
    %1010 = math.log %1009 : vector<8x64xf32>
    %1011 = arith.addf %1003, %1010 : vector<8x64xf32>
    %1012 = vector.extract_strided_slice %996 {offsets = [0, 64], sizes = [8, 8], strides = [1, 1]} : vector<8x128xf32> to vector<8x8xf32>
    %1013 = vector.extract_strided_slice %996 {offsets = [0, 72], sizes = [8, 8], strides = [1, 1]} : vector<8x128xf32> to vector<8x8xf32>
    %1014 = arith.mulf %1011, %994 : vector<8x64xf32>
    %c688 = arith.constant 688 : index
    %c0_180 = arith.constant 0 : index
    %1015 = vector.load %arg2[%c688, %c0_180] : memref<1064x128xf32, #tpu.memory_space<vmem>>, vector<8x128xf32>
    %1016 = vector.extract_strided_slice %1015 {offsets = [0, 0], sizes = [8, 64], strides = [1, 1]} : vector<8x128xf32> to vector<8x64xf32>
    %1017 = vector.shape_cast %1016 : vector<8x64xf32> to vector<1x8x64xf32>
    %1018 = vector.extract_strided_slice %1014 {offsets = [0, 0], sizes = [1, 64], strides = [1, 1]} : vector<8x64xf32> to vector<1x64xf32>
    %1019 = vector.shape_cast %1018 : vector<1x64xf32> to vector<1x1x64xf32>
    %1020 = vector.extract_strided_slice %1012 {offsets = [0, 0], sizes = [1, 8], strides = [1, 1]} : vector<8x8xf32> to vector<1x8xf32>
    %1021 = vector.shape_cast %1020 : vector<1x8xf32> to vector<1x8x1xf32>
    %1022 = vector.broadcast %1019 : vector<1x1x64xf32> to vector<1x8x64xf32>
    %1023 = vector.broadcast %1021 : vector<1x8x1xf32> to vector<1x8x64xf32>
    %1024 = arith.mulf %1022, %1023 : vector<1x8x64xf32>
    %1025 = vector.extract_strided_slice %1013 {offsets = [0, 0], sizes = [1, 8], strides = [1, 1]} : vector<8x8xf32> to vector<1x8xf32>
    %1026 = vector.shape_cast %1025 : vector<1x8xf32> to vector<1x8x1xf32>
    %1027 = vector.extract_strided_slice %1014 {offsets = [1, 0], sizes = [1, 64], strides = [1, 1]} : vector<8x64xf32> to vector<1x64xf32>
    %1028 = vector.shape_cast %1027 : vector<1x64xf32> to vector<1x1x64xf32>
    %1029 = vector.extract_strided_slice %1012 {offsets = [1, 0], sizes = [1, 8], strides = [1, 1]} : vector<8x8xf32> to vector<1x8xf32>
    %1030 = vector.shape_cast %1029 : vector<1x8xf32> to vector<1x8x1xf32>
    %1031 = vector.broadcast %1028 : vector<1x1x64xf32> to vector<1x8x64xf32>
    %1032 = vector.broadcast %1030 : vector<1x8x1xf32> to vector<1x8x64xf32>
    %1033 = arith.mulf %1031, %1032 : vector<1x8x64xf32>
    %1034 = vector.extract_strided_slice %1013 {offsets = [1, 0], sizes = [1, 8], strides = [1, 1]} : vector<8x8xf32> to vector<1x8xf32>
    %1035 = vector.shape_cast %1034 : vector<1x8xf32> to vector<1x8x1xf32>
    %1036 = vector.extract_strided_slice %1011 {offsets = [2, 0], sizes = [1, 64], strides = [1, 1]} : vector<8x64xf32> to vector<1x64xf32>
    %1037 = vector.shape_cast %1036 : vector<1x64xf32> to vector<1x1x64xf32>
    %1038 = vector.broadcast %1037 : vector<1x1x64xf32> to vector<1x8x64xf32>
    %1039 = arith.mulf %1038, %1017 : vector<1x8x64xf32>
    %1040 = math.exp %1039 : vector<1x8x64xf32>
    %1041 = vector.extract_strided_slice %1014 {offsets = [2, 0], sizes = [1, 64], strides = [1, 1]} : vector<8x64xf32> to vector<1x64xf32>
    %1042 = vector.shape_cast %1041 : vector<1x64xf32> to vector<1x1x64xf32>
    %1043 = vector.extract_strided_slice %1012 {offsets = [2, 0], sizes = [1, 8], strides = [1, 1]} : vector<8x8xf32> to vector<1x8xf32>
    %1044 = vector.shape_cast %1043 : vector<1x8xf32> to vector<1x8x1xf32>
    %1045 = vector.broadcast %1042 : vector<1x1x64xf32> to vector<1x8x64xf32>
    %1046 = vector.broadcast %1044 : vector<1x8x1xf32> to vector<1x8x64xf32>
    %1047 = arith.mulf %1045, %1046 : vector<1x8x64xf32>
    %1048 = vector.extract_strided_slice %1013 {offsets = [2, 0], sizes = [1, 8], strides = [1, 1]} : vector<8x8xf32> to vector<1x8xf32>
    %1049 = vector.shape_cast %1048 : vector<1x8xf32> to vector<1x8x1xf32>
    %1050 = vector.extract_strided_slice %1011 {offsets = [3, 0], sizes = [1, 64], strides = [1, 1]} : vector<8x64xf32> to vector<1x64xf32>
    %1051 = vector.shape_cast %1050 : vector<1x64xf32> to vector<1x1x64xf32>
    %1052 = vector.broadcast %1051 : vector<1x1x64xf32> to vector<1x8x64xf32>
    %1053 = arith.mulf %1052, %1017 : vector<1x8x64xf32>
    %1054 = math.exp %1053 : vector<1x8x64xf32>
    %1055 = vector.extract_strided_slice %1014 {offsets = [3, 0], sizes = [1, 64], strides = [1, 1]} : vector<8x64xf32> to vector<1x64xf32>
    %1056 = vector.shape_cast %1055 : vector<1x64xf32> to vector<1x1x64xf32>
    %1057 = vector.extract_strided_slice %1012 {offsets = [3, 0], sizes = [1, 8], strides = [1, 1]} : vector<8x8xf32> to vector<1x8xf32>
    %1058 = vector.shape_cast %1057 : vector<1x8xf32> to vector<1x8x1xf32>
    %1059 = vector.broadcast %1056 : vector<1x1x64xf32> to vector<1x8x64xf32>
    %1060 = vector.broadcast %1058 : vector<1x8x1xf32> to vector<1x8x64xf32>
    %1061 = arith.mulf %1059, %1060 : vector<1x8x64xf32>
    %1062 = vector.extract_strided_slice %1013 {offsets = [3, 0], sizes = [1, 8], strides = [1, 1]} : vector<8x8xf32> to vector<1x8xf32>
    %1063 = vector.shape_cast %1062 : vector<1x8xf32> to vector<1x8x1xf32>
    %1064 = vector.extract_strided_slice %1011 {offsets = [4, 0], sizes = [1, 64], strides = [1, 1]} : vector<8x64xf32> to vector<1x64xf32>
    %1065 = vector.shape_cast %1064 : vector<1x64xf32> to vector<1x1x64xf32>
    %1066 = vector.broadcast %1065 : vector<1x1x64xf32> to vector<1x8x64xf32>
    %1067 = arith.mulf %1066, %1017 : vector<1x8x64xf32>
    %1068 = math.exp %1067 : vector<1x8x64xf32>
    %1069 = vector.extract_strided_slice %1014 {offsets = [4, 0], sizes = [1, 64], strides = [1, 1]} : vector<8x64xf32> to vector<1x64xf32>
    %1070 = vector.shape_cast %1069 : vector<1x64xf32> to vector<1x1x64xf32>
    %1071 = vector.extract_strided_slice %1012 {offsets = [4, 0], sizes = [1, 8], strides = [1, 1]} : vector<8x8xf32> to vector<1x8xf32>
    %1072 = vector.shape_cast %1071 : vector<1x8xf32> to vector<1x8x1xf32>
    %1073 = vector.broadcast %1070 : vector<1x1x64xf32> to vector<1x8x64xf32>
    %1074 = vector.broadcast %1072 : vector<1x8x1xf32> to vector<1x8x64xf32>
    %1075 = arith.mulf %1073, %1074 : vector<1x8x64xf32>
    %1076 = vector.extract_strided_slice %1013 {offsets = [4, 0], sizes = [1, 8], strides = [1, 1]} : vector<8x8xf32> to vector<1x8xf32>
    %1077 = vector.shape_cast %1076 : vector<1x8xf32> to vector<1x8x1xf32>
    %1078 = vector.extract_strided_slice %1011 {offsets = [5, 0], sizes = [1, 64], strides = [1, 1]} : vector<8x64xf32> to vector<1x64xf32>
    %1079 = vector.shape_cast %1078 : vector<1x64xf32> to vector<1x1x64xf32>
    %1080 = vector.broadcast %1079 : vector<1x1x64xf32> to vector<1x8x64xf32>
    %1081 = arith.mulf %1080, %1017 : vector<1x8x64xf32>
    %1082 = math.exp %1081 : vector<1x8x64xf32>
    %1083 = vector.extract_strided_slice %1014 {offsets = [5, 0], sizes = [1, 64], strides = [1, 1]} : vector<8x64xf32> to vector<1x64xf32>
    %1084 = vector.shape_cast %1083 : vector<1x64xf32> to vector<1x1x64xf32>
    %1085 = vector.extract_strided_slice %1012 {offsets = [5, 0], sizes = [1, 8], strides = [1, 1]} : vector<8x8xf32> to vector<1x8xf32>
    %1086 = vector.shape_cast %1085 : vector<1x8xf32> to vector<1x8x1xf32>
    %1087 = vector.broadcast %1084 : vector<1x1x64xf32> to vector<1x8x64xf32>
    %1088 = vector.broadcast %1086 : vector<1x8x1xf32> to vector<1x8x64xf32>
    %1089 = arith.mulf %1087, %1088 : vector<1x8x64xf32>
    %1090 = vector.extract_strided_slice %1013 {offsets = [5, 0], sizes = [1, 8], strides = [1, 1]} : vector<8x8xf32> to vector<1x8xf32>
    %1091 = vector.shape_cast %1090 : vector<1x8xf32> to vector<1x8x1xf32>
    %1092 = vector.extract_strided_slice %1011 {offsets = [6, 0], sizes = [1, 64], strides = [1, 1]} : vector<8x64xf32> to vector<1x64xf32>
    %1093 = vector.shape_cast %1092 : vector<1x64xf32> to vector<1x1x64xf32>
    %1094 = vector.broadcast %1093 : vector<1x1x64xf32> to vector<1x8x64xf32>
    %1095 = arith.mulf %1094, %1017 : vector<1x8x64xf32>
    %1096 = math.exp %1095 : vector<1x8x64xf32>
    %1097 = vector.extract_strided_slice %1014 {offsets = [6, 0], sizes = [1, 64], strides = [1, 1]} : vector<8x64xf32> to vector<1x64xf32>
    %1098 = vector.shape_cast %1097 : vector<1x64xf32> to vector<1x1x64xf32>
    %1099 = vector.extract_strided_slice %1012 {offsets = [6, 0], sizes = [1, 8], strides = [1, 1]} : vector<8x8xf32> to vector<1x8xf32>
    %1100 = vector.shape_cast %1099 : vector<1x8xf32> to vector<1x8x1xf32>
    %1101 = vector.broadcast %1098 : vector<1x1x64xf32> to vector<1x8x64xf32>
    %1102 = vector.broadcast %1100 : vector<1x8x1xf32> to vector<1x8x64xf32>
    %1103 = arith.mulf %1101, %1102 : vector<1x8x64xf32>
    %1104 = vector.extract_strided_slice %1013 {offsets = [6, 0], sizes = [1, 8], strides = [1, 1]} : vector<8x8xf32> to vector<1x8xf32>
    %1105 = vector.shape_cast %1104 : vector<1x8xf32> to vector<1x8x1xf32>
    %1106 = vector.extract_strided_slice %1011 {offsets = [7, 0], sizes = [1, 64], strides = [1, 1]} : vector<8x64xf32> to vector<1x64xf32>
    %1107 = vector.shape_cast %1106 : vector<1x64xf32> to vector<1x1x64xf32>
    %1108 = vector.broadcast %1107 : vector<1x1x64xf32> to vector<1x8x64xf32>
    %1109 = arith.mulf %1108, %1017 : vector<1x8x64xf32>
    %1110 = math.exp %1109 : vector<1x8x64xf32>
    %1111 = vector.extract_strided_slice %1014 {offsets = [7, 0], sizes = [1, 64], strides = [1, 1]} : vector<8x64xf32> to vector<1x64xf32>
    %1112 = vector.shape_cast %1111 : vector<1x64xf32> to vector<1x1x64xf32>
    %1113 = vector.extract_strided_slice %1012 {offsets = [7, 0], sizes = [1, 8], strides = [1, 1]} : vector<8x8xf32> to vector<1x8xf32>
    %1114 = vector.shape_cast %1113 : vector<1x8xf32> to vector<1x8x1xf32>
    %1115 = vector.broadcast %1112 : vector<1x1x64xf32> to vector<1x8x64xf32>
    %1116 = vector.broadcast %1114 : vector<1x8x1xf32> to vector<1x8x64xf32>
    %1117 = arith.mulf %1115, %1116 : vector<1x8x64xf32>
    %1118 = vector.extract_strided_slice %1013 {offsets = [7, 0], sizes = [1, 8], strides = [1, 1]} : vector<8x8xf32> to vector<1x8xf32>
    %1119 = vector.shape_cast %1118 : vector<1x8xf32> to vector<1x8x1xf32>
    %1120 = tpu.concatenate %1024, %1033 in 0 : vector<1x8x64xf32>, vector<1x8x64xf32> -> vector<2x8x64xf32>
    %1121 = tpu.concatenate %1026, %1035 in 0 : vector<1x8x1xf32>, vector<1x8x1xf32> -> vector<2x8x1xf32>
    %1122 = vector.broadcast %1121 : vector<2x8x1xf32> to vector<2x8x64xf32>
    %1123 = arith.mulf %1120, %1122 : vector<2x8x64xf32>
    %cst_181 = arith.constant dense<0.000000e+00> : vector<2x64xf32>
    %1124 = vector.multi_reduction <add>, %1123, %cst_181 [1] : vector<2x8x64xf32> to vector<2x64xf32>
    %c0_182 = arith.constant 0 : index
    %c0_183 = arith.constant 0 : index
    %1125 = vector.load %arg5[%c0_182, %c0_183] : memref<16x64xf32, #tpu.memory_space<vmem>>, vector<2x64xf32>
    tpu.vector_store %arg5[%c0_182, %c0_183], %1124 {strides = array<i32>} : memref<16x64xf32, #tpu.memory_space<vmem>>, vector<2x64xf32>,
    %1126 = tpu.concatenate %1040, %1054 in 0 : vector<1x8x64xf32>, vector<1x8x64xf32> -> vector<2x8x64xf32>
    %1127 = arith.mulf %1120, %1126 : vector<2x8x64xf32>
    %1128 = tpu.concatenate %1047, %1061 in 0 : vector<1x8x64xf32>, vector<1x8x64xf32> -> vector<2x8x64xf32>
    %1129 = arith.addf %1127, %1128 : vector<2x8x64xf32>
    %1130 = tpu.concatenate %1049, %1063 in 0 : vector<1x8x1xf32>, vector<1x8x1xf32> -> vector<2x8x1xf32>
    %1131 = vector.broadcast %1130 : vector<2x8x1xf32> to vector<2x8x64xf32>
    %1132 = arith.mulf %1129, %1131 : vector<2x8x64xf32>
    %cst_184 = arith.constant dense<0.000000e+00> : vector<2x64xf32>
    %1133 = vector.multi_reduction <add>, %1132, %cst_184 [1] : vector<2x8x64xf32> to vector<2x64xf32>
    %c2_185 = arith.constant 2 : index
    %c0_186 = arith.constant 0 : index
    %1134 = vector.load %arg5[%c2_185, %c0_186] : memref<16x64xf32, #tpu.memory_space<vmem>>, vector<2x64xf32>
    tpu.vector_store %arg5[%c2_185, %c0_186], %1133 {strides = array<i32>} : memref<16x64xf32, #tpu.memory_space<vmem>>, vector<2x64xf32>,
    %1135 = tpu.concatenate %1068, %1082 in 0 : vector<1x8x64xf32>, vector<1x8x64xf32> -> vector<2x8x64xf32>
    %1136 = arith.mulf %1129, %1135 : vector<2x8x64xf32>
    %1137 = tpu.concatenate %1075, %1089 in 0 : vector<1x8x64xf32>, vector<1x8x64xf32> -> vector<2x8x64xf32>
    %1138 = arith.addf %1136, %1137 : vector<2x8x64xf32>
    %1139 = tpu.concatenate %1077, %1091 in 0 : vector<1x8x1xf32>, vector<1x8x1xf32> -> vector<2x8x1xf32>
    %1140 = vector.broadcast %1139 : vector<2x8x1xf32> to vector<2x8x64xf32>
    %1141 = arith.mulf %1138, %1140 : vector<2x8x64xf32>
    %cst_187 = arith.constant dense<0.000000e+00> : vector<2x64xf32>
    %1142 = vector.multi_reduction <add>, %1141, %cst_187 [1] : vector<2x8x64xf32> to vector<2x64xf32>
    %c4_188 = arith.constant 4 : index
    %c0_189 = arith.constant 0 : index
    %1143 = vector.load %arg5[%c4_188, %c0_189] : memref<16x64xf32, #tpu.memory_space<vmem>>, vector<2x64xf32>
    tpu.vector_store %arg5[%c4_188, %c0_189], %1142 {strides = array<i32>} : memref<16x64xf32, #tpu.memory_space<vmem>>, vector<2x64xf32>,
    %1144 = tpu.concatenate %1096, %1110 in 0 : vector<1x8x64xf32>, vector<1x8x64xf32> -> vector<2x8x64xf32>
    %1145 = arith.mulf %1138, %1144 : vector<2x8x64xf32>
    %1146 = tpu.concatenate %1103, %1117 in 0 : vector<1x8x64xf32>, vector<1x8x64xf32> -> vector<2x8x64xf32>
    %1147 = arith.addf %1145, %1146 : vector<2x8x64xf32>
    %1148 = tpu.concatenate %1105, %1119 in 0 : vector<1x8x1xf32>, vector<1x8x1xf32> -> vector<2x8x1xf32>
    %1149 = vector.broadcast %1148 : vector<2x8x1xf32> to vector<2x8x64xf32>
    %1150 = arith.mulf %1147, %1149 : vector<2x8x64xf32>
    %cst_190 = arith.constant dense<0.000000e+00> : vector<2x64xf32>
    %1151 = vector.multi_reduction <add>, %1150, %cst_190 [1] : vector<2x8x64xf32> to vector<2x64xf32>
    %c6_191 = arith.constant 6 : index
    %c0_192 = arith.constant 0 : index
    %1152 = vector.load %arg5[%c6_191, %c0_192] : memref<16x64xf32, #tpu.memory_space<vmem>>, vector<2x64xf32>
    tpu.vector_store %arg5[%c6_191, %c0_192], %1151 {strides = array<i32>} : memref<16x64xf32, #tpu.memory_space<vmem>>, vector<2x64xf32>,
    %c0_193 = arith.constant 0 : index
    %c0_194 = arith.constant 0 : index
    %1153 = vector.load %arg5[%c0_193, %c0_194] : memref<16x64xf32, #tpu.memory_space<vmem>>, vector<8x64xf32>
    %c702 = arith.constant 702 : index
    %c0_195 = arith.constant 0 : index
    %1154 = vector.load %arg2[%c702, %c0_195] : memref<1064x128xf32, #tpu.memory_space<vmem>>, vector<1x128xf32>
    %1155 = vector.extract_strided_slice %1154 {offsets = [0, 0], sizes = [1, 64], strides = [1, 1]} : vector<1x128xf32> to vector<1x64xf32>
    %1156 = vector.broadcast %1155 : vector<1x64xf32> to vector<8x64xf32>
    %1157 = arith.mulf %1156, %994 : vector<8x64xf32>
    %1158 = arith.addf %1153, %1157 : vector<8x64xf32>
    %cst_196 = arith.constant 5.000000e-01 : f32
    %1159 = vector.broadcast %cst_196 : f32 to vector<8x64xf32>
    %1160 = arith.mulf %1159, %960 : vector<8x64xf32>
    %1161 = math.tanh %1160 : vector<8x64xf32>
    %cst_197 = arith.constant 1.000000e+00 : f32
    %1162 = vector.broadcast %cst_197 : f32 to vector<8x64xf32>
    %1163 = arith.addf %1162, %1161 : vector<8x64xf32>
    %cst_198 = arith.constant 5.000000e-01 : f32
    %1164 = vector.broadcast %cst_198 : f32 to vector<8x64xf32>
    %1165 = arith.mulf %1164, %1163 : vector<8x64xf32>
    %1166 = arith.mulf %960, %1165 : vector<8x64xf32>
    %1167 = arith.mulf %1158, %1166 : vector<8x64xf32>
    %c624 = arith.constant 624 : index
    %c0_199 = arith.constant 0 : index
    %1168 = vector.load %arg2[%c624, %c0_199] : memref<1064x128xf32, #tpu.memory_space<vmem>>, vector<64x128xf32>
    %cst_200 = arith.constant dense<0.000000e+00> : vector<8x128xf32>
    %1169 = tpu.matmul %1167, %1168, %cst_200 {dimension_numbers = #tpu.dot_dimension_numbers<[1], [0], [0], [1], [0, 0, 1, 1], [], []>} : vector<8x64xf32>, vector<64x128xf32>, vector<8x128xf32> -> vector<8x128xf32>
    %1170 = vector.extract_strided_slice %1169 {offsets = [0, 0], sizes = [8, 32], strides = [1, 1]} : vector<8x128xf32> to vector<8x32xf32>
    %1171 = vector.extract_strided_slice %736 {offsets = [0, 0], sizes = [2, 32], strides = [1, 1]} : vector<16x32xf32> to vector<2x32xf32>
    %1172 = vector.extract_strided_slice %736 {offsets = [2, 0], sizes = [2, 32], strides = [1, 1]} : vector<16x32xf32> to vector<2x32xf32>
    %1173 = arith.addf %1171, %1172 : vector<2x32xf32>
    %1174 = vector.extract_strided_slice %736 {offsets = [4, 0], sizes = [2, 32], strides = [1, 1]} : vector<16x32xf32> to vector<2x32xf32>
    %1175 = arith.addf %1173, %1174 : vector<2x32xf32>
    %1176 = vector.extract_strided_slice %736 {offsets = [6, 0], sizes = [2, 32], strides = [1, 1]} : vector<16x32xf32> to vector<2x32xf32>
    %1177 = arith.addf %1175, %1176 : vector<2x32xf32>
    %1178 = vector.extract_strided_slice %736 {offsets = [8, 0], sizes = [2, 32], strides = [1, 1]} : vector<16x32xf32> to vector<2x32xf32>
    %1179 = arith.addf %1177, %1178 : vector<2x32xf32>
    %1180 = vector.extract_strided_slice %736 {offsets = [10, 0], sizes = [2, 32], strides = [1, 1]} : vector<16x32xf32> to vector<2x32xf32>
    %1181 = arith.addf %1179, %1180 : vector<2x32xf32>
    %1182 = vector.extract_strided_slice %736 {offsets = [12, 0], sizes = [2, 32], strides = [1, 1]} : vector<16x32xf32> to vector<2x32xf32>
    %1183 = arith.addf %1181, %1182 : vector<2x32xf32>
    %1184 = vector.extract_strided_slice %736 {offsets = [14, 0], sizes = [2, 32], strides = [1, 1]} : vector<16x32xf32> to vector<2x32xf32>
    %1185 = arith.addf %1183, %1184 : vector<2x32xf32>
    %1186 = vector.extract_strided_slice %1170 {offsets = [0, 0], sizes = [2, 32], strides = [1, 1]} : vector<8x32xf32> to vector<2x32xf32>
    %1187 = vector.extract_strided_slice %1170 {offsets = [2, 0], sizes = [2, 32], strides = [1, 1]} : vector<8x32xf32> to vector<2x32xf32>
    %1188 = arith.addf %1186, %1187 : vector<2x32xf32>
    %1189 = vector.extract_strided_slice %1170 {offsets = [4, 0], sizes = [2, 32], strides = [1, 1]} : vector<8x32xf32> to vector<2x32xf32>
    %1190 = arith.addf %1188, %1189 : vector<2x32xf32>
    %1191 = vector.extract_strided_slice %1170 {offsets = [6, 0], sizes = [2, 32], strides = [1, 1]} : vector<8x32xf32> to vector<2x32xf32>
    %1192 = arith.addf %1190, %1191 : vector<2x32xf32>
    %cst_201 = arith.constant 1.250000e-01 : f32
    %1193 = vector.broadcast %cst_201 : f32 to vector<2x32xf32>
    %1194 = arith.mulf %1185, %1193 : vector<2x32xf32>
    %cst_202 = arith.constant 2.500000e-01 : f32
    %1195 = vector.broadcast %cst_202 : f32 to vector<2x32xf32>
    %1196 = arith.mulf %1192, %1195 : vector<2x32xf32>
    %1197 = arith.addf %1194, %1196 : vector<2x32xf32>
    %1198 = math.tanh %1197 : vector<2x32xf32>
    %c704 = arith.constant 704 : index
    %c0_203 = arith.constant 0 : index
    %1199 = vector.load %arg2[%c704, %c0_203] : memref<1064x128xf32, #tpu.memory_space<vmem>>, vector<32x128xf32>
    %cst_204 = arith.constant dense<0.000000e+00> : vector<2x128xf32>
    %1200 = tpu.matmul %1198, %1199, %cst_204 {dimension_numbers = #tpu.dot_dimension_numbers<[1], [0], [0], [1], [0, 0, 1, 1], [], []>} : vector<2x32xf32>, vector<32x128xf32>, vector<2x128xf32> -> vector<2x128xf32>
    %1201 = vector.extract_strided_slice %1200 {offsets = [0, 0], sizes = [2, 64], strides = [1, 1]} : vector<2x128xf32> to vector<2x64xf32>
    %1202 = vector.extract_strided_slice %1200 {offsets = [0, 64], sizes = [2, 64], strides = [1, 1]} : vector<2x128xf32> to vector<2x64xf32>
    %c872 = arith.constant 872 : index
    %c0_205 = arith.constant 0 : index
    %1203 = vector.load %arg2[%c872, %c0_205] : memref<1064x128xf32, #tpu.memory_space<vmem>>, vector<4x128xf32>
    %1204 = vector.extract_strided_slice %1203 {offsets = [0, 0], sizes = [4, 64], strides = [1, 1]} : vector<4x128xf32> to vector<4x64xf32>
    %c876 = arith.constant 876 : index
    %c0_206 = arith.constant 0 : index
    %1205 = vector.load %arg2[%c876, %c0_206] : memref<1064x128xf32, #tpu.memory_space<vmem>>, vector<1x128xf32>
    %1206 = vector.extract_strided_slice %1205 {offsets = [0, 0], sizes = [1, 64], strides = [1, 1]} : vector<1x128xf32> to vector<1x64xf32>
    %1207 = vector.extract_strided_slice %1204 {offsets = [3, 0], sizes = [1, 64], strides = [1, 1]} : vector<4x64xf32> to vector<1x64xf32>
    %1208 = vector.broadcast %1207 : vector<1x64xf32> to vector<2x64xf32>
    %1209 = arith.mulf %1201, %1208 : vector<2x64xf32>
    %1210 = vector.broadcast %1206 : vector<1x64xf32> to vector<2x64xf32>
    %1211 = arith.addf %1209, %1210 : vector<2x64xf32>
    %cst_207 = arith.constant 5.000000e-01 : f32
    %1212 = vector.broadcast %cst_207 : f32 to vector<2x64xf32>
    %1213 = arith.mulf %1212, %1211 : vector<2x64xf32>
    %1214 = math.tanh %1213 : vector<2x64xf32>
    %cst_208 = arith.constant 1.000000e+00 : f32
    %1215 = vector.broadcast %cst_208 : f32 to vector<2x64xf32>
    %1216 = arith.addf %1215, %1214 : vector<2x64xf32>
    %cst_209 = arith.constant 5.000000e-01 : f32
    %1217 = vector.broadcast %cst_209 : f32 to vector<2x64xf32>
    %1218 = arith.mulf %1217, %1216 : vector<2x64xf32>
    %1219 = arith.mulf %1211, %1218 : vector<2x64xf32>
    %c736 = arith.constant 736 : index
    %c0_210 = arith.constant 0 : index
    %1220 = vector.load %arg2[%c736, %c0_210] : memref<1064x128xf32, #tpu.memory_space<vmem>>, vector<64x128xf32>
    %cst_211 = arith.constant dense<0.000000e+00> : vector<2x128xf32>
    %1221 = tpu.matmul %1219, %1220, %cst_211 {dimension_numbers = #tpu.dot_dimension_numbers<[1], [0], [0], [1], [0, 0, 1, 1], [], []>} : vector<2x64xf32>, vector<64x128xf32>, vector<2x128xf32> -> vector<2x128xf32>
    %c877 = arith.constant 877 : index
    %c0_212 = arith.constant 0 : index
    %1222 = vector.load %arg2[%c877, %c0_212] : memref<1064x128xf32, #tpu.memory_space<vmem>>, vector<1x128xf32>
    %1223 = vector.extract_strided_slice %1222 {offsets = [0, 0], sizes = [1, 64], strides = [1, 1]} : vector<1x128xf32> to vector<1x64xf32>
    %1224 = vector.extract_strided_slice %1221 {offsets = [0, 0], sizes = [2, 64], strides = [1, 1]} : vector<2x128xf32> to vector<2x64xf32>
    %1225 = vector.broadcast %1223 : vector<1x64xf32> to vector<2x64xf32>
    %1226 = arith.addf %1224, %1225 : vector<2x64xf32>
    %cst_213 = arith.constant 0.000000e+00 : f32
    %1227 = vector.broadcast %cst_213 : f32 to vector<2x64xf32>
    %1228 = arith.maximumf %1226, %1227 : vector<2x64xf32>
    %1229 = math.absf %1226 : vector<2x64xf32>
    %cst_214 = arith.constant 0.000000e+00 : f32
    %1230 = vector.broadcast %cst_214 : f32 to vector<2x64xf32>
    %1231 = arith.subf %1230, %1229 : vector<2x64xf32>
    %1232 = math.exp %1231 : vector<2x64xf32>
    %cst_215 = arith.constant 1.000000e+00 : f32
    %1233 = vector.broadcast %cst_215 : f32 to vector<2x64xf32>
    %1234 = arith.addf %1233, %1232 : vector<2x64xf32>
    %1235 = math.log %1234 : vector<2x64xf32>
    %1236 = arith.addf %1228, %1235 : vector<2x64xf32>
    %1237 = vector.extract_strided_slice %1221 {offsets = [0, 64], sizes = [2, 8], strides = [1, 1]} : vector<2x128xf32> to vector<2x8xf32>
    %1238 = vector.extract_strided_slice %1221 {offsets = [0, 72], sizes = [2, 8], strides = [1, 1]} : vector<2x128xf32> to vector<2x8xf32>
    %1239 = arith.mulf %1236, %1219 : vector<2x64xf32>
    %1240 = vector.extract_strided_slice %1239 {offsets = [0, 0], sizes = [1, 64], strides = [1, 1]} : vector<2x64xf32> to vector<1x64xf32>
    %1241 = vector.shape_cast %1240 : vector<1x64xf32> to vector<1x1x64xf32>
    %1242 = vector.extract_strided_slice %1237 {offsets = [0, 0], sizes = [1, 8], strides = [1, 1]} : vector<2x8xf32> to vector<1x8xf32>
    %1243 = vector.shape_cast %1242 : vector<1x8xf32> to vector<1x8x1xf32>
    %1244 = vector.broadcast %1241 : vector<1x1x64xf32> to vector<1x8x64xf32>
    %1245 = vector.broadcast %1243 : vector<1x8x1xf32> to vector<1x8x64xf32>
    %1246 = arith.mulf %1244, %1245 : vector<1x8x64xf32>
    %1247 = vector.extract_strided_slice %1238 {offsets = [0, 0], sizes = [1, 8], strides = [1, 1]} : vector<2x8xf32> to vector<1x8xf32>
    %1248 = vector.shape_cast %1247 : vector<1x8xf32> to vector<1x8x1xf32>
    %1249 = vector.extract_strided_slice %1239 {offsets = [1, 0], sizes = [1, 64], strides = [1, 1]} : vector<2x64xf32> to vector<1x64xf32>
    %1250 = vector.shape_cast %1249 : vector<1x64xf32> to vector<1x1x64xf32>
    %1251 = vector.extract_strided_slice %1237 {offsets = [1, 0], sizes = [1, 8], strides = [1, 1]} : vector<2x8xf32> to vector<1x8xf32>
    %1252 = vector.shape_cast %1251 : vector<1x8xf32> to vector<1x8x1xf32>
    %1253 = vector.broadcast %1250 : vector<1x1x64xf32> to vector<1x8x64xf32>
    %1254 = vector.broadcast %1252 : vector<1x8x1xf32> to vector<1x8x64xf32>
    %1255 = arith.mulf %1253, %1254 : vector<1x8x64xf32>
    %1256 = vector.extract_strided_slice %1238 {offsets = [1, 0], sizes = [1, 8], strides = [1, 1]} : vector<2x8xf32> to vector<1x8xf32>
    %1257 = vector.shape_cast %1256 : vector<1x8xf32> to vector<1x8x1xf32>
    %1258 = tpu.concatenate %1246, %1255 in 0 : vector<1x8x64xf32>, vector<1x8x64xf32> -> vector<2x8x64xf32>
    %1259 = tpu.concatenate %1248, %1257 in 0 : vector<1x8x1xf32>, vector<1x8x1xf32> -> vector<2x8x1xf32>
    %1260 = vector.broadcast %1259 : vector<2x8x1xf32> to vector<2x8x64xf32>
    %1261 = arith.mulf %1258, %1260 : vector<2x8x64xf32>
    %cst_216 = arith.constant dense<0.000000e+00> : vector<2x64xf32>
    %1262 = vector.multi_reduction <add>, %1261, %cst_216 [1] : vector<2x8x64xf32> to vector<2x64xf32>
    %c0_217 = arith.constant 0 : index
    %c0_218 = arith.constant 0 : index
    %1263 = vector.load %arg5[%c0_217, %c0_218] : memref<16x64xf32, #tpu.memory_space<vmem>>, vector<2x64xf32>
    tpu.vector_store %arg5[%c0_217, %c0_218], %1262 {strides = array<i32>} : memref<16x64xf32, #tpu.memory_space<vmem>>, vector<2x64xf32>,
    %c0_219 = arith.constant 0 : index
    %c0_220 = arith.constant 0 : index
    %1264 = vector.load %arg5[%c0_219, %c0_220] : memref<16x64xf32, #tpu.memory_space<vmem>>, vector<2x64xf32>
    %c878 = arith.constant 878 : index
    %c0_221 = arith.constant 0 : index
    %1265 = vector.load %arg2[%c878, %c0_221] : memref<1064x128xf32, #tpu.memory_space<vmem>>, vector<1x128xf32>
    %1266 = vector.extract_strided_slice %1265 {offsets = [0, 0], sizes = [1, 64], strides = [1, 1]} : vector<1x128xf32> to vector<1x64xf32>
    %1267 = vector.broadcast %1266 : vector<1x64xf32> to vector<2x64xf32>
    %1268 = arith.mulf %1267, %1219 : vector<2x64xf32>
    %1269 = arith.addf %1264, %1268 : vector<2x64xf32>
    %cst_222 = arith.constant 5.000000e-01 : f32
    %1270 = vector.broadcast %cst_222 : f32 to vector<2x64xf32>
    %1271 = arith.mulf %1270, %1202 : vector<2x64xf32>
    %1272 = math.tanh %1271 : vector<2x64xf32>
    %cst_223 = arith.constant 1.000000e+00 : f32
    %1273 = vector.broadcast %cst_223 : f32 to vector<2x64xf32>
    %1274 = arith.addf %1273, %1272 : vector<2x64xf32>
    %cst_224 = arith.constant 5.000000e-01 : f32
    %1275 = vector.broadcast %cst_224 : f32 to vector<2x64xf32>
    %1276 = arith.mulf %1275, %1274 : vector<2x64xf32>
    %1277 = arith.mulf %1202, %1276 : vector<2x64xf32>
    %1278 = arith.mulf %1269, %1277 : vector<2x64xf32>
    %c800 = arith.constant 800 : index
    %c0_225 = arith.constant 0 : index
    %1279 = vector.load %arg2[%c800, %c0_225] : memref<1064x128xf32, #tpu.memory_space<vmem>>, vector<64x128xf32>
    %cst_226 = arith.constant dense<0.000000e+00> : vector<2x128xf32>
    %1280 = tpu.matmul %1278, %1279, %cst_226 {dimension_numbers = #tpu.dot_dimension_numbers<[1], [0], [0], [1], [0, 0, 1, 1], [], []>} : vector<2x64xf32>, vector<64x128xf32>, vector<2x128xf32> -> vector<2x128xf32>
    %1281 = vector.extract_strided_slice %1280 {offsets = [0, 0], sizes = [2, 32], strides = [1, 1]} : vector<2x128xf32> to vector<2x32xf32>
    %1282 = math.tanh %1281 : vector<2x32xf32>
    %c880 = arith.constant 880 : index
    %c0_227 = arith.constant 0 : index
    %1283 = vector.load %arg2[%c880, %c0_227] : memref<1064x128xf32, #tpu.memory_space<vmem>>, vector<32x128xf32>
    %cst_228 = arith.constant dense<0.000000e+00> : vector<2x128xf32>
    %1284 = tpu.matmul %1282, %1283, %cst_228 {dimension_numbers = #tpu.dot_dimension_numbers<[1], [0], [0], [1], [0, 0, 1, 1], [], []>} : vector<2x32xf32>, vector<32x128xf32>, vector<2x128xf32> -> vector<2x128xf32>
    %1285 = vector.extract_strided_slice %1284 {offsets = [0, 0], sizes = [2, 64], strides = [1, 1]} : vector<2x128xf32> to vector<2x64xf32>
    %1286 = vector.extract_strided_slice %1284 {offsets = [0, 64], sizes = [2, 64], strides = [1, 1]} : vector<2x128xf32> to vector<2x64xf32>
    %c1048 = arith.constant 1048 : index
    %c0_229 = arith.constant 0 : index
    %1287 = vector.load %arg2[%c1048, %c0_229] : memref<1064x128xf32, #tpu.memory_space<vmem>>, vector<4x128xf32>
    %1288 = vector.extract_strided_slice %1287 {offsets = [0, 0], sizes = [4, 64], strides = [1, 1]} : vector<4x128xf32> to vector<4x64xf32>
    %c1052 = arith.constant 1052 : index
    %c0_230 = arith.constant 0 : index
    %1289 = vector.load %arg2[%c1052, %c0_230] : memref<1064x128xf32, #tpu.memory_space<vmem>>, vector<1x128xf32>
    %1290 = vector.extract_strided_slice %1289 {offsets = [0, 0], sizes = [1, 64], strides = [1, 1]} : vector<1x128xf32> to vector<1x64xf32>
    %1291 = vector.extract_strided_slice %1288 {offsets = [3, 0], sizes = [1, 64], strides = [1, 1]} : vector<4x64xf32> to vector<1x64xf32>
    %1292 = vector.broadcast %1291 : vector<1x64xf32> to vector<2x64xf32>
    %1293 = arith.mulf %1285, %1292 : vector<2x64xf32>
    %1294 = vector.broadcast %1290 : vector<1x64xf32> to vector<2x64xf32>
    %1295 = arith.addf %1293, %1294 : vector<2x64xf32>
    %cst_231 = arith.constant 5.000000e-01 : f32
    %1296 = vector.broadcast %cst_231 : f32 to vector<2x64xf32>
    %1297 = arith.mulf %1296, %1295 : vector<2x64xf32>
    %1298 = math.tanh %1297 : vector<2x64xf32>
    %cst_232 = arith.constant 1.000000e+00 : f32
    %1299 = vector.broadcast %cst_232 : f32 to vector<2x64xf32>
    %1300 = arith.addf %1299, %1298 : vector<2x64xf32>
    %cst_233 = arith.constant 5.000000e-01 : f32
    %1301 = vector.broadcast %cst_233 : f32 to vector<2x64xf32>
    %1302 = arith.mulf %1301, %1300 : vector<2x64xf32>
    %1303 = arith.mulf %1295, %1302 : vector<2x64xf32>
    %c912 = arith.constant 912 : index
    %c0_234 = arith.constant 0 : index
    %1304 = vector.load %arg2[%c912, %c0_234] : memref<1064x128xf32, #tpu.memory_space<vmem>>, vector<64x128xf32>
    %cst_235 = arith.constant dense<0.000000e+00> : vector<2x128xf32>
    %1305 = tpu.matmul %1303, %1304, %cst_235 {dimension_numbers = #tpu.dot_dimension_numbers<[1], [0], [0], [1], [0, 0, 1, 1], [], []>} : vector<2x64xf32>, vector<64x128xf32>, vector<2x128xf32> -> vector<2x128xf32>
    %c1053 = arith.constant 1053 : index
    %c0_236 = arith.constant 0 : index
    %1306 = vector.load %arg2[%c1053, %c0_236] : memref<1064x128xf32, #tpu.memory_space<vmem>>, vector<1x128xf32>
    %1307 = vector.extract_strided_slice %1306 {offsets = [0, 0], sizes = [1, 64], strides = [1, 1]} : vector<1x128xf32> to vector<1x64xf32>
    %1308 = vector.extract_strided_slice %1305 {offsets = [0, 0], sizes = [2, 64], strides = [1, 1]} : vector<2x128xf32> to vector<2x64xf32>
    %1309 = vector.broadcast %1307 : vector<1x64xf32> to vector<2x64xf32>
    %1310 = arith.addf %1308, %1309 : vector<2x64xf32>
    %cst_237 = arith.constant 0.000000e+00 : f32
    %1311 = vector.broadcast %cst_237 : f32 to vector<2x64xf32>
    %1312 = arith.maximumf %1310, %1311 : vector<2x64xf32>
    %1313 = math.absf %1310 : vector<2x64xf32>
    %cst_238 = arith.constant 0.000000e+00 : f32
    %1314 = vector.broadcast %cst_238 : f32 to vector<2x64xf32>
    %1315 = arith.subf %1314, %1313 : vector<2x64xf32>
    %1316 = math.exp %1315 : vector<2x64xf32>
    %cst_239 = arith.constant 1.000000e+00 : f32
    %1317 = vector.broadcast %cst_239 : f32 to vector<2x64xf32>
    %1318 = arith.addf %1317, %1316 : vector<2x64xf32>
    %1319 = math.log %1318 : vector<2x64xf32>
    %1320 = arith.addf %1312, %1319 : vector<2x64xf32>
    %1321 = vector.extract_strided_slice %1305 {offsets = [0, 64], sizes = [2, 8], strides = [1, 1]} : vector<2x128xf32> to vector<2x8xf32>
    %1322 = vector.extract_strided_slice %1305 {offsets = [0, 72], sizes = [2, 8], strides = [1, 1]} : vector<2x128xf32> to vector<2x8xf32>
    %1323 = arith.mulf %1320, %1303 : vector<2x64xf32>
    %1324 = vector.extract_strided_slice %1323 {offsets = [0, 0], sizes = [1, 64], strides = [1, 1]} : vector<2x64xf32> to vector<1x64xf32>
    %1325 = vector.shape_cast %1324 : vector<1x64xf32> to vector<1x1x64xf32>
    %1326 = vector.extract_strided_slice %1321 {offsets = [0, 0], sizes = [1, 8], strides = [1, 1]} : vector<2x8xf32> to vector<1x8xf32>
    %1327 = vector.shape_cast %1326 : vector<1x8xf32> to vector<1x8x1xf32>
    %1328 = vector.broadcast %1325 : vector<1x1x64xf32> to vector<1x8x64xf32>
    %1329 = vector.broadcast %1327 : vector<1x8x1xf32> to vector<1x8x64xf32>
    %1330 = arith.mulf %1328, %1329 : vector<1x8x64xf32>
    %1331 = vector.extract_strided_slice %1322 {offsets = [0, 0], sizes = [1, 8], strides = [1, 1]} : vector<2x8xf32> to vector<1x8xf32>
    %1332 = vector.shape_cast %1331 : vector<1x8xf32> to vector<1x8x1xf32>
    %1333 = vector.extract_strided_slice %1323 {offsets = [1, 0], sizes = [1, 64], strides = [1, 1]} : vector<2x64xf32> to vector<1x64xf32>
    %1334 = vector.shape_cast %1333 : vector<1x64xf32> to vector<1x1x64xf32>
    %1335 = vector.extract_strided_slice %1321 {offsets = [1, 0], sizes = [1, 8], strides = [1, 1]} : vector<2x8xf32> to vector<1x8xf32>
    %1336 = vector.shape_cast %1335 : vector<1x8xf32> to vector<1x8x1xf32>
    %1337 = vector.broadcast %1334 : vector<1x1x64xf32> to vector<1x8x64xf32>
    %1338 = vector.broadcast %1336 : vector<1x8x1xf32> to vector<1x8x64xf32>
    %1339 = arith.mulf %1337, %1338 : vector<1x8x64xf32>
    %1340 = vector.extract_strided_slice %1322 {offsets = [1, 0], sizes = [1, 8], strides = [1, 1]} : vector<2x8xf32> to vector<1x8xf32>
    %1341 = vector.shape_cast %1340 : vector<1x8xf32> to vector<1x8x1xf32>
    %1342 = tpu.concatenate %1330, %1339 in 0 : vector<1x8x64xf32>, vector<1x8x64xf32> -> vector<2x8x64xf32>
    %1343 = tpu.concatenate %1332, %1341 in 0 : vector<1x8x1xf32>, vector<1x8x1xf32> -> vector<2x8x1xf32>
    %1344 = vector.broadcast %1343 : vector<2x8x1xf32> to vector<2x8x64xf32>
    %1345 = arith.mulf %1342, %1344 : vector<2x8x64xf32>
    %cst_240 = arith.constant dense<0.000000e+00> : vector<2x64xf32>
    %1346 = vector.multi_reduction <add>, %1345, %cst_240 [1] : vector<2x8x64xf32> to vector<2x64xf32>
    %c0_241 = arith.constant 0 : index
    %c0_242 = arith.constant 0 : index
    %1347 = vector.load %arg5[%c0_241, %c0_242] : memref<16x64xf32, #tpu.memory_space<vmem>>, vector<2x64xf32>
    tpu.vector_store %arg5[%c0_241, %c0_242], %1346 {strides = array<i32>} : memref<16x64xf32, #tpu.memory_space<vmem>>, vector<2x64xf32>,
    %c0_243 = arith.constant 0 : index
    %c0_244 = arith.constant 0 : index
    %1348 = vector.load %arg5[%c0_243, %c0_244] : memref<16x64xf32, #tpu.memory_space<vmem>>, vector<2x64xf32>
    %c1054 = arith.constant 1054 : index
    %c0_245 = arith.constant 0 : index
    %1349 = vector.load %arg2[%c1054, %c0_245] : memref<1064x128xf32, #tpu.memory_space<vmem>>, vector<1x128xf32>
    %1350 = vector.extract_strided_slice %1349 {offsets = [0, 0], sizes = [1, 64], strides = [1, 1]} : vector<1x128xf32> to vector<1x64xf32>
    %1351 = vector.broadcast %1350 : vector<1x64xf32> to vector<2x64xf32>
    %1352 = arith.mulf %1351, %1303 : vector<2x64xf32>
    %1353 = arith.addf %1348, %1352 : vector<2x64xf32>
    %cst_246 = arith.constant 5.000000e-01 : f32
    %1354 = vector.broadcast %cst_246 : f32 to vector<2x64xf32>
    %1355 = arith.mulf %1354, %1286 : vector<2x64xf32>
    %1356 = math.tanh %1355 : vector<2x64xf32>
    %cst_247 = arith.constant 1.000000e+00 : f32
    %1357 = vector.broadcast %cst_247 : f32 to vector<2x64xf32>
    %1358 = arith.addf %1357, %1356 : vector<2x64xf32>
    %cst_248 = arith.constant 5.000000e-01 : f32
    %1359 = vector.broadcast %cst_248 : f32 to vector<2x64xf32>
    %1360 = arith.mulf %1359, %1358 : vector<2x64xf32>
    %1361 = arith.mulf %1286, %1360 : vector<2x64xf32>
    %1362 = arith.mulf %1353, %1361 : vector<2x64xf32>
    %c976 = arith.constant 976 : index
    %c0_249 = arith.constant 0 : index
    %1363 = vector.load %arg2[%c976, %c0_249] : memref<1064x128xf32, #tpu.memory_space<vmem>>, vector<64x128xf32>
    %cst_250 = arith.constant dense<0.000000e+00> : vector<2x128xf32>
    %1364 = tpu.matmul %1362, %1363, %cst_250 {dimension_numbers = #tpu.dot_dimension_numbers<[1], [0], [0], [1], [0, 0, 1, 1], [], []>} : vector<2x64xf32>, vector<64x128xf32>, vector<2x128xf32> -> vector<2x128xf32>
    %1365 = vector.extract_strided_slice %1364 {offsets = [0, 0], sizes = [2, 32], strides = [1, 1]} : vector<2x128xf32> to vector<2x32xf32>
    %cst_251 = arith.constant dense<0.000000e+00> : vector<2xf32>
    %1366 = vector.multi_reduction <add>, %1365, %cst_251 [1] : vector<2x32xf32> to vector<2xf32>
    %1367 = vector.shape_cast %1366 : vector<2xf32> to vector<2x1xf32>
    %cst_252 = arith.constant 3.200000e+01 : f32
    %1368 = vector.broadcast %cst_252 : f32 to vector<2x1xf32>
    %1369 = arith.divf %1367, %1368 : vector<2x1xf32>
    %c0_253 = arith.constant 0 : index
    %c0_254 = arith.constant 0 : index
    %1370 = vector.load %arg3[%c0_253, %c0_254] : memref<2x1xf32, #tpu.memory_space<vmem>>, vector<2x1xf32>
    tpu.vector_store %arg3[%c0_253, %c0_254], %1369 {strides = array<i32>} : memref<2x1xf32, #tpu.memory_space<vmem>>, vector<2x1xf32>,
    return
  }
}

</mosaic_0001>

<bundles_post_ra>
// kernel: tpu_custom_call.1
= control target key start
LH: loop header
LB: loop body
LE: loop exit
PB: predicated region body
PF: predicated region fallthrough
CT: control target
= control target key end

     0   :  { %8 = vsyncpa [#allocation5], 0  ;;  %s5008_s12 = smov [#allocation4]   ;;  %s5812_s0 = inlined_call_operand.vmem [shape: f32[16,1], index: 0, kind: input, shape index: {}]   ;;  %s5813_s1 = inlined_call_operand.vmem [shape: f32[8,1], index: 1, kind: input, shape index: {}]   ;;  %s5814_s2 = inlined_call_operand.hbm [shape: f32[1064,128], index: 2, kind: input, shape index: {}]   ;;  %s5815_s3 = inlined_call_operand.vmem [shape: f32[2,1], index: 3, kind: output, shape index: {}]  }
   0x1   :  { %s18_s13 = sshll.u32 %s5008_s12, 4  ;;  %s4984_s16 = scalar_lea.hbm %s5814_s2, 17024  ;;  %s19_s13 = int_to_ptr.vmem [resolvable:$true] %s18_s13 }
   0x2   :  { %p4985_p0 = scmp.ne.s32.totalorder %s5814_s2, %s4984_s16  ;;  %p4988_p1 = scmp.lt.u32.totalorder %s4984_s16, %s5814_s2 }
   0x4   :  { %p4990_p2 = pnand %p4988_p1, %p4985_p0 }
   0x6   :  { %4993 = shalt.err (!%p4990_p2)
}
   0x7   :  { %s4994_s21 = scalar_lea.vmem %s19_s13, 17024  ;;  %p4999_p4 = scmp.lt.s32.totalorder %s19_s13, %s19_s13 }
   0x8   :  { %p4995_p3 = scmp.ne.s32.totalorder %s19_s13, %s4994_s21  ;;  %p5000_p5 = scmp.lt.s32.totalorder %s4994_s21, %s4994_s21 }
   0xa   :  { %p5001_p6 = por %p5000_p5, %p4999_p4 }
   0xc   :  { %p5002_p7 = pnand %p5001_p6, %p4995_p3 }
   0xe   :  { %5005 = shalt.err (!%p5002_p7)
}
   0xf   :  { %s5009_s22 = smov 128   ;;  %s5010_s23 = smov 8  }
  0x10   :  { %24 = dma.hbm_to_vmem [thread:$0]  %s5814_s2, 17024, %s19_s13, [#allocation5], %s5009_s22, %s5009_s22, %s5010_s23  }
  0x11   :  { %5006 = dma.done.wait [#allocation5], 17024  }
  0x12   :  { %5007 = vsyncadd [#allocation5], 4294950272  ;;  %v5011_v0 = vmov 0   ;;  %v31_v1 = vld [vmem:[%s5812_s0] sm:$0xff]  ;;  %v4134_v2 = vld [vmem:[#allocation4 + $0x420] ss:$0 sm:$0xff]  ;;  %v147_v30 = vlaneseq }
  0x13   :  { %4824 = vset.pattern.permute.xlu0 %v5011_v0  ;;  %4825 = vset.pattern.permute.xlu1 %v5011_v0  ;;  %s5012_s28 = smov 96   ;;  %v55_v3 = vld [vmem:[#allocation4] sm:$0xff]  ;;  %v56_v4 = vld [vmem:[#allocation4 + $0x8] sm:$0xff]  ;;  %v57_v7 = vld [vmem:[#allocation4 + $0x10] sm:$0xff]  ;;  %vm59_vm0 = vcmask 261120   ;;  %vm28_vm1 = vcmask 523264  }
  0x14   :  { %35 = vperm.xlu0 %4824, %v31_v1   ;;  %50 = vrot.lane.b32.xlu1 %v4134_v2, %s5012_s28  ;;  %v32_v5 = vld [vmem:[%s5812_s0 + $0x8] sm:$0xff]  ;;  %v4615_v6 = vpack.c.bf16 %v56_v4, %v55_v3  ;;  %v58_v8 = vld [vmem:[#allocation4 + $0x18] sm:$0xff]  ;;  %v5013_v17 = vmov 0.0   ;;  %v200_v19 = vld [vmem:[#allocation4 + $0x28] sm:$0xff]  ;;  %v5059_v31 = vshrl.u32 %v147_v30, 7  ;;  %s5014_s0 = smov 64  }
  0x15   :  { %v4619_v9 = vpack.c.bf16 %v58_v8, %v57_v7  ;;  %29 = vst.msk [vmem:[#allocation2] sm:$0xff] %vm28_vm1, %v5013_v17  ;;  %v199_v18 = vld [vmem:[#allocation4 + $0x20] sm:$0xff]  ;;  %v201_v20 = vld [vmem:[#allocation4 + $0x30] sm:$0xff]  ;;  %v202_v22 = vld [vmem:[#allocation4 + $0x38] sm:$0xff]  ;;  %vm714_vm2 = vcmask 1041409   ;;  %vm717_vm3 = vcmask 517120  }
  0x16   :  { %4616 = vmatprep.subr.bf16.mxu0 %v4615_v6  ;;  %v4623_v21 = vpack.c.bf16 %v200_v19, %v199_v18  ;;  %v4627_v23 = vpack.c.bf16 %v202_v22, %v201_v20  ;;  %v203_v24 = vld [vmem:[#allocation4 + $0x40] sm:$0xff]  ;;  %v204_v25 = vld [vmem:[#allocation4 + $0x48] sm:$0xff]  ;;  %v205_v27 = vld [vmem:[#allocation4 + $0x50] sm:$0xff]  ;;  %v5068_v34 = vsub.s32 3, %v5059_v31  ;;  %v5073_v36 = vsub.s32 2, %v5059_v31 }
  0x17   :  { %4618 = vmatpush3.bf16.msra.mxu0 %v4615_v6  ;;  %v4631_v26 = vpack.c.bf16 %v204_v25, %v203_v24  ;;  %v206_v28 = vld [vmem:[#allocation4 + $0x58] sm:$0xff]  ;;  %v141_v35 = vld [vmem:[#allocation4 + $0xa8] sm:$0xf]  ;;  %v5076_v37 = vsub.s32 1, %v5059_v31  ;;  %v5081_v40 = vsub.s32 0, %v5059_v31  ;;  %v5101_v22 = vsub.s32 4, %v5059_v31 }
  0x18   :  { %40 = vperm.xlu0 %4824, %v32_v5   ;;  %4620 = vmatprep.subr.bf16.mxu0 %v4619_v9  ;;  %v4635_v29 = vpack.c.bf16 %v206_v28, %v205_v27  ;;  %v150_v38 = vrot.slane %v141_v35, %v5068_v34  ;;  %v158_v39 = vrot.slane %v141_v35, %v5073_v36  ;;  %v4137_v63 = vld [vmem:[#allocation4 + $0xac] ss:$0 sm:$0xff]  ;;  %v5106_v25 = vsub.s32 7, %v5059_v31 }
  0x19   :  { %4624 = vmatprep.subr.bf16.mxu1 %v4623_v21  ;;  %v168_v42 = vrot.slane %v141_v35, %v5076_v37  ;;  %v178_v52 = vrot.slane %v141_v35, %v5081_v40  ;;  %vm5016_vm4 = vmmov 0   ;;  %vm4121_vm5 = vcmask 254976  }
  0x1a   :  { %4626 = vmatpush3.bf16.msra.mxu1 %v4623_v21  ;;  %v5098_v21 = vsub.s32 5, %v5059_v31  ;;  %vm4127_vm6 = vcmask 1024  }
  0x1b   :  { %4622 = vmatpush3.bf16.msra.mxu0 %v4619_v9  ;;  %4628 = vmatprep.subr.bf16.mxu1 %v4627_v23 }
  0x1e   :  { %4630 = vmatpush3.bf16.msra.mxu1 %v4627_v23 }
  0x1f   :  { %4632 = vmatprep.subr.bf16.mxu1 %v4631_v26 }
  0x22   :  { %4634 = vmatpush3.bf16.msra.mxu1 %v4631_v26  ;;  %v5109_v26 = vsub.s32 6, %v5059_v31 }
  0x23   :  { %4636 = vmatprep.subr.bf16.mxu1 %v4635_v29 }
  0x26   :  { %4638 = vmatpush3.bf16.msra.mxu1 %v4635_v29 }
  0x86   :  { %v51_v11 = vpop.permute.xlu1 %50 }
  0x93   :  { %v36_v10 = vpop.permute.xlu0 %35 }
  0x94   :  { %v47_v12 = vmul.f32 %v4134_v2, %v36_v10 }
  0x96   :  { %v53_v13 = vadd.f32 %v51_v11, %v47_v12 }
  0x97   :  { %v41_v14 = vpop.permute.xlu0 %40 }
  0x98   :  { %v48_v15 = vmul.f32 %v4134_v2, %v41_v14  ;;  %4329 = vmatprep.mubr.msk.f32.mxu0 %vm59_vm0, %v53_v13 }
  0x9a   :  { %v54_v16 = vadd.f32 %v51_v11, %v48_v15 }
  0x9c   :  { %4330 = vmatmul.mubr.msk.f32.vlgmr.msra.gmra.mrb[0].mxu0 %vm59_vm0, %v54_v16 }
 0x16f   :  { %v5061_v32 = vpop.f32.mrb[0].mxu0 }
 0x170   :  { %144 = vst.msk [vmem:[#allocation2 + $0x10] sm:$0xff] %vm28_vm1, %v5061_v32  ;;  %v5065_v33 = vpop.f32.mrb[1].mxu0 }
 0x171   :  { %143 = vst.msk [vmem:[#allocation2 + $0x8] sm:$0xff] %vm28_vm1, %v5065_v33 }
 0x177   :  { %v146_v41 = vld [vmem:[#allocation2 + $0x10] sm:$0xff] }
 0x178   :  { %v145_v43 = vld [vmem:[#allocation2 + $0x8] sm:$0xff]  ;;  %v152_v44 = vmul.f32 %v150_v38, %v146_v41 }
 0x179   :  { %v153_v45 = vld [vmem:[#allocation2 + $0x6] sm:$0xff]  ;;  %v154_v46 = vld [vmem:[#allocation2 + $0xe] sm:$0xff]  ;;  %v151_v47 = vmul.f32 %v150_v38, %v145_v43 }
 0x17a   :  { %v159_v48 = vmul.f32 %v158_v39, %v153_v45  ;;  %v160_v49 = vmul.f32 %v158_v39, %v154_v46  ;;  %v163_v50 = vld [vmem:[#allocation2 + $0x4] sm:$0xff]  ;;  %v164_v51 = vld [vmem:[#allocation2 + $0xc] sm:$0xff]  ;;  %v4140_v43 = vld [vmem:[#allocation4 + $0xad] ss:$0 sm:$0xff] }
 0x17b   :  { %v173_v53 = vld [vmem:[#allocation2 + $0x2] sm:$0xff]  ;;  %v174_v54 = vld [vmem:[#allocation2 + $0xa] sm:$0xff]  ;;  %v169_v57 = vmul.f32 %v168_v42, %v163_v50  ;;  %v170_v58 = vmul.f32 %v168_v42, %v164_v51 }
 0x17c   :  { %v161_v55 = vadd.f32 %v159_v48, %v151_v47  ;;  %v162_v56 = vadd.f32 %v160_v49, %v152_v44  ;;  %v179_v61 = vmul.f32 %v178_v52, %v173_v53  ;;  %v180_v62 = vmul.f32 %v178_v52, %v174_v54 }
 0x17e   :  { %v171_v59 = vadd.f32 %v169_v57, %v161_v55  ;;  %v172_v60 = vadd.f32 %v170_v58, %v162_v56 }
 0x180   :  { %v181_v0 = vadd.f32 %v179_v61, %v171_v59  ;;  %v182_v1 = vadd.f32 %v180_v62, %v172_v60  ;;  %v976_v61 = vmul.f32 0.5, %v5061_v32  ;;  %v975_v62 = vmul.f32 0.5, %v5065_v33 }
 0x182   :  { %v187_v2 = vadd.f32 %v4137_v63, %v181_v0  ;;  %v188_v3 = vadd.f32 %v4137_v63, %v182_v1 }
 0x184   :  { %v189_v4 = vmul.f32 0.5, %v187_v2  ;;  %v190_v5 = vmul.f32 0.5, %v188_v3 }
 0x186   :  { %4826 = vtanh.f32 %v189_v4 }
 0x187   :  { %4828 = vtanh.f32 %v190_v5 }
 0x190   :  { %v4827_v6 = vpop.eup %4826 }
 0x191   :  { %v4829_v7 = vpop.eup %4828  ;;  %v193_v8 = vadd.f32 1.0, %v4827_v6 }
 0x192   :  { %v194_v9 = vadd.f32 1.0, %v4829_v7 }
 0x193   :  { %v195_v10 = vmul.f32 0.5, %v193_v8 }
 0x194   :  { %v196_v11 = vmul.f32 0.5, %v194_v9 }
 0x195   :  { %v5085_v12 = vmul.f32 %v195_v10, %v187_v2 }
 0x196   :  { %v5087_v13 = vmul.f32 %v196_v11, %v188_v3 }
 0x197   :  { %4348 = vmatprep.mubr.msk.f32.mxu1 %vm28_vm1, %v5085_v12 }
 0x198   :  { %4349 = vmatmul.mubr.msk.f32.vlgmr.msra.gmra.mrb[0].mxu1 %vm28_vm1, %v5087_v13 }
 0x26b   :  { %v4350_v14 = vpop.f32.mrb[0].mxu1 }
 0x26c   :  { %v279_v15 = vpop.f32.mrb[1].mxu1  ;;  %v528_v16 = vrot.slane %v4350_v14, %v5076_v37  ;;  %v504_v18 = vrot.slane %v4350_v14, %v5081_v40  ;;  %v576_v19 = vrot.slane %v4350_v14, %v5068_v34  ;;  %v552_v20 = vrot.slane %v4350_v14, %v5073_v36 }
 0x26d   :  { %v624_v23 = vrot.slane %v4350_v14, %v5098_v21  ;;  %v600_v24 = vrot.slane %v4350_v14, %v5101_v22  ;;  %v5112_v27 = vrot.slane %v4350_v14, %v5106_v25  ;;  %v5115_v28 = vrot.slane %v4350_v14, %v5109_v26 }
 0x26e   :  { %540 = vbcast.lane.b32.xlu0 %v528_v16, 328  ;;  %516 = vbcast.lane.b32.xlu1 %v504_v18, 328  ;;  %v336_v29 = vrot.slane %v279_v15, %v5076_v37  ;;  %v319_v30 = vrot.slane %v279_v15, %v5081_v40  ;;  %v384_v31 = vrot.slane %v279_v15, %v5068_v34 }
 0x26f   :  { %v360_v35 = vrot.slane %v279_v15, %v5073_v36  ;;  %v432_v38 = vrot.slane %v279_v15, %v5098_v21  ;;  %v408_v39 = vrot.slane %v279_v15, %v5101_v22  ;;  %v480_v41 = vrot.slane %v279_v15, %v5106_v25 }
 0x270   :  { %v456_v42 = vrot.slane %v279_v15, %v5109_v26  ;;  %v293_v44 = vadd.f32 %v4140_v43, %v279_v15  ;;  %v5127_v47 = vadd.f32 %v4350_v14, %v4140_v43 }
 0x272   :  { %588 = vbcast.lane.b32.xlu0 %v576_v19, 328  ;;  %564 = vbcast.lane.b32.xlu1 %v552_v20, 328  ;;  %v297_v45 = vand.u32 2147483647, %v293_v44  ;;  %v298_v49 = vand.u32 2147483647, %v5127_v47 }
 0x273   :  { %v295_v6 = vmax.f32 %v293_v44, 0.0 }
 0x274   :  { %v299_v46 = vsub.f32 0.0, %v297_v45  ;;  %v300_v50 = vsub.f32 0.0, %v298_v49 }
 0x276   :  { %636 = vbcast.lane.b32.xlu0 %v624_v23, 328  ;;  %612 = vbcast.lane.b32.xlu1 %v600_v24, 328  ;;  %v301_v48 = vmul.f32 1.442695, %v299_v46  ;;  %v303_v51 = vmul.f32 1.442695, %v300_v50 }
 0x278   :  { %4830 = vpow2.f32 %v301_v48 }
 0x279   :  { %4832 = vpow2.f32 %v303_v51 }
 0x27a   :  { %684 = vbcast.lane.b32.xlu0 %v5112_v27, 328  ;;  %660 = vbcast.lane.b32.xlu1 %v5115_v28, 328 }
 0x27e   :  { %348 = vbcast.lane.b32.xlu0 %v336_v29, 328  ;;  %331 = vbcast.lane.b32.xlu1 %v319_v30, 328 }
 0x282   :  { %396 = vbcast.lane.b32.xlu0 %v384_v31, 328  ;;  %372 = vbcast.lane.b32.xlu1 %v360_v35, 328  ;;  %v4831_v52 = vpop.eup %4830 }
 0x283   :  { %v305_v53 = vadd.f32 1.0, %v4831_v52  ;;  %v4833_v58 = vpop.eup %4832 }
 0x284   :  { %v306_v63 = vadd.f32 1.0, %v4833_v58 }
 0x285   :  { %4834 = vlog2.f32 %v305_v53 }
 0x286   :  { %444 = vbcast.lane.b32.xlu0 %v432_v38, 328  ;;  %420 = vbcast.lane.b32.xlu1 %v408_v39, 328  ;;  %4836 = vtanh.f32 %v976_v61 }
 0x287   :  { %4838 = vtanh.f32 %v975_v62 }
 0x288   :  { %4840 = vlog2.f32 %v306_v63 }
 0x28a   :  { %492 = vbcast.lane.b32.xlu0 %v480_v41, 328  ;;  %468 = vbcast.lane.b32.xlu1 %v456_v42, 328 }
 0x28e   :  { %531 = vbcast.lane.b32.xlu0 %v528_v16, 320  ;;  %507 = vbcast.lane.b32.xlu1 %v504_v18, 320 }
 0x28f   :  { %v4835_v2 = vpop.eup %4834 }
 0x290   :  { %v308_v5 = vmul.f32 0.6931472, %v4835_v2  ;;  %v4837_v10 = vpop.eup %4836 }
 0x291   :  { %v4839_v11 = vpop.eup %4838 }
 0x292   :  { %579 = vbcast.lane.b32.xlu0 %v576_v19, 320  ;;  %555 = vbcast.lane.b32.xlu1 %v552_v20, 320  ;;  %v311_v9 = vadd.f32 %v308_v5, %v295_v6  ;;  %v4841_v16 = vpop.eup %4840  ;;  %v5133_v19 = vld [vmem:[#allocation4 + $0xa0] sm:$0xff] }
 0x294   :  { %v377_v18 = vrot.slane %v311_v9, %v5068_v34  ;;  %v353_v20 = vrot.slane %v311_v9, %v5073_v36  ;;  %v449_v53 = vrot.slane %v311_v9, %v5109_v26  ;;  %v5171_v61 = vmul.f32 %v311_v9, %v5085_v12 }
 0x296   :  { %627 = vbcast.lane.b32.xlu0 %v624_v23, 320  ;;  %603 = vbcast.lane.b32.xlu1 %v600_v24, 320  ;;  %v980_v23 = vadd.f32 1.0, %v4837_v10  ;;  %v979_v24 = vadd.f32 1.0, %v4839_v11  ;;  %v344_v6 = vrot.slane %v5171_v61, %v5076_v37 }
 0x298   :  { %v982_v43 = vmul.f32 0.5, %v980_v23  ;;  %v981_v44 = vmul.f32 0.5, %v979_v24 }
 0x29a   :  { %339 = vbcast.lane.b32.xlu0 %v336_v29, 320  ;;  %322 = vbcast.lane.b32.xlu1 %v319_v30, 320  ;;  %v310_v29 = vmul.f32 0.6931472, %v4841_v16 }
 0x29e   :  { %387 = vbcast.lane.b32.xlu0 %v384_v31, 320  ;;  %363 = vbcast.lane.b32.xlu1 %v360_v35, 320  ;;  %v378_v35 = vmul.f32 %v377_v18, %v5133_v19 }
 0x2a0   :  { %v379_v49 = vmul.f32 1.442695, %v378_v35 }
 0x2a2   :  { %435 = vbcast.lane.b32.xlu0 %v432_v38, 320  ;;  %411 = vbcast.lane.b32.xlu1 %v408_v39, 320  ;;  %v425_v38 = vrot.slane %v311_v9, %v5098_v21  ;;  %v296_v39 = vmax.f32 %v5127_v47, 0.0  ;;  %v473_v47 = vrot.slane %v311_v9, %v5106_v25  ;;  %4842 = vpow2.f32 %v379_v49 }
 0x2a4   :  { %v5141_v45 = vadd.f32 %v310_v29, %v296_v39  ;;  %v426_v50 = vmul.f32 %v425_v38, %v5133_v19  ;;  %v474_v58 = vmul.f32 %v473_v47, %v5133_v19  ;;  %v392_v29 = vrot.slane %v5171_v61, %v5068_v34 }
 0x2a6   :  { %483 = vbcast.lane.b32.xlu0 %v480_v41, 320  ;;  %459 = vbcast.lane.b32.xlu1 %v456_v42, 320  ;;  %v354_v41 = vmul.f32 %v353_v20, %v5133_v19  ;;  %v401_v42 = vrot.slane %v311_v9, %v5101_v22  ;;  %v475_v2 = vmul.f32 1.442695, %v474_v58  ;;  %v545_v5 = vrot.slane %v5141_v45, %v5073_v36 }
 0x2a7   :  { %v593_v23 = vrot.slane %v5141_v45, %v5101_v22 }
 0x2a8   :  { %v355_v51 = vmul.f32 1.442695, %v354_v41  ;;  %v402_v52 = vmul.f32 %v401_v42, %v5133_v19  ;;  %v546_v20 = vmul.f32 %v545_v5, %v5133_v19  ;;  %v665_v42 = vrot.slane %v5141_v45, %v5106_v25 }
 0x2aa   :  { %4844 = vpow2.f32 %v355_v51  ;;  %v547_v47 = vmul.f32 1.442695, %v546_v20  ;;  %v594_v51 = vmul.f32 %v593_v23, %v5133_v19 }
 0x2ac   :  { %v4843_v24 = vpop.eup %4842  ;;  %v595_v5 = vmul.f32 1.442695, %v594_v51 }
 0x2e0   :  { %v541_v54 = vpop.permute.xlu0 %540  ;;  %v517_v55 = vpop.permute.xlu1 %516 }
 0x2e1   :  { %835 = vperm.xlu0 %4824, %v541_v54   ;;  %830 = vperm.xlu1 %4825, %v517_v55   ;;  %v984_v54 = vmul.f32 %v5061_v32, %v982_v43  ;;  %v983_v55 = vmul.f32 %v981_v44, %v5065_v33  ;;  %v2114_v32 = vld [vmem:[%s5813_s1] sm:$0xff]  ;;  %v403_v33 = vmul.f32 1.442695, %v402_v52  ;;  %v641_v52 = vrot.slane %v5141_v45, %v5109_v26 }
 0x2e4   :  { %v589_v56 = vpop.permute.xlu0 %588  ;;  %v565_v57 = vpop.permute.xlu1 %564 }
 0x2e5   :  { %870 = vperm.xlu0 %4824, %v589_v56   ;;  %865 = vperm.xlu1 %4825, %v565_v57  }
 0x2e8   :  { %v637_v59 = vpop.permute.xlu0 %636  ;;  %v613_v60 = vpop.permute.xlu1 %612 }
 0x2e9   :  { %905 = vperm.xlu0 %4824, %v637_v59   ;;  %900 = vperm.xlu1 %4825, %v613_v60   ;;  %v450_v59 = vmul.f32 %v449_v53, %v5133_v19  ;;  %v497_v60 = vrot.slane %v5141_v45, %v5081_v40 }
 0x2ec   :  { %v685_v0 = vpop.permute.xlu0 %684  ;;  %v661_v1 = vpop.permute.xlu1 %660 }
 0x2ed   :  { %940 = vperm.xlu0 %4824, %v685_v0   ;;  %935 = vperm.xlu1 %4825, %v661_v1   ;;  %v569_v1 = vrot.slane %v5141_v45, %v5068_v34 }
 0x2ef   :  { %v570_v11 = vmul.f32 %v569_v1, %v5133_v19 }
 0x2f0   :  { %v349_v3 = vpop.permute.xlu0 %348  ;;  %v332_v4 = vpop.permute.xlu1 %331 }
 0x2f1   :  { %693 = vperm.xlu0 %4824, %v349_v3   ;;  %688 = vperm.xlu1 %4825, %v332_v4   ;;  %v451_v3 = vmul.f32 1.442695, %v450_v59  ;;  %v498_v4 = vmul.f32 %v497_v60, %v5133_v19  ;;  %v571_v39 = vmul.f32 1.442695, %v570_v11  ;;  %v666_v60 = vmul.f32 %v665_v42, %v5133_v19 }
 0x2f2   :  { %v464_v11 = vrot.slane %v5171_v61, %v5109_v26 }
 0x2f3   :  { %v499_v18 = vmul.f32 1.442695, %v498_v4  ;;  %v5222_v4 = vmul.f32 %v5141_v45, %v5087_v13 }
 0x2f4   :  { %v397_v7 = vpop.permute.xlu0 %396  ;;  %v373_v8 = vpop.permute.xlu1 %372 }
 0x2f5   :  { %730 = vperm.xlu0 %4824, %v397_v7   ;;  %725 = vperm.xlu1 %4825, %v373_v8   ;;  %v327_v7 = vrot.slane %v5171_v61, %v5081_v40 }
 0x2f8   :  { %v445_v14 = vpop.permute.xlu0 %444  ;;  %v421_v15 = vpop.permute.xlu1 %420 }
 0x2f9   :  { %765 = vperm.xlu0 %4824, %v445_v14   ;;  %760 = vperm.xlu1 %4825, %v421_v15   ;;  %v617_v14 = vrot.slane %v5141_v45, %v5098_v21 }
 0x2fb   :  { %v618_v41 = vmul.f32 %v617_v14, %v5133_v19 }
 0x2fc   :  { %v493_v30 = vpop.permute.xlu0 %492  ;;  %v469_v31 = vpop.permute.xlu1 %468 }
 0x2fd   :  { %800 = vperm.xlu0 %4824, %v493_v30   ;;  %795 = vperm.xlu1 %4825, %v469_v31   ;;  %v368_v30 = vrot.slane %v5171_v61, %v5073_v36  ;;  %v4845_v31 = vpop.eup %4844  ;;  %v619_v59 = vmul.f32 1.442695, %v618_v41 }
 0x300   :  { %v5143_v46 = vpop.permute.xlu0 %531  ;;  %v5145_v48 = vpop.permute.xlu1 %507 }
 0x301   :  { %675 = vbcast.lane.b32.xlu0 %v5112_v27, 320  ;;  %651 = vbcast.lane.b32.xlu1 %v5115_v28, 320  ;;  %v521_v27 = vrot.slane %v5141_v45, %v5076_v37  ;;  %v427_v28 = vmul.f32 1.442695, %v426_v50  ;;  %v667_v45 = vmul.f32 1.442695, %v666_v60 }
 0x303   :  { %v522_v0 = vmul.f32 %v521_v27, %v5133_v19  ;;  %4846 = vpow2.f32 %v427_v28  ;;  %v440_v27 = vrot.slane %v5171_v61, %v5098_v21  ;;  %v416_v28 = vrot.slane %v5171_v61, %v5101_v22 }
 0x304   :  { %v5155_v56 = vpop.permute.xlu0 %579  ;;  %v5157_v57 = vpop.permute.xlu1 %555  ;;  %4848 = vpow2.f32 %v403_v33 }
 0x305   :  { %989 = vrot.lane.b32.xlu0 %v984_v54, %s5014_s0  ;;  %987 = vrot.lane.b32.xlu1 %v983_v55, %s5014_s0  ;;  %v523_v10 = vmul.f32 1.442695, %v522_v0  ;;  %4850 = vpow2.f32 %v475_v2 }
 0x306   :  { %4852 = vpow2.f32 %v451_v3 }
 0x307   :  { %4854 = vpow2.f32 %v523_v10  ;;  %v488_v10 = vrot.slane %v5171_v61, %v5106_v25  ;;  %v512_v61 = vrot.slane %v5222_v4, %v5081_v40 }
 0x308   :  { %v5173_v62 = vpop.permute.xlu0 %627  ;;  %v5175_v63 = vpop.permute.xlu1 %603  ;;  %4856 = vpow2.f32 %v499_v18 }
 0x309   :  { %2117 = vperm.xlu1 %4825, %v2114_v32   ;;  %4858 = vpow2.f32 %v571_v39 }
 0x30a   :  { %4860 = vpow2.f32 %v547_v47  ;;  %v996_v47 = vld [vmem:[#allocation4 + $0x68] sm:$0xff] }
 0x30b   :  { %4862 = vpow2.f32 %v619_v59  ;;  %v999_v59 = vld [vmem:[#allocation4 + $0x80] sm:$0xff] }
 0x30c   :  { %v340_v8 = vpop.permute.xlu0 %339  ;;  %v323_v9 = vpop.permute.xlu1 %322  ;;  %4864 = vpow2.f32 %v595_v5 }
 0x30d   :  { %v5190_v15 = vmul.f32 %v344_v6, %v340_v8  ;;  %v5192_v16 = vmul.f32 %v327_v7, %v323_v9  ;;  %v4847_v53 = vpop.eup %4846  ;;  %v642_v6 = vmul.f32 %v641_v52, %v5133_v19  ;;  %4866 = vpow2.f32 %v667_v45 }
 0x30e   :  { %v4849_v58 = vpop.eup %4848  ;;  %v584_v52 = vrot.slane %v5222_v4, %v5068_v34 }
 0x30f   :  { %v720_v43 = vmul.f32 %v4843_v24, %v5190_v15  ;;  %v719_v44 = vmul.f32 %v4845_v31, %v5192_v16  ;;  %v4851_v7 = vpop.eup %4850  ;;  %v643_v31 = vmul.f32 1.442695, %v642_v6 }
 0x310   :  { %v388_v35 = vpop.permute.xlu0 %387  ;;  %v364_v38 = vpop.permute.xlu1 %363 }
 0x311   :  { %v393_v49 = vmul.f32 %v392_v29, %v388_v35  ;;  %v369_v50 = vmul.f32 %v368_v30, %v364_v38  ;;  %v4853_v14 = vpop.eup %4852  ;;  %v536_v35 = vrot.slane %v5222_v4, %v5076_v37  ;;  %4868 = vpow2.f32 %v643_v31 }
 0x312   :  { %v4855_v30 = vpop.eup %4854 }
 0x313   :  { %v5209_v54 = vadd.f32 %v720_v43, %v393_v49  ;;  %v5211_v55 = vadd.f32 %v719_v44, %v369_v50  ;;  %v4857_v41 = vpop.eup %4856  ;;  %v537_v42 = vmul.f32 %v536_v35, %v5143_v46  ;;  %v513_v43 = vmul.f32 %v512_v61, %v5145_v48  ;;  %v995_v50 = vld [vmem:[#allocation4 + $0x60] sm:$0xff] }
 0x314   :  { %v436_v32 = vpop.permute.xlu0 %435  ;;  %v412_v33 = vpop.permute.xlu1 %411  ;;  %v585_v48 = vmul.f32 %v584_v52, %v5155_v56 }
 0x315   :  { %v441_v0 = vmul.f32 %v440_v27, %v436_v32  ;;  %v755_v1 = vmul.f32 %v4847_v53, %v5209_v54  ;;  %v417_v2 = vmul.f32 %v416_v28, %v412_v33  ;;  %v754_v3 = vmul.f32 %v4849_v58, %v5211_v55  ;;  %v4859_v51 = vpop.eup %4858  ;;  %v997_v32 = vld [vmem:[#allocation4 + $0x70] sm:$0xff]  ;;  %v998_v33 = vld [vmem:[#allocation4 + $0x78] sm:$0xff] }
 0x316   :  { %v4639_v53 = vpack.c.bf16 %v996_v47, %v995_v50  ;;  %v560_v27 = vrot.slane %v5222_v4, %v5073_v36  ;;  %v4861_v46 = vpop.eup %4860 }
 0x317   :  { %v5225_v8 = vadd.f32 %v755_v1, %v441_v0  ;;  %v5227_v9 = vadd.f32 %v754_v3, %v417_v2  ;;  %v4643_v2 = vpack.c.bf16 %v998_v33, %v997_v32  ;;  %v1000_v3 = vld [vmem:[#allocation4 + $0x88] sm:$0xff]  ;;  %v4863_v5 = vpop.eup %4862 }
 0x318   :  { %v484_v18 = vpop.permute.xlu0 %483  ;;  %v460_v20 = vpop.permute.xlu1 %459  ;;  %4640 = vmatprep.subr.bf16.mxu0 %v4639_v53  ;;  %v561_v60 = vmul.f32 %v560_v27, %v5157_v57  ;;  %v4647_v6 = vpack.c.bf16 %v1000_v3, %v999_v59 }
 0x319   :  { %v489_v23 = vmul.f32 %v488_v10, %v484_v18  ;;  %v790_v24 = vmul.f32 %v4851_v7, %v5225_v8  ;;  %v465_v19 = vmul.f32 %v464_v11, %v460_v20  ;;  %v789_v29 = vmul.f32 %v4853_v14, %v5227_v9  ;;  %4642 = vmatpush3.bf16.msra.mxu0 %v4639_v53  ;;  %v1001_v14 = vld [vmem:[#allocation4 + $0x90] sm:$0xff]  ;;  %v1002_v18 = vld [vmem:[#allocation4 + $0x98] sm:$0xff]  ;;  %v4865_v20 = vpop.eup %4864 }
 0x31a   :  { %v632_v7 = vrot.slane %v5222_v4, %v5098_v21  ;;  %v608_v10 = vrot.slane %v5222_v4, %v5101_v22  ;;  %4644 = vmatprep.subr.bf16.mxu0 %v4643_v2 }
 0x31b   :  { %v5239_v38 = vadd.f32 %v790_v24, %v489_v23  ;;  %v5241_v39 = vadd.f32 %v789_v29, %v465_v19  ;;  %v4867_v19 = vpop.eup %4866  ;;  %v4651_v29 = vpack.c.bf16 %v1002_v18, %v1001_v14 }
 0x31c   :  { %v633_v57 = vmul.f32 %v632_v7, %v5173_v62  ;;  %v609_v45 = vmul.f32 %v608_v10, %v5175_v63  ;;  %v4869_v35 = vpop.eup %4868 }
 0x31d   :  { %v825_v44 = vmul.f32 %v4855_v30, %v5239_v38  ;;  %v824_v49 = vmul.f32 %v4857_v41, %v5241_v39  ;;  %4646 = vmatpush3.bf16.msra.mxu0 %v4643_v2 }
 0x31e   :  { %4648 = vmatprep.subr.bf16.mxu0 %v4647_v6 }
 0x31f   :  { %v827_v28 = vadd.f32 %v825_v44, %v537_v42  ;;  %v826_v58 = vadd.f32 %v824_v49, %v513_v43 }
 0x321   :  { %v860_v0 = vmul.f32 %v4859_v51, %v827_v28  ;;  %v859_v1 = vmul.f32 %v4861_v46, %v826_v58  ;;  %4650 = vmatpush3.bf16.msra.mxu0 %v4647_v6 }
 0x322   :  { %4652 = vmatprep.subr.bf16.mxu0 %v4651_v29 }
 0x323   :  { %v862_v56 = vadd.f32 %v860_v0, %v585_v48  ;;  %v861_v11 = vadd.f32 %v859_v1, %v561_v60 }
 0x325   :  { %v895_v23 = vmul.f32 %v4863_v5, %v862_v56  ;;  %v894_v24 = vmul.f32 %v4865_v20, %v861_v11  ;;  %4654 = vmatpush3.bf16.msra.mxu0 %v4651_v29 }
 0x327   :  { %v897_v30 = vadd.f32 %v895_v23, %v633_v57  ;;  %v896_v31 = vadd.f32 %v894_v24, %v609_v45 }
 0x329   :  { %v5259_v61 = vmul.f32 %v4867_v19, %v897_v30  ;;  %v5261_v41 = vmul.f32 %v4869_v35, %v896_v31 }
 0x360   :  { %v836_v42 = vpop.permute.xlu0 %835  ;;  %v831_v62 = vpop.permute.xlu1 %830 }
 0x361   :  { %v839_v43 = vmul.f32 %v836_v42, %v827_v28  ;;  %v838_v63 = vmul.f32 %v831_v62, %v826_v58 }
 0x363   :  { %v847_v44 = vsel %vm28_vm1, %v839_v43, 0.0  ;;  %v840_v49 = vsel %vm28_vm1, %v838_v63, 0.0 }
 0x364   :  { %v848_v50 = vrot.slane %v847_v44, 4  ;;  %v841_v47 = vrot.slane %v840_v49, 4  ;;  %v871_v51 = vpop.permute.xlu0 %870  ;;  %v866_v52 = vpop.permute.xlu1 %865 }
 0x365   :  { %v874_v53 = vmul.f32 %v871_v51, %v862_v56  ;;  %v873_v27 = vmul.f32 %v866_v52, %v861_v11 }
 0x366   :  { %v849_v46 = vadd.f32 %v848_v50, %v847_v44  ;;  %v842_v48 = vadd.f32 %v841_v47, %v840_v49 }
 0x367   :  { %v882_v32 = vsel %vm28_vm1, %v874_v53, 0.0  ;;  %v875_v33 = vsel %vm28_vm1, %v873_v27, 0.0 }
 0x368   :  { %v850_v59 = vrot.slane %v849_v46, 2  ;;  %v843_v60 = vrot.slane %v842_v48, 2  ;;  %v883_v28 = vrot.slane %v882_v32, 4  ;;  %v876_v58 = vrot.slane %v875_v33, 4  ;;  %v906_v0 = vpop.permute.xlu0 %905  ;;  %v901_v1 = vpop.permute.xlu1 %900 }
 0x369   :  { %v909_v2 = vmul.f32 %v906_v0, %v897_v30  ;;  %v908_v3 = vmul.f32 %v901_v1, %v896_v31 }
 0x36a   :  { %v851_v5 = vadd.f32 %v850_v59, %v849_v46  ;;  %v844_v6 = vadd.f32 %v843_v60, %v842_v48  ;;  %v884_v7 = vadd.f32 %v883_v28, %v882_v32  ;;  %v877_v10 = vadd.f32 %v876_v58, %v875_v33 }
 0x36b   :  { %v917_v56 = vsel %vm28_vm1, %v909_v2, 0.0  ;;  %v910_v11 = vsel %vm28_vm1, %v908_v3, 0.0 }
 0x36c   :  { %v852_v14 = vrot.slane %v851_v5, 1  ;;  %v845_v18 = vrot.slane %v844_v6, 1  ;;  %v885_v20 = vrot.slane %v884_v7, 2  ;;  %v878_v57 = vrot.slane %v877_v10, 2  ;;  %v5269_v45 = vpop.permute.xlu0 %940  ;;  %v5271_v23 = vpop.permute.xlu1 %935 }
 0x36d   :  { %v918_v24 = vrot.slane %v917_v56, 4  ;;  %v911_v19 = vrot.slane %v910_v11, 4 }
 0x36e   :  { %v853_v29 = vadd.f32 %v852_v14, %v851_v5  ;;  %v846_v30 = vadd.f32 %v845_v18, %v844_v6  ;;  %v886_v31 = vadd.f32 %v885_v20, %v884_v7  ;;  %v879_v35 = vadd.f32 %v878_v57, %v877_v10 }
 0x36f   :  { %v919_v42 = vadd.f32 %v918_v24, %v917_v56  ;;  %v912_v62 = vadd.f32 %v911_v19, %v910_v11 }
 0x370   :  { %v856_v43 = vsel %vm714_vm2, %v853_v29, %v846_v30  ;;  %v887_v63 = vrot.slane %v886_v31, 1  ;;  %v880_v44 = vrot.slane %v879_v35, 1  ;;  %v694_v49 = vpop.permute.xlu0 %693  ;;  %v689_v50 = vpop.permute.xlu1 %688 }
 0x371   :  { %858 = vst.msk [vmem:[#allocation3 + $0x8] sm:$0x3] %vm717_vm3, %v856_v43  ;;  %v920_v47 = vrot.slane %v919_v42, 2  ;;  %v913_v51 = vrot.slane %v912_v62, 2  ;;  %v697_v52 = vmul.f32 %v694_v49, %v5190_v15  ;;  %v696_v53 = vmul.f32 %v689_v50, %v5192_v16 }
 0x372   :  { %v888_v27 = vadd.f32 %v887_v63, %v886_v31  ;;  %v881_v46 = vadd.f32 %v880_v44, %v879_v35  ;;  %v680_v63 = vrot.slane %v5222_v4, %v5106_v25  ;;  %v656_v44 = vrot.slane %v5222_v4, %v5109_v26 }
 0x373   :  { %v921_v48 = vadd.f32 %v920_v47, %v919_v42  ;;  %v914_v32 = vadd.f32 %v913_v51, %v912_v62  ;;  %v705_v33 = vsel %vm28_vm1, %v697_v52, 0.0  ;;  %v698_v59 = vsel %vm28_vm1, %v696_v53, 0.0 }
 0x374   :  { %v891_v60 = vsel %vm714_vm2, %v888_v27, %v881_v46  ;;  %v706_v28 = vrot.slane %v705_v33, 4  ;;  %v699_v58 = vrot.slane %v698_v59, 4  ;;  %v731_v0 = vpop.permute.xlu0 %730  ;;  %v726_v1 = vpop.permute.xlu1 %725 }
 0x375   :  { %893 = vst.msk [vmem:[#allocation3 + $0xa] sm:$0x3] %vm717_vm3, %v891_v60  ;;  %v922_v2 = vrot.slane %v921_v48, 1  ;;  %v915_v15 = vrot.slane %v914_v32, 1  ;;  %v734_v16 = vmul.f32 %v731_v0, %v5209_v54  ;;  %v733_v3 = vmul.f32 %v726_v1, %v5211_v55 }
 0x376   :  { %v707_v5 = vadd.f32 %v706_v28, %v705_v33  ;;  %v700_v6 = vadd.f32 %v699_v58, %v698_v59 }
 0x377   :  { %v923_v7 = vadd.f32 %v922_v2, %v921_v48  ;;  %v916_v10 = vadd.f32 %v915_v15, %v914_v32  ;;  %v742_v56 = vsel %vm28_vm1, %v734_v16, 0.0  ;;  %v735_v11 = vsel %vm28_vm1, %v733_v3, 0.0 }
 0x378   :  { %v708_v14 = vrot.slane %v707_v5, 2  ;;  %v701_v18 = vrot.slane %v700_v6, 2  ;;  %v743_v20 = vrot.slane %v742_v56, 4  ;;  %v736_v57 = vrot.slane %v735_v11, 4  ;;  %v766_v24 = vpop.permute.xlu0 %765  ;;  %v761_v19 = vpop.permute.xlu1 %760 }
 0x379   :  { %v926_v29 = vsel %vm714_vm2, %v923_v7, %v916_v10  ;;  %v769_v54 = vmul.f32 %v766_v24, %v5225_v8  ;;  %v768_v55 = vmul.f32 %v761_v19, %v5227_v9 }
 0x37a   :  { %928 = vst.msk [vmem:[#allocation3 + $0xc] sm:$0x3] %vm717_vm3, %v926_v29  ;;  %v709_v30 = vadd.f32 %v708_v14, %v707_v5  ;;  %v702_v31 = vadd.f32 %v701_v18, %v700_v6  ;;  %v744_v35 = vadd.f32 %v743_v20, %v742_v56  ;;  %v737_v42 = vadd.f32 %v736_v57, %v735_v11 }
 0x37b   :  { %v777_v62 = vsel %vm28_vm1, %v769_v54, 0.0  ;;  %v770_v43 = vsel %vm28_vm1, %v768_v55, 0.0 }
 0x37c   :  { %v710_v49 = vrot.slane %v709_v30, 1  ;;  %v703_v8 = vrot.slane %v702_v31, 1  ;;  %v745_v50 = vrot.slane %v744_v35, 2  ;;  %v738_v9 = vrot.slane %v737_v42, 2  ;;  %v801_v47 = vpop.permute.xlu0 %800  ;;  %v796_v51 = vpop.permute.xlu1 %795 }
 0x37d   :  { %v778_v52 = vrot.slane %v777_v62, 4  ;;  %v771_v53 = vrot.slane %v770_v43, 4  ;;  %v804_v27 = vmul.f32 %v801_v47, %v5239_v38  ;;  %v803_v46 = vmul.f32 %v796_v51, %v5241_v39 }
 0x37e   :  { %v711_v48 = vadd.f32 %v710_v49, %v709_v30  ;;  %v704_v32 = vadd.f32 %v703_v8, %v702_v31  ;;  %v746_v33 = vadd.f32 %v745_v50, %v744_v35  ;;  %v739_v59 = vadd.f32 %v738_v9, %v737_v42 }
 0x37f   :  { %v779_v60 = vadd.f32 %v778_v52, %v777_v62  ;;  %v772_v28 = vadd.f32 %v771_v53, %v770_v43  ;;  %v812_v4 = vsel %vm28_vm1, %v804_v27, 0.0  ;;  %v805_v58 = vsel %vm28_vm1, %v803_v46, 0.0 }
 0x380   :  { %v715_v0 = vsel %vm714_vm2, %v711_v48, %v704_v32  ;;  %v747_v1 = vrot.slane %v746_v33, 1  ;;  %v740_v2 = vrot.slane %v739_v59, 1  ;;  %v813_v15 = vrot.slane %v812_v4, 4  ;;  %v676_v16 = vpop.permute.xlu0 %675  ;;  %v652_v3 = vpop.permute.xlu1 %651 }
 0x381   :  { %718 = vst.msk [vmem:[#allocation3] sm:$0x3] %vm717_vm3, %v715_v0  ;;  %v780_v38 = vrot.slane %v779_v60, 2  ;;  %v773_v39 = vrot.slane %v772_v28, 2  ;;  %v806_v5 = vrot.slane %v805_v58, 4  ;;  %v681_v6 = vmul.f32 %v680_v63, %v676_v16 }
 0x382   :  { %v748_v7 = vadd.f32 %v747_v1, %v746_v33  ;;  %v741_v10 = vadd.f32 %v740_v2, %v739_v59  ;;  %v814_v56 = vadd.f32 %v813_v15, %v812_v4  ;;  %v657_v11 = vmul.f32 %v656_v44, %v652_v3  ;;  %v4141_v59 = vld [vmem:[#allocation4 + $0xae] ss:$0 sm:$0xff] }
 0x383   :  { %v781_v14 = vadd.f32 %v780_v38, %v779_v60  ;;  %v774_v18 = vadd.f32 %v773_v39, %v772_v28  ;;  %v807_v20 = vadd.f32 %v806_v5, %v805_v58  ;;  %v932_v57 = vadd.f32 %v5259_v61, %v681_v6  ;;  %v1086_v6 = vld [vmem:[#allocation4 + $0xb0] sm:$0xff] }
 0x384   :  { %v751_v24 = vsel %vm714_vm2, %v748_v7, %v741_v10  ;;  %v815_v19 = vrot.slane %v814_v56, 2  ;;  %v931_v29 = vadd.f32 %v5261_v41, %v657_v11  ;;  %v971_v4 = vmul.f32 %v4141_v59, %v5085_v12  ;;  %v988_v2 = vpop.permute.xlu1 %987  ;;  %v990_v39 = vpop.permute.xlu0 %989  ;;  %v1087_v12 = vld [vmem:[#allocation4 + $0xb8] sm:$0xff]  ;;  %v1088_v7 = vld [vmem:[#allocation4 + $0xc0] sm:$0xff] }
 0x385   :  { %753 = vst.msk [vmem:[#allocation3 + $0x2] sm:$0x3] %vm717_vm3, %v751_v24  ;;  %v782_v54 = vrot.slane %v781_v14, 1  ;;  %v775_v55 = vrot.slane %v774_v18, 1  ;;  %v808_v30 = vrot.slane %v807_v20, 2  ;;  %v944_v31 = vmul.f32 %v5269_v45, %v932_v57  ;;  %v1229_v57 = vld [vmem:[#allocation4 + $0xd0] sm:$0xff] }
 0x386   :  { %v816_v35 = vadd.f32 %v815_v19, %v814_v56  ;;  %v943_v42 = vmul.f32 %v5271_v23, %v931_v29  ;;  %v972_v16 = vmul.f32 %v4141_v59, %v5087_v13  ;;  %v4655_v10 = vpack.c.bf16 %v1087_v12, %v1086_v6  ;;  %v1089_v56 = vld [vmem:[#allocation4 + $0xc8] sm:$0xff]  ;;  %v1230_v24 = vld [vmem:[#allocation4 + $0xd8] sm:$0xff]  ;;  %v1231_v19 = vld [vmem:[#allocation4 + $0xe0] sm:$0xff] }
 0x387   :  { %v783_v62 = vadd.f32 %v782_v54, %v781_v14  ;;  %v776_v43 = vadd.f32 %v775_v55, %v774_v18  ;;  %v809_v63 = vadd.f32 %v808_v30, %v807_v20  ;;  %v952_v61 = vsel %vm28_vm1, %v944_v31, 0.0  ;;  %v1232_v54 = vld [vmem:[#allocation4 + $0xe8] sm:$0xff]  ;;  %v1233_v30 = vld [vmem:[#allocation4 + $0xf0] sm:$0xff]  ;;  %v1234_v31 = vld [vmem:[#allocation4 + $0xf8] sm:$0xff] }
 0x388   :  { %v817_v44 = vrot.slane %v816_v35, 1  ;;  %v953_v49 = vrot.slane %v952_v61, 4  ;;  %v945_v8 = vsel %vm28_vm1, %v943_v42, 0.0  ;;  %v4659_v11 = vpack.c.bf16 %v1089_v56, %v1088_v7  ;;  %4656 = vmatprep.subr.bf16.mxu1 %v4655_v10  ;;  %v1235_v42 = vld [vmem:[#allocation4 + $0x100] sm:$0xff] }
 0x389   :  { %v786_v41 = vsel %vm714_vm2, %v783_v62, %v776_v43  ;;  %v810_v50 = vrot.slane %v809_v63, 1  ;;  %v946_v9 = vrot.slane %v945_v8, 4  ;;  %4658 = vmatpush3.bf16.msra.mxu1 %v4655_v10  ;;  %v4663_v29 = vpack.c.bf16 %v1230_v24, %v1229_v57  ;;  %v1236_v62 = vld [vmem:[#allocation4 + $0x108] sm:$0xff] }
 0x38a   :  { %788 = vst.msk [vmem:[#allocation3 + $0x4] sm:$0x3] %vm717_vm3, %v786_v41  ;;  %v818_v47 = vadd.f32 %v817_v44, %v816_v35  ;;  %v954_v45 = vadd.f32 %v953_v49, %v952_v61  ;;  %4660 = vmatprep.subr.bf16.mxu1 %v4659_v11  ;;  %v4667_v55 = vpack.c.bf16 %v1232_v54, %v1231_v19  ;;  %v1171_v49 = vld [vmem:[#allocation4 + $0x158] sm:$0xf] }
 0x38b   :  { %v811_v51 = vadd.f32 %v810_v50, %v809_v63  ;;  %v947_v52 = vadd.f32 %v946_v9, %v945_v8  ;;  %4664 = vmatprep.subr.bf16.mxu0 %v4663_v29  ;;  %v4671_v35 = vpack.c.bf16 %v1234_v31, %v1233_v30  ;;  %v4675_v43 = vpack.c.bf16 %v1236_v62, %v1235_v42  ;;  %v2122_v54 = vld [vmem:[#allocation4 + $0x178] sm:$0xff]  ;;  %v2118_v30 = vpop.permute.xlu1 %2117 }
 0x38c   :  { %v955_v23 = vrot.slane %v954_v45, 2  ;;  %v5015_v63 = vmov 0.0|0.0   ;;  %v1180_v8 = vrot.slane %v1171_v49, %v5068_v34  ;;  %v1188_v41 = vrot.slane %v1171_v49, %v5073_v36 }
 0x38d   :  { %v821_v53 = vsel %vm714_vm2, %v818_v47, %v811_v51  ;;  %v948_v27 = vrot.slane %v947_v52, 2  ;;  %4662 = vmatpush3.bf16.msra.mxu1 %v4659_v11  ;;  %v1198_v9 = vrot.slane %v1171_v49, %v5076_v37 }
 0x38e   :  { %823 = vst.msk [vmem:[#allocation3 + $0x6] sm:$0x3] %vm717_vm3, %v821_v53  ;;  %v956_v46 = vadd.f32 %v955_v23, %v954_v45 }
 0x38f   :  { %v949_v48 = vadd.f32 %v948_v27, %v947_v52 }
 0x390   :  { %v957_v32 = vrot.slane %v956_v46, 1 }
 0x391   :  { %v950_v33 = vrot.slane %v949_v48, 1 }
 0x392   :  { %v958_v60 = vadd.f32 %v957_v32, %v956_v46  ;;  %v1208_v32 = vrot.slane %v1171_v49, %v5081_v40 }
 0x393   :  { %v951_v28 = vadd.f32 %v950_v33, %v949_v48 }
 0x395   :  { %v964_v58 = vld [vmem:[#allocation3] sm:$0xff]  ;;  %v961_v0 = vsel %vm714_vm2, %v958_v60, %v951_v28 }
 0x396   :  { %963 = vst.msk [vmem:[#allocation3 + $0xe] sm:$0x3] %vm717_vm3, %v961_v0  ;;  %v973_v1 = vadd.f32 %v971_v4, %v964_v58 }
 0x398   :  { %v993_v15 = vmul.f32 %v988_v2, %v973_v1 }
 0x39a   :  { %4367 = vmatprep.mubr.msk.f32.mxu0 %vm28_vm1, %v993_v15 }
 0x39d   :  { %v965_v3 = vld [vmem:[#allocation3 + $0x8] sm:$0xff] }
 0x39e   :  { %v974_v38 = vadd.f32 %v972_v16, %v965_v3  ;;  %v4146_v16 = vld [vmem:[#allocation4 + $0x15c] ss:$0 sm:$0xff] }
 0x3a0   :  { %v994_v5 = vmul.f32 %v990_v39, %v974_v38 }
 0x3a2   :  { %4368 = vmatmul.mubr.msk.f32.vlgmr.msra.gmra.mrb[2].mxu0 %vm28_vm1, %v994_v5 }
 0x3a3   :  { %4666 = vmatpush3.bf16.msra.mxu0 %v4663_v29  ;;  %v2121_v29 = vld [vmem:[#allocation4 + $0x170] sm:$0xff] }
 0x3a4   :  { %4668 = vmatprep.subr.bf16.mxu0 %v4667_v55 }
 0x3a7   :  { %4670 = vmatpush3.bf16.msra.mxu0 %v4667_v55  ;;  %v4699_v55 = vpack.c.bf16 %v2122_v54, %v2121_v29 }
 0x3a8   :  { %4672 = vmatprep.subr.bf16.mxu0 %v4671_v35 }
 0x3ab   :  { %4674 = vmatpush3.bf16.msra.mxu0 %v4671_v35 }
 0x3ac   :  { %4676 = vmatprep.subr.bf16.mxu0 %v4675_v43 }
 0x3af   :  { %4678 = vmatpush3.bf16.msra.mxu0 %v4675_v43 }
 0x3b0   :  { %4695 = vmatprep.subr.bf16.mxu0 %v5015_v63 }
 0x475   :  { %v4369_v14 = vpop.f32.mrb[2].mxu0 }
 0x476   :  { %v1075_v18 = vpop.f32.mrb[3].mxu0 }
 0x477   :  { %4870 = vtanh.f32 %v1075_v18  ;;  %v2120_v18 = vld [vmem:[#allocation4 + $0x168] sm:$0xff] }
 0x478   :  { %4872 = vtanh.f32 %v4369_v14  ;;  %v2119_v14 = vld [vmem:[#allocation4 + $0x160] sm:$0xff] }
 0x479   :  { %v4696_v24 = vpack.c.bf16 %v2120_v18, %v2119_v14 }
 0x481   :  { %v4871_v13 = vpop.eup %4870 }
 0x482   :  { %v4873_v20 = vpop.eup %4872  ;;  %4378 = vmatprep.mubr.msk.f32.mxu1 %vm59_vm0, %v4871_v13 }
 0x483   :  { %4379 = vmatmul.mubr.msk.f32.vlgmr.msra.gmra.mrb[2].mxu1 %vm59_vm0, %v4873_v20 }
 0x556   :  { %v5322_v61 = vpop.f32.mrb[2].mxu1 }
 0x557   :  { %1174 = vst.msk [vmem:[#allocation2 + $0x10] sm:$0xff] %vm28_vm1, %v5322_v61  ;;  %v5326_v44 = vpop.f32.mrb[3].mxu1 }
 0x558   :  { %1173 = vst.msk [vmem:[#allocation2 + $0x8] sm:$0xff] %vm28_vm1, %v5326_v44 }
 0x55e   :  { %v1176_v50 = vld [vmem:[#allocation2 + $0x10] sm:$0xff] }
 0x55f   :  { %v1175_v47 = vld [vmem:[#allocation2 + $0x8] sm:$0xff]  ;;  %v1182_v45 = vmul.f32 %v1180_v8, %v1176_v50 }
 0x560   :  { %v1183_v51 = vld [vmem:[#allocation2 + $0x6] sm:$0xff]  ;;  %v1184_v52 = vld [vmem:[#allocation2 + $0xe] sm:$0xff]  ;;  %v1181_v23 = vmul.f32 %v1180_v8, %v1175_v47 }
 0x561   :  { %v1189_v53 = vmul.f32 %v1188_v41, %v1183_v51  ;;  %v1190_v27 = vmul.f32 %v1188_v41, %v1184_v52  ;;  %v1193_v46 = vld [vmem:[#allocation2 + $0x4] sm:$0xff]  ;;  %v1194_v48 = vld [vmem:[#allocation2 + $0xc] sm:$0xff] }
 0x562   :  { %v1203_v33 = vld [vmem:[#allocation2 + $0x2] sm:$0xff]  ;;  %v1204_v59 = vld [vmem:[#allocation2 + $0xa] sm:$0xff]  ;;  %v1199_v4 = vmul.f32 %v1198_v9, %v1193_v46  ;;  %v1200_v58 = vmul.f32 %v1198_v9, %v1194_v48 }
 0x563   :  { %v1191_v60 = vadd.f32 %v1189_v53, %v1181_v23  ;;  %v1192_v28 = vadd.f32 %v1190_v27, %v1182_v45  ;;  %v1209_v2 = vmul.f32 %v1208_v32, %v1203_v33  ;;  %v1210_v15 = vmul.f32 %v1208_v32, %v1204_v59  ;;  %v4149_v33 = vld [vmem:[#allocation4 + $0x15d] ss:$0 sm:$0xff] }
 0x565   :  { %v1201_v0 = vadd.f32 %v1199_v4, %v1191_v60  ;;  %v1202_v1 = vadd.f32 %v1200_v58, %v1192_v28 }
 0x567   :  { %v1211_v3 = vadd.f32 %v1209_v2, %v1201_v0  ;;  %v1212_v38 = vadd.f32 %v1210_v15, %v1202_v1 }
 0x569   :  { %v1217_v39 = vadd.f32 %v4146_v16, %v1211_v3  ;;  %v1218_v5 = vadd.f32 %v4146_v16, %v1212_v38 }
 0x56b   :  { %v1219_v6 = vmul.f32 0.5, %v1217_v39  ;;  %v1220_v12 = vmul.f32 0.5, %v1218_v5 }
 0x56d   :  { %4874 = vtanh.f32 %v1219_v6 }
 0x56e   :  { %4876 = vtanh.f32 %v1220_v12 }
 0x577   :  { %v4875_v7 = vpop.eup %4874 }
 0x578   :  { %v4877_v10 = vpop.eup %4876  ;;  %v1223_v56 = vadd.f32 1.0, %v4875_v7 }
 0x579   :  { %v1224_v11 = vadd.f32 1.0, %v4877_v10  ;;  %v2004_v10 = vmul.f32 0.5, %v5322_v61 }
 0x57a   :  { %v1225_v13 = vmul.f32 0.5, %v1223_v56  ;;  %v2003_v56 = vmul.f32 0.5, %v5326_v44 }
 0x57b   :  { %v1226_v20 = vmul.f32 0.5, %v1224_v11 }
 0x57c   :  { %v5334_v57 = vmul.f32 %v1225_v13, %v1217_v39 }
 0x57d   :  { %v5336_v19 = vmul.f32 %v1226_v20, %v1218_v5 }
 0x57e   :  { %4397 = vmatprep.mubr.msk.f32.mxu0 %vm28_vm1, %v5334_v57 }
 0x57f   :  { %4398 = vmatmul.mubr.msk.f32.vlgmr.msra.gmra.mrb[4].mxu0 %vm28_vm1, %v5336_v19 }
 0x580   :  { %4697 = vmatpush3.bf16.msra.mxu0 %v4696_v24  ;;  %4427 = vmatprep.mubr.msk.f32.mxu0 %vm5016_vm4, %v5013_v17 }
 0x581   :  { %4698 = vmatprep.subr.bf16.mxu0 %v5015_v63 }
 0x584   :  { %4700 = vmatpush3.bf16.msra.mxu0 %v4699_v55 }
 0x585   :  { %4713 = vmatprep.subr.bf16.mxu0 %v5015_v63 }
 0x587   :  { %4428 = vmatmul.mubr.msk.f32.vlgmr.msra.gmra.mrb[6].mxu0 %vm59_vm0, %v2118_v30 }
 0x588   :  { %4465 = vmatprep.mubr.msk.f32.mxu0 %vm5016_vm4, %v5013_v17 }
 0x652   :  { %v4399_v31 = vpop.f32.mrb[4].mxu0 }
 0x653   :  { %v1309_v35 = vpop.f32.mrb[5].mxu0  ;;  %v1558_v42 = vrot.slane %v4399_v31, %v5076_v37  ;;  %v1534_v62 = vrot.slane %v4399_v31, %v5081_v40  ;;  %v1606_v43 = vrot.slane %v4399_v31, %v5068_v34  ;;  %v1582_v49 = vrot.slane %v4399_v31, %v5073_v36 }
 0x654   :  { %v1654_v50 = vrot.slane %v4399_v31, %v5098_v21  ;;  %v1630_v9 = vrot.slane %v4399_v31, %v5101_v22  ;;  %v5360_v47 = vrot.slane %v4399_v31, %v5106_v25  ;;  %v5363_v45 = vrot.slane %v4399_v31, %v5109_v26 }
 0x655   :  { %1570 = vbcast.lane.b32.xlu1 %v1558_v42, 328  ;;  %1546 = vbcast.lane.b32.xlu0 %v1534_v62, 328  ;;  %v1366_v51 = vrot.slane %v1309_v35, %v5076_v37  ;;  %v1349_v52 = vrot.slane %v1309_v35, %v5081_v40  ;;  %v1414_v23 = vrot.slane %v1309_v35, %v5068_v34 }
 0x656   :  { %v1390_v53 = vrot.slane %v1309_v35, %v5073_v36  ;;  %v1462_v27 = vrot.slane %v1309_v35, %v5098_v21  ;;  %v1438_v46 = vrot.slane %v1309_v35, %v5101_v22  ;;  %v1510_v48 = vrot.slane %v1309_v35, %v5106_v25 }
 0x657   :  { %v1486_v32 = vrot.slane %v1309_v35, %v5109_v26  ;;  %v1323_v59 = vadd.f32 %v4149_v33, %v1309_v35  ;;  %v5375_v4 = vadd.f32 %v4399_v31, %v4149_v33 }
 0x659   :  { %1618 = vbcast.lane.b32.xlu1 %v1606_v43, 328  ;;  %1594 = vbcast.lane.b32.xlu0 %v1582_v49, 328  ;;  %v1327_v60 = vand.u32 2147483647, %v1323_v59  ;;  %v1328_v0 = vand.u32 2147483647, %v5375_v4 }
 0x65a   :  { %v5353_v8 = vpop.f32.mrb[6].mxu0  ;;  %v1325_v54 = vmax.f32 %v1323_v59, 0.0 }
 0x65b   :  { %2197 = vst.msk [vmem:[#allocation2 + $0x8] sm:$0xff] %vm28_vm1, %v5353_v8  ;;  %v4429_v41 = vpop.f32.mrb[7].mxu0  ;;  %v1329_v28 = vsub.f32 0.0, %v1327_v60  ;;  %v1330_v1 = vsub.f32 0.0, %v1328_v0 }
 0x65d   :  { %1666 = vbcast.lane.b32.xlu1 %v1654_v50, 328  ;;  %1642 = vbcast.lane.b32.xlu0 %v1630_v9, 328  ;;  %v1331_v58 = vmul.f32 1.442695, %v1329_v28  ;;  %v1333_v2 = vmul.f32 1.442695, %v1330_v1 }
 0x65f   :  { %4878 = vpow2.f32 %v1331_v58 }
 0x660   :  { %4880 = vpow2.f32 %v1333_v2 }
 0x661   :  { %1714 = vbcast.lane.b32.xlu1 %v5360_v47, 328  ;;  %1690 = vbcast.lane.b32.xlu0 %v5363_v45, 328 }
 0x665   :  { %1378 = vbcast.lane.b32.xlu1 %v1366_v51, 328  ;;  %1361 = vbcast.lane.b32.xlu0 %v1349_v52, 328 }
 0x669   :  { %1426 = vbcast.lane.b32.xlu1 %v1414_v23, 328  ;;  %1402 = vbcast.lane.b32.xlu0 %v1390_v53, 328  ;;  %v4879_v15 = vpop.eup %4878 }
 0x66a   :  { %v1335_v16 = vadd.f32 1.0, %v4879_v15  ;;  %v4881_v6 = vpop.eup %4880 }
 0x66b   :  { %v1336_v11 = vadd.f32 1.0, %v4881_v6 }
 0x66c   :  { %4882 = vlog2.f32 %v1335_v16 }
 0x66d   :  { %1474 = vbcast.lane.b32.xlu1 %v1462_v27, 328  ;;  %1450 = vbcast.lane.b32.xlu0 %v1438_v46, 328  ;;  %4884 = vtanh.f32 %v2004_v10 }
 0x66e   :  { %4886 = vtanh.f32 %v2003_v56 }
 0x66f   :  { %4888 = vlog2.f32 %v1336_v11 }
 0x671   :  { %1522 = vbcast.lane.b32.xlu1 %v1510_v48, 328  ;;  %1498 = vbcast.lane.b32.xlu0 %v1486_v32, 328 }
 0x675   :  { %1561 = vbcast.lane.b32.xlu1 %v1558_v42, 320  ;;  %1537 = vbcast.lane.b32.xlu0 %v1534_v62, 320 }
 0x676   :  { %v4883_v13 = vpop.eup %4882 }
 0x677   :  { %v1338_v29 = vmul.f32 0.6931472, %v4883_v13  ;;  %v4885_v35 = vpop.eup %4884 }
 0x678   :  { %v4887_v42 = vpop.eup %4886 }
 0x679   :  { %1609 = vbcast.lane.b32.xlu1 %v1606_v43, 320  ;;  %1585 = vbcast.lane.b32.xlu0 %v1582_v49, 320  ;;  %v1341_v31 = vadd.f32 %v1338_v29, %v1325_v54  ;;  %v4889_v49 = vpop.eup %4888 }
 0x67b   :  { %v1407_v41 = vrot.slane %v1341_v31, %v5068_v34  ;;  %v1431_v59 = vrot.slane %v1341_v31, %v5101_v22  ;;  %v5416_v56 = vmul.f32 %v1341_v31, %v5334_v57 }
 0x67d   :  { %1657 = vbcast.lane.b32.xlu1 %v1654_v50, 320  ;;  %1633 = vbcast.lane.b32.xlu0 %v1630_v9, 320  ;;  %v5381_v50 = vld [vmem:[#allocation4 + $0x150] sm:$0xff]  ;;  %v1383_v9 = vrot.slane %v1341_v31, %v5073_v36 }
 0x67f   :  { %v1384_v33 = vmul.f32 %v1383_v9, %v5381_v50 }
 0x681   :  { %1369 = vbcast.lane.b32.xlu1 %v1366_v51, 320  ;;  %1352 = vbcast.lane.b32.xlu0 %v1349_v52, 320  ;;  %v2008_v51 = vadd.f32 1.0, %v4885_v35  ;;  %v2007_v52 = vadd.f32 1.0, %v4887_v42  ;;  %v1385_v16 = vmul.f32 1.442695, %v1384_v33 }
 0x683   :  { %v2010_v60 = vmul.f32 0.5, %v2008_v51  ;;  %v2009_v28 = vmul.f32 0.5, %v2007_v52 }
 0x685   :  { %1417 = vbcast.lane.b32.xlu1 %v1414_v23, 320  ;;  %1393 = vbcast.lane.b32.xlu0 %v1390_v53, 320  ;;  %v1340_v23 = vmul.f32 0.6931472, %v4889_v49 }
 0x689   :  { %1465 = vbcast.lane.b32.xlu1 %v1462_v27, 320  ;;  %1441 = vbcast.lane.b32.xlu0 %v1438_v46, 320  ;;  %v1408_v46 = vmul.f32 %v1407_v41, %v5381_v50 }
 0x68b   :  { %v1409_v2 = vmul.f32 1.442695, %v1408_v46 }
 0x68d   :  { %1513 = vbcast.lane.b32.xlu1 %v1510_v48, 320  ;;  %1489 = vbcast.lane.b32.xlu0 %v1486_v32, 320  ;;  %v1455_v48 = vrot.slane %v1341_v31, %v5098_v21  ;;  %v1326_v32 = vmax.f32 %v5375_v4, 0.0  ;;  %v1503_v4 = vrot.slane %v1341_v31, %v5106_v25  ;;  %4890 = vpow2.f32 %v1409_v2 }
 0x68e   :  { %4892 = vpow2.f32 %v1385_v16 }
 0x68f   :  { %v5389_v58 = vadd.f32 %v1340_v23, %v1326_v32  ;;  %v1456_v15 = vmul.f32 %v1455_v48, %v5381_v50 }
 0x691   :  { %v1599_v13 = vrot.slane %v5389_v58, %v5068_v34  ;;  %v1575_v54 = vrot.slane %v5389_v58, %v5073_v36  ;;  %v1623_v52 = vrot.slane %v5389_v58, %v5101_v22 }
 0x693   :  { %v1576_v51 = vmul.f32 %v1575_v54, %v5381_v50 }
 0x695   :  { %v1577_v16 = vmul.f32 1.442695, %v1576_v51 }
 0x697   :  { %v4891_v23 = vpop.eup %4890 }
 0x698   :  { %v4893_v46 = vpop.eup %4892 }
 0x6c7   :  { %v1571_v3 = vpop.permute.xlu1 %1570  ;;  %v1547_v38 = vpop.permute.xlu0 %1546 }
 0x6c8   :  { %1863 = vperm.xlu1 %4825, %v1571_v3   ;;  %1858 = vperm.xlu0 %4824, %v1547_v38   ;;  %v1432_v3 = vmul.f32 %v1431_v59, %v5381_v50  ;;  %v1479_v38 = vrot.slane %v1341_v31, %v5109_v26 }
 0x6ca   :  { %v1433_v10 = vmul.f32 1.442695, %v1432_v3  ;;  %v1624_v3 = vmul.f32 %v1623_v52, %v5381_v50 }
 0x6cb   :  { %v1619_v39 = vpop.permute.xlu1 %1618  ;;  %v1595_v5 = vpop.permute.xlu0 %1594 }
 0x6cc   :  { %1898 = vperm.xlu1 %4825, %v1619_v39   ;;  %1893 = vperm.xlu0 %4824, %v1595_v5   ;;  %v2012_v39 = vmul.f32 %v5322_v61, %v2010_v60  ;;  %v2011_v5 = vmul.f32 %v2009_v28, %v5326_v44  ;;  %v1480_v61 = vmul.f32 %v1479_v38, %v5381_v50 }
 0x6cd   :  { %v1527_v44 = vrot.slane %v5389_v58, %v5081_v40  ;;  %v1695_v60 = vrot.slane %v5389_v58, %v5106_v25  ;;  %v1671_v38 = vrot.slane %v5389_v58, %v5109_v26 }
 0x6cf   :  { %v1667_v12 = vpop.permute.xlu1 %1666  ;;  %v1643_v7 = vpop.permute.xlu0 %1642  ;;  %v1528_v29 = vmul.f32 %v1527_v44, %v5381_v50 }
 0x6d0   :  { %1933 = vperm.xlu1 %4825, %v1667_v12   ;;  %1928 = vperm.xlu0 %4824, %v1643_v7   ;;  %v1504_v7 = vmul.f32 %v1503_v4, %v5381_v50 }
 0x6d1   :  { %v1529_v9 = vmul.f32 1.442695, %v1528_v29 }
 0x6d3   :  { %v1715_v14 = vpop.permute.xlu1 %1714  ;;  %v1691_v18 = vpop.permute.xlu0 %1690 }
 0x6d4   :  { %1968 = vperm.xlu1 %4825, %v1715_v14   ;;  %1963 = vperm.xlu0 %4824, %v1691_v18  }
 0x6d7   :  { %v1379_v20 = vpop.permute.xlu1 %1378  ;;  %v1362_v24 = vpop.permute.xlu0 %1361 }
 0x6d8   :  { %1723 = vperm.xlu1 %4825, %v1379_v20   ;;  %1718 = vperm.xlu0 %4824, %v1362_v24   ;;  %v1505_v20 = vmul.f32 1.442695, %v1504_v7  ;;  %v1481_v24 = vmul.f32 1.442695, %v1480_v61  ;;  %v1446_v7 = vrot.slane %v5416_v56, %v5101_v22 }
 0x6db   :  { %v1427_v55 = vpop.permute.xlu1 %1426  ;;  %v1403_v30 = vpop.permute.xlu0 %1402 }
 0x6dc   :  { %1758 = vperm.xlu1 %4825, %v1427_v55   ;;  %1753 = vperm.xlu0 %4824, %v1403_v30   ;;  %v1374_v55 = vrot.slane %v5416_v56, %v5076_v37  ;;  %v1357_v30 = vrot.slane %v5416_v56, %v5081_v40 }
 0x6df   :  { %v1475_v62 = vpop.permute.xlu1 %1474  ;;  %v1451_v43 = vpop.permute.xlu0 %1450 }
 0x6e0   :  { %1793 = vperm.xlu1 %4825, %v1475_v62   ;;  %1788 = vperm.xlu0 %4824, %v1451_v43   ;;  %v1600_v62 = vmul.f32 %v1599_v13, %v5381_v50  ;;  %v1647_v43 = vrot.slane %v5389_v58, %v5098_v21  ;;  %v1696_v13 = vmul.f32 %v1695_v60, %v5381_v50 }
 0x6e2   :  { %v1601_v33 = vmul.f32 1.442695, %v1600_v62  ;;  %v1648_v59 = vmul.f32 %v1647_v43, %v5381_v50  ;;  %v1518_v43 = vrot.slane %v5416_v56, %v5106_v25 }
 0x6e3   :  { %v1523_v53 = vpop.permute.xlu1 %1522  ;;  %v1499_v27 = vpop.permute.xlu0 %1498 }
 0x6e4   :  { %1828 = vperm.xlu1 %4825, %v1523_v53   ;;  %1823 = vperm.xlu0 %4824, %v1499_v27   ;;  %v1422_v53 = vrot.slane %v5416_v56, %v5068_v34  ;;  %v1398_v27 = vrot.slane %v5416_v56, %v5073_v36 }
 0x6e7   :  { %v5391_v0 = vpop.permute.xlu1 %1561  ;;  %v5393_v1 = vpop.permute.xlu0 %1537 }
 0x6e8   :  { %1705 = vbcast.lane.b32.xlu1 %v5360_v47, 320  ;;  %1681 = vbcast.lane.b32.xlu0 %v5363_v45, 320  ;;  %v1551_v47 = vrot.slane %v5389_v58, %v5076_v37  ;;  %v1457_v45 = vmul.f32 1.442695, %v1456_v15 }
 0x6ea   :  { %v1552_v18 = vmul.f32 %v1551_v47, %v5381_v50  ;;  %4894 = vpow2.f32 %v1457_v45  ;;  %v1470_v45 = vrot.slane %v5416_v56, %v5098_v21 }
 0x6eb   :  { %v5403_v6 = vpop.permute.xlu1 %1609  ;;  %v5405_v12 = vpop.permute.xlu0 %1585  ;;  %4896 = vpow2.f32 %v1433_v10 }
 0x6ec   :  { %2017 = vrot.lane.b32.xlu1 %v2012_v39, %s5014_s0  ;;  %2015 = vrot.lane.b32.xlu0 %v2011_v5, %s5014_s0  ;;  %v1553_v42 = vmul.f32 1.442695, %v1552_v18  ;;  %4898 = vpow2.f32 %v1505_v20  ;;  %v1649_v18 = vmul.f32 1.442695, %v1648_v59 }
 0x6ed   :  { %4900 = vpow2.f32 %v1481_v24 }
 0x6ee   :  { %4902 = vpow2.f32 %v1553_v42 }
 0x6ef   :  { %v5418_v11 = vpop.permute.xlu1 %1657  ;;  %v5420_v14 = vpop.permute.xlu0 %1633  ;;  %4904 = vpow2.f32 %v1529_v9  ;;  %v1494_v9 = vrot.slane %v5416_v56, %v5109_v26 }
 0x6f0   :  { %4906 = vpow2.f32 %v1601_v33 }
 0x6f1   :  { %4908 = vpow2.f32 %v1577_v16 }
 0x6f2   :  { %4910 = vpow2.f32 %v1649_v18 }
 0x6f3   :  { %v1370_v31 = vpop.permute.xlu1 %1369  ;;  %v1353_v35 = vpop.permute.xlu0 %1352 }
 0x6f4   :  { %v5435_v49 = vmul.f32 %v1374_v55, %v1370_v31  ;;  %v5437_v41 = vmul.f32 %v1357_v30, %v1353_v35  ;;  %v4895_v39 = vpop.eup %4894  ;;  %v5467_v55 = vmul.f32 %v5389_v58, %v5336_v19  ;;  %v1625_v30 = vmul.f32 1.442695, %v1624_v3 }
 0x6f5   :  { %v4897_v10 = vpop.eup %4896  ;;  %v1672_v31 = vmul.f32 %v1671_v38, %v5381_v50  ;;  %v1697_v58 = vmul.f32 1.442695, %v1696_v13  ;;  %v2026_v13 = vld [vmem:[#allocation4 + $0x128] sm:$0xff] }
 0x6f6   :  { %v1748_v28 = vmul.f32 %v4891_v23, %v5435_v49  ;;  %v1747_v2 = vmul.f32 %v4893_v46, %v5437_v41  ;;  %v4899_v35 = vpop.eup %4898  ;;  %4912 = vpow2.f32 %v1625_v30  ;;  %v1542_v56 = vrot.slane %v5467_v55, %v5081_v40 }
 0x6f7   :  { %v1418_v48 = vpop.permute.xlu1 %1417  ;;  %v1394_v32 = vpop.permute.xlu0 %1393  ;;  %v1673_v33 = vmul.f32 1.442695, %v1672_v31  ;;  %4914 = vpow2.f32 %v1697_v58  ;;  %v2028_v31 = vld [vmem:[#allocation4 + $0x138] sm:$0xff] }
 0x6f8   :  { %v1423_v15 = vmul.f32 %v1422_v53, %v1418_v48  ;;  %v1399_v4 = vmul.f32 %v1398_v27, %v1394_v32  ;;  %v4901_v51 = vpop.eup %4900  ;;  %v1566_v32 = vrot.slane %v5467_v55, %v5076_v37  ;;  %v1543_v16 = vmul.f32 %v1542_v56, %v5393_v1  ;;  %v2025_v1 = vld [vmem:[#allocation4 + $0x120] sm:$0xff] }
 0x6f9   :  { %v4903_v48 = vpop.eup %4902  ;;  %4916 = vpow2.f32 %v1673_v33  ;;  %v4683_v30 = vpack.c.bf16 %v2026_v13, %v2025_v1 }
 0x6fa   :  { %v5454_v5 = vadd.f32 %v1748_v28, %v1423_v15  ;;  %v5456_v47 = vadd.f32 %v1747_v2, %v1399_v4  ;;  %v4905_v28 = vpop.eup %4904  ;;  %v1567_v2 = vmul.f32 %v1566_v32, %v5391_v0  ;;  %v2023_v15 = vld [vmem:[#allocation4 + $0x110] sm:$0xff]  ;;  %v2024_v4 = vld [vmem:[#allocation4 + $0x118] sm:$0xff] }
 0x6fb   :  { %v1466_v61 = vpop.permute.xlu1 %1465  ;;  %v1442_v44 = vpop.permute.xlu0 %1441 }
 0x6fc   :  { %v1471_v20 = vmul.f32 %v1470_v45, %v1466_v61  ;;  %v1783_v24 = vmul.f32 %v4895_v39, %v5454_v5  ;;  %v1447_v29 = vmul.f32 %v1446_v7, %v1442_v44  ;;  %v1782_v54 = vmul.f32 %v4897_v10, %v5456_v47  ;;  %v4907_v45 = vpop.eup %4906 }
 0x6fd   :  { %v4679_v39 = vpack.c.bf16 %v2024_v4, %v2023_v15  ;;  %v1614_v7 = vrot.slane %v5467_v55, %v5068_v34  ;;  %v1590_v10 = vrot.slane %v5467_v55, %v5073_v36  ;;  %v4909_v44 = vpop.eup %4908 }
 0x6fe   :  { %v5470_v42 = vadd.f32 %v1783_v24, %v1471_v20  ;;  %v5472_v62 = vadd.f32 %v1782_v54, %v1447_v29  ;;  %v2027_v20 = vld [vmem:[#allocation4 + $0x130] sm:$0xff] }
 0x6ff   :  { %v1514_v52 = vpop.permute.xlu1 %1513  ;;  %v1490_v23 = vpop.permute.xlu0 %1489  ;;  %4680 = vmatprep.subr.bf16.mxu1 %v4679_v39  ;;  %v1615_v18 = vmul.f32 %v1614_v7, %v5403_v6  ;;  %v1591_v24 = vmul.f32 %v1590_v10, %v5405_v12  ;;  %v1638_v6 = vrot.slane %v5467_v55, %v5101_v22 }
 0x700   :  { %v1519_v53 = vmul.f32 %v1518_v43, %v1514_v52  ;;  %v1818_v27 = vmul.f32 %v4899_v35, %v5470_v42  ;;  %v1495_v50 = vmul.f32 %v1494_v9, %v1490_v23  ;;  %v1817_v46 = vmul.f32 %v4901_v51, %v5472_v62  ;;  %4682 = vmatpush3.bf16.msra.mxu1 %v4679_v39  ;;  %v4911_v35 = vpop.eup %4910  ;;  %v2029_v51 = vld [vmem:[#allocation4 + $0x140] sm:$0xff]  ;;  %v2030_v52 = vld [vmem:[#allocation4 + $0x148] sm:$0xff] }
 0x701   :  { %v1662_v43 = vrot.slane %v5467_v55, %v5098_v21  ;;  %v4687_v9 = vpack.c.bf16 %v2028_v31, %v2027_v20  ;;  %4684 = vmatprep.subr.bf16.mxu1 %v4683_v30 }
 0x702   :  { %v5484_v59 = vadd.f32 %v1818_v27, %v1519_v53  ;;  %v5486_v60 = vadd.f32 %v1817_v46, %v1495_v50  ;;  %v4913_v53 = vpop.eup %4912  ;;  %v1639_v27 = vmul.f32 %v1638_v6, %v5420_v14 }
 0x703   :  { %v1663_v12 = vmul.f32 %v1662_v43, %v5418_v11  ;;  %v4915_v32 = vpop.eup %4914 }
 0x704   :  { %v1853_v3 = vmul.f32 %v4903_v48, %v5484_v59  ;;  %v1852_v38 = vmul.f32 %v4905_v28, %v5486_v60  ;;  %4686 = vmatpush3.bf16.msra.mxu1 %v4683_v30  ;;  %v4691_v48 = vpack.c.bf16 %v2030_v52, %v2029_v51  ;;  %v4917_v28 = vpop.eup %4916 }
 0x705   :  { %4688 = vmatprep.subr.bf16.mxu1 %v4687_v9 }
 0x706   :  { %v1855_v61 = vadd.f32 %v1853_v3, %v1567_v2  ;;  %v1854_v0 = vadd.f32 %v1852_v38, %v1543_v16 }
 0x708   :  { %v1888_v29 = vmul.f32 %v4907_v45, %v1855_v61  ;;  %v1887_v54 = vmul.f32 %v4909_v44, %v1854_v0  ;;  %4690 = vmatpush3.bf16.msra.mxu1 %v4687_v9 }
 0x709   :  { %4692 = vmatprep.subr.bf16.mxu1 %v4691_v48 }
 0x70a   :  { %v1890_v23 = vadd.f32 %v1888_v29, %v1615_v18  ;;  %v1889_v58 = vadd.f32 %v1887_v54, %v1591_v24 }
 0x70c   :  { %v1923_v50 = vmul.f32 %v4911_v35, %v1890_v23  ;;  %v1922_v46 = vmul.f32 %v4913_v53, %v1889_v58  ;;  %4694 = vmatpush3.bf16.msra.mxu1 %v4691_v48 }
 0x70d   :  { %4701 = vmatprep.subr.bf16.mxu1 %v5015_v63 }
 0x70e   :  { %v1925_v33 = vadd.f32 %v1923_v50, %v1663_v12  ;;  %v1924_v56 = vadd.f32 %v1922_v46, %v1639_v27 }
 0x710   :  { %v5504_v2 = vmul.f32 %v4915_v32, %v1925_v33  ;;  %v5506_v15 = vmul.f32 %v4917_v28, %v1924_v56 }
 0x747   :  { %v1864_v11 = vpop.permute.xlu1 %1863  ;;  %v1859_v4 = vpop.permute.xlu0 %1858 }
 0x748   :  { %v1867_v14 = vmul.f32 %v1864_v11, %v1855_v61  ;;  %v1866_v16 = vmul.f32 %v1859_v4, %v1854_v0 }
 0x74a   :  { %v1875_v3 = vsel %vm28_vm1, %v1867_v14, 0.0  ;;  %v1868_v38 = vsel %vm28_vm1, %v1866_v16, 0.0 }
 0x74b   :  { %v1876_v39 = vrot.slane %v1875_v3, 4  ;;  %v1869_v45 = vrot.slane %v1868_v38, 4  ;;  %v1899_v7 = vpop.permute.xlu1 %1898  ;;  %v1894_v10 = vpop.permute.xlu0 %1893 }
 0x74c   :  { %v1902_v44 = vmul.f32 %v1899_v7, %v1890_v23  ;;  %v1901_v18 = vmul.f32 %v1894_v10, %v1889_v58 }
 0x74d   :  { %v1877_v1 = vadd.f32 %v1876_v39, %v1875_v3  ;;  %v1870_v13 = vadd.f32 %v1869_v45, %v1868_v38  ;;  %v5519_v3 = vld [vmem:[#allocation4 + $0x208] sm:$0xf] }
 0x74e   :  { %v1910_v20 = vsel %vm28_vm1, %v1902_v44, 0.0  ;;  %v1903_v24 = vsel %vm28_vm1, %v1901_v18, 0.0 }
 0x74f   :  { %v1878_v29 = vrot.slane %v1877_v1, 2  ;;  %v1871_v54 = vrot.slane %v1870_v13, 2  ;;  %v1911_v61 = vrot.slane %v1910_v20, 4  ;;  %v1904_v0 = vrot.slane %v1903_v24, 4  ;;  %v1934_v30 = vpop.permute.xlu1 %1933  ;;  %v1929_v31 = vpop.permute.xlu0 %1928 }
 0x750   :  { %v1937_v35 = vmul.f32 %v1934_v30, %v1925_v33  ;;  %v1936_v43 = vmul.f32 %v1929_v31, %v1924_v56  ;;  %v2198_v31 = vld [vmem:[#allocation2 + $0x8] sm:$0xff] }
 0x751   :  { %v1879_v9 = vadd.f32 %v1878_v29, %v1877_v1  ;;  %v1872_v51 = vadd.f32 %v1871_v54, %v1870_v13  ;;  %v1912_v52 = vadd.f32 %v1911_v61, %v1910_v20  ;;  %v1905_v6 = vadd.f32 %v1904_v0, %v1903_v24 }
 0x752   :  { %v1945_v23 = vsel %vm28_vm1, %v1937_v35, 0.0  ;;  %v1938_v58 = vsel %vm28_vm1, %v1936_v43, 0.0  ;;  %v2202_v29 = vrot.slane %v5519_v3, %v5068_v34 }
 0x753   :  { %v1880_v53 = vrot.slane %v1879_v9, 1  ;;  %v1873_v12 = vrot.slane %v1872_v51, 1  ;;  %v1913_v27 = vrot.slane %v1912_v52, 2  ;;  %v1906_v50 = vrot.slane %v1905_v6, 2  ;;  %v5515_v46 = vpop.permute.xlu1 %1968  ;;  %v5517_v48 = vpop.permute.xlu0 %1963 }
 0x754   :  { %v1946_v32 = vrot.slane %v1945_v23, 4  ;;  %v1939_v28 = vrot.slane %v1938_v58, 4 }
 0x755   :  { %v1881_v33 = vadd.f32 %v1880_v53, %v1879_v9  ;;  %v1874_v56 = vadd.f32 %v1873_v12, %v1872_v51  ;;  %v1914_v11 = vadd.f32 %v1913_v27, %v1912_v52  ;;  %v1907_v4 = vadd.f32 %v1906_v50, %v1905_v6  ;;  %v2204_v50 = vld [vmem:[#allocation2 + $0x6] sm:$0xff] }
 0x756   :  { %v1947_v14 = vadd.f32 %v1946_v32, %v1945_v23  ;;  %v1940_v16 = vadd.f32 %v1939_v28, %v1938_v58  ;;  %v5535_v27 = vmul.f32 %v2202_v29, %v2198_v31  ;;  %v1686_v29 = vrot.slane %v5467_v55, %v5109_v26 }
 0x757   :  { %v1884_v38 = vsel %vm714_vm2, %v1881_v33, %v1874_v56  ;;  %v1915_v39 = vrot.slane %v1914_v11, 1  ;;  %v1908_v45 = vrot.slane %v1907_v4, 1  ;;  %v1724_v7 = vpop.permute.xlu1 %1723  ;;  %v1719_v10 = vpop.permute.xlu0 %1718 }
 0x758   :  { %1886 = vst.msk [vmem:[#allocation3 + $0x8] sm:$0x3] %vm717_vm3, %v1884_v38  ;;  %v1948_v44 = vrot.slane %v1947_v14, 2  ;;  %v1941_v18 = vrot.slane %v1940_v16, 2  ;;  %v1727_v1 = vmul.f32 %v1724_v7, %v5435_v49  ;;  %v1726_v13 = vmul.f32 %v1719_v10, %v5437_v41 }
 0x759   :  { %v1916_v20 = vadd.f32 %v1915_v39, %v1914_v11  ;;  %v1909_v24 = vadd.f32 %v1908_v45, %v1907_v4  ;;  %v2208_v41 = vrot.slane %v5519_v3, %v5073_v36 }
 0x75a   :  { %v1949_v54 = vadd.f32 %v1948_v44, %v1947_v14  ;;  %v1942_v61 = vadd.f32 %v1941_v18, %v1940_v16  ;;  %v1735_v0 = vsel %vm28_vm1, %v1727_v1, 0.0  ;;  %v1728_v30 = vsel %vm28_vm1, %v1726_v13, 0.0 }
 0x75b   :  { %v1919_v35 = vsel %vm714_vm2, %v1916_v20, %v1909_v24  ;;  %v1736_v43 = vrot.slane %v1735_v0, 4  ;;  %v1729_v9 = vrot.slane %v1728_v30, 4  ;;  %v1759_v51 = vpop.permute.xlu1 %1758  ;;  %v1754_v49 = vpop.permute.xlu0 %1753  ;;  %v2209_v7 = vmul.f32 %v2208_v41, %v2204_v50 }
 0x75c   :  { %1921 = vst.msk [vmem:[#allocation3 + $0xa] sm:$0x3] %vm717_vm3, %v1919_v35  ;;  %v1950_v52 = vrot.slane %v1949_v54, 1  ;;  %v1943_v6 = vrot.slane %v1942_v61, 1  ;;  %v1762_v23 = vmul.f32 %v1759_v51, %v5454_v5  ;;  %v1761_v58 = vmul.f32 %v1754_v49, %v5456_v47 }
 0x75d   :  { %v1737_v53 = vadd.f32 %v1736_v43, %v1735_v0  ;;  %v1730_v12 = vadd.f32 %v1729_v9, %v1728_v30  ;;  %v1710_v24 = vrot.slane %v5467_v55, %v5106_v25 }
 0x75e   :  { %v1951_v32 = vadd.f32 %v1950_v52, %v1949_v54  ;;  %v1944_v28 = vadd.f32 %v1943_v6, %v1942_v61  ;;  %v1770_v33 = vsel %vm28_vm1, %v1762_v23, 0.0  ;;  %v1763_v56 = vsel %vm28_vm1, %v1761_v58, 0.0 }
 0x75f   :  { %v1738_v11 = vrot.slane %v1737_v53, 2  ;;  %v1731_v4 = vrot.slane %v1730_v12, 2  ;;  %v1771_v14 = vrot.slane %v1770_v33, 4  ;;  %v1764_v16 = vrot.slane %v1763_v56, 4  ;;  %v1794_v38 = vpop.permute.xlu1 %1793  ;;  %v1789_v39 = vpop.permute.xlu0 %1788 }
 0x760   :  { %v1954_v5 = vsel %vm714_vm2, %v1951_v32, %v1944_v28  ;;  %v1797_v47 = vmul.f32 %v1794_v38, %v5470_v42  ;;  %v1796_v45 = vmul.f32 %v1789_v39, %v5472_v62 }
 0x761   :  { %1956 = vst.msk [vmem:[#allocation3 + $0xc] sm:$0x3] %vm717_vm3, %v1954_v5  ;;  %v1739_v10 = vadd.f32 %v1738_v11, %v1737_v53  ;;  %v1732_v44 = vadd.f32 %v1731_v4, %v1730_v12  ;;  %v1772_v18 = vadd.f32 %v1771_v14, %v1770_v33  ;;  %v1765_v1 = vadd.f32 %v1764_v16, %v1763_v56 }
 0x762   :  { %v1805_v13 = vsel %vm28_vm1, %v1797_v47, 0.0  ;;  %v1798_v20 = vsel %vm28_vm1, %v1796_v45, 0.0 }
 0x763   :  { %v1740_v42 = vrot.slane %v1739_v10, 1  ;;  %v1733_v54 = vrot.slane %v1732_v44, 1  ;;  %v1773_v62 = vrot.slane %v1772_v18, 2  ;;  %v1766_v61 = vrot.slane %v1765_v1, 2  ;;  %v1829_v0 = vpop.permute.xlu1 %1828  ;;  %v1824_v30 = vpop.permute.xlu0 %1823 }
 0x764   :  { %v1806_v31 = vrot.slane %v1805_v13, 4  ;;  %v1799_v35 = vrot.slane %v1798_v20, 4  ;;  %v1832_v43 = vmul.f32 %v1829_v0, %v5484_v59  ;;  %v1831_v9 = vmul.f32 %v1824_v30, %v5486_v60 }
 0x765   :  { %v1741_v51 = vadd.f32 %v1740_v42, %v1739_v10  ;;  %v1734_v49 = vadd.f32 %v1733_v54, %v1732_v44  ;;  %v1774_v41 = vadd.f32 %v1773_v62, %v1772_v18  ;;  %v1767_v52 = vadd.f32 %v1766_v61, %v1765_v1  ;;  %v2211_v62 = vld [vmem:[#allocation2 + $0x4] sm:$0xff] }
 0x766   :  { %v1807_v6 = vadd.f32 %v1806_v31, %v1805_v13  ;;  %v1800_v23 = vadd.f32 %v1799_v35, %v1798_v20  ;;  %v1840_v55 = vsel %vm28_vm1, %v1832_v43, 0.0  ;;  %v1833_v58 = vsel %vm28_vm1, %v1831_v9, 0.0 }
 0x767   :  { %v1744_v53 = vsel %vm714_vm2, %v1741_v51, %v1734_v49  ;;  %v1775_v12 = vrot.slane %v1774_v41, 1  ;;  %v1768_v50 = vrot.slane %v1767_v52, 1  ;;  %v1841_v32 = vrot.slane %v1840_v55, 4  ;;  %v1706_v28 = vpop.permute.xlu1 %1705  ;;  %v1682_v33 = vpop.permute.xlu0 %1681 }
 0x768   :  { %1746 = vst.msk [vmem:[#allocation3] sm:$0x3] %vm717_vm3, %v1744_v53  ;;  %v1808_v59 = vrot.slane %v1807_v6, 2  ;;  %v1801_v60 = vrot.slane %v1800_v23, 2  ;;  %v1834_v56 = vrot.slane %v1833_v58, 4  ;;  %v1711_v11 = vmul.f32 %v1710_v24, %v1706_v28 }
 0x769   :  { %v1776_v4 = vadd.f32 %v1775_v12, %v1774_v41  ;;  %v1769_v14 = vadd.f32 %v1768_v50, %v1767_v52  ;;  %v1842_v16 = vadd.f32 %v1841_v32, %v1840_v55  ;;  %v1687_v38 = vmul.f32 %v1686_v29, %v1682_v33  ;;  %v2218_v41 = vld [vmem:[#allocation2 + $0x2] sm:$0xff]  ;;  %v4154_v33 = vld [vmem:[#allocation4 + $0x20c] ss:$0 sm:$0xff] }
 0x76a   :  { %v1809_v39 = vadd.f32 %v1808_v59, %v1807_v6  ;;  %v1802_v5 = vadd.f32 %v1801_v60, %v1800_v23  ;;  %v1835_v47 = vadd.f32 %v1834_v56, %v1833_v58  ;;  %v1960_v45 = vadd.f32 %v5504_v2, %v1711_v11  ;;  %v4150_v60 = vld [vmem:[#allocation4 + $0x15e] ss:$0 sm:$0xff] }
 0x76b   :  { %v1779_v10 = vsel %vm714_vm2, %v1776_v4, %v1769_v14  ;;  %v1843_v44 = vrot.slane %v1842_v16, 2  ;;  %v1959_v18 = vadd.f32 %v5506_v15, %v1687_v38  ;;  %v2215_v1 = vrot.slane %v5519_v3, %v5076_v37 }
 0x76c   :  { %1781 = vst.msk [vmem:[#allocation3 + $0x2] sm:$0x3] %vm717_vm3, %v1779_v10  ;;  %v1810_v13 = vrot.slane %v1809_v39, 1  ;;  %v1803_v20 = vrot.slane %v1802_v5, 1  ;;  %v1836_v24 = vrot.slane %v1835_v47, 2  ;;  %v1972_v29 = vmul.f32 %v5515_v46, %v1960_v45 }
 0x76d   :  { %v1844_v42 = vadd.f32 %v1843_v44, %v1842_v16  ;;  %v1971_v54 = vmul.f32 %v5517_v48, %v1959_v18  ;;  %v2210_v2 = vadd.f32 %v2209_v7, %v5535_v27  ;;  %v2222_v9 = vrot.slane %v5519_v3, %v5081_v40  ;;  %v2235_v44 = vld [vmem:[#allocation4 + $0x180] sm:$0xff]  ;;  %v2236_v18 = vld [vmem:[#allocation4 + $0x188] sm:$0xff] }
 0x76e   :  { %v1811_v61 = vadd.f32 %v1810_v13, %v1809_v39  ;;  %v1804_v0 = vadd.f32 %v1803_v20, %v1802_v5  ;;  %v1837_v30 = vadd.f32 %v1836_v24, %v1835_v47  ;;  %v1980_v15 = vsel %vm28_vm1, %v1972_v29, 0.0  ;;  %v2016_v5 = vpop.permute.xlu0 %2015  ;;  %v2018_v20 = vpop.permute.xlu1 %2017  ;;  %v2237_v29 = vld [vmem:[#allocation4 + $0x190] sm:$0xff] }
 0x76f   :  { %v1845_v31 = vrot.slane %v1844_v42, 1  ;;  %v1981_v35 = vrot.slane %v1980_v15, 4  ;;  %v1973_v43 = vsel %vm28_vm1, %v1971_v54, 0.0  ;;  %v2216_v48 = vmul.f32 %v2215_v1, %v2211_v62 }
 0x770   :  { %v1814_v46 = vsel %vm714_vm2, %v1811_v61, %v1804_v0  ;;  %v1838_v51 = vrot.slane %v1837_v30, 1  ;;  %v1974_v49 = vrot.slane %v1973_v43, 4  ;;  %v2223_v12 = vmul.f32 %v2222_v9, %v2218_v41  ;;  %v2241_v0 = vld [vmem:[#allocation4 + $0x1b0] sm:$0xff] }
 0x771   :  { %1816 = vst.msk [vmem:[#allocation3 + $0x4] sm:$0x3] %vm717_vm3, %v1814_v46  ;;  %v1846_v27 = vadd.f32 %v1845_v31, %v1844_v42  ;;  %v1982_v7 = vadd.f32 %v1981_v35, %v1980_v15  ;;  %v2217_v23 = vadd.f32 %v2216_v48, %v2210_v2  ;;  %v1999_v14 = vmul.f32 %v4150_v60, %v5334_v57  ;;  %v2238_v42 = vld [vmem:[#allocation4 + $0x198] sm:$0xff]  ;;  %v2239_v2 = vld [vmem:[#allocation4 + $0x1a0] sm:$0xff] }
 0x772   :  { %v1839_v52 = vadd.f32 %v1838_v51, %v1837_v30  ;;  %v1975_v6 = vadd.f32 %v1974_v49, %v1973_v43  ;;  %v2000_v10 = vmul.f32 %v4150_v60, %v5336_v19  ;;  %v4702_v57 = vpack.c.bf16 %v2236_v18, %v2235_v44  ;;  %v2240_v19 = vld [vmem:[#allocation4 + $0x1a8] sm:$0xff]  ;;  %v2242_v30 = vld [vmem:[#allocation4 + $0x1b8] sm:$0xff] }
 0x773   :  { %v1983_v55 = vrot.slane %v1982_v7, 2  ;;  %v2224_v32 = vadd.f32 %v2223_v12, %v2217_v23  ;;  %v4705_v54 = vpack.c.bf16 %v2238_v42, %v2237_v29  ;;  %v4708_v61 = vpack.c.bf16 %v2240_v19, %v2239_v2  ;;  %v4156_v29 = vld [vmem:[#allocation4 + $0x20d] ss:$0 sm:$0xff]  ;;  %v2665_v42 = vld [vmem:[#allocation4 + $0x1c0] sm:$0xff] }
 0x774   :  { %v1849_v58 = vsel %vm714_vm2, %v1846_v27, %v1839_v52  ;;  %v1976_v53 = vrot.slane %v1975_v6, 2  ;;  %v4711_v31 = vpack.c.bf16 %v2242_v30, %v2241_v0  ;;  %v2669_v30 = vld [vmem:[#allocation4 + $0x1e0] sm:$0xff] }
 0x775   :  { %1851 = vst.msk [vmem:[#allocation3 + $0x6] sm:$0x3] %vm717_vm3, %v1849_v58  ;;  %v1984_v3 = vadd.f32 %v1983_v55, %v1982_v7  ;;  %v2229_v4 = vadd.f32 %v4154_v33, %v2224_v32 }
 0x776   :  { %v1977_v50 = vadd.f32 %v1976_v53, %v1975_v6 }
 0x777   :  { %v1985_v28 = vrot.slane %v1984_v3, 1  ;;  %v2230_v47 = vmul.f32 0.5, %v2229_v4 }
 0x778   :  { %v1978_v59 = vrot.slane %v1977_v50, 1 }
 0x779   :  { %v1986_v56 = vadd.f32 %v1985_v28, %v1984_v3  ;;  %4918 = vtanh.f32 %v2230_v47 }
 0x77a   :  { %v1979_v11 = vadd.f32 %v1978_v59, %v1977_v50 }
 0x77c   :  { %v1989_v16 = vsel %vm714_vm2, %v1986_v56, %v1979_v11  ;;  %v1992_v38 = vld [vmem:[#allocation3] sm:$0xff] }
 0x77d   :  { %1991 = vst.msk [vmem:[#allocation3 + $0xe] sm:$0x3] %vm717_vm3, %v1989_v16  ;;  %v2001_v39 = vadd.f32 %v1999_v14, %v1992_v38  ;;  %v2655_v38 = vmul.f32 0.5, %v5353_v8 }
 0x77f   :  { %v2021_v45 = vmul.f32 %v2016_v5, %v2001_v39 }
 0x781   :  { %4416 = vmatprep.mubr.msk.f32.mxu1 %vm28_vm1, %v2021_v45 }
 0x783   :  { %v4919_v62 = vpop.eup %4918 }
 0x784   :  { %v1993_v1 = vld [vmem:[#allocation3 + $0x8] sm:$0xff]  ;;  %v2232_v15 = vadd.f32 1.0, %v4919_v62  ;;  %v2667_v62 = vld [vmem:[#allocation4 + $0x1d0] sm:$0xff] }
 0x785   :  { %v2002_v13 = vadd.f32 %v2000_v10, %v1993_v1 }
 0x786   :  { %v2233_v35 = vmul.f32 0.5, %v2232_v15  ;;  %v2670_v15 = vld [vmem:[#allocation4 + $0x1e8] sm:$0xff] }
 0x787   :  { %v2022_v24 = vmul.f32 %v2018_v20, %v2002_v13 }
 0x788   :  { %v5583_v43 = vmul.f32 %v2233_v35, %v2229_v4  ;;  %v4720_v35 = vpack.c.bf16 %v2670_v15, %v2669_v30 }
 0x789   :  { %4417 = vmatmul.mubr.msk.f32.vlgmr.msra.gmra.mrb[4].mxu1 %vm28_vm1, %v2022_v24 }
 0x78a   :  { %4703 = vmatpush3.bf16.msra.mxu1 %v4702_v57  ;;  %4446 = vmatprep.mubr.msk.f32.mxu1 %vm5016_vm4, %v5013_v17 }
 0x78b   :  { %4704 = vmatprep.subr.bf16.mxu1 %v5015_v63 }
 0x78e   :  { %4706 = vmatpush3.bf16.msra.mxu1 %v4705_v54  ;;  %v2666_v54 = vld [vmem:[#allocation4 + $0x1c8] sm:$0xff] }
 0x78f   :  { %4707 = vmatprep.subr.bf16.mxu1 %v5015_v63  ;;  %v4714_v2 = vpack.c.bf16 %v2666_v54, %v2665_v42 }
 0x791   :  { %4715 = vmatpush3.bf16.msra.mxu0 %v4714_v2 }
 0x792   :  { %4709 = vmatpush3.bf16.msra.mxu1 %v4708_v61  ;;  %v2668_v61 = vld [vmem:[#allocation4 + $0x1d8] sm:$0xff]  ;;  %4716 = vmatprep.subr.bf16.mxu0 %v5015_v63 }
 0x793   :  { %4710 = vmatprep.subr.bf16.mxu1 %v5015_v63  ;;  %v4717_v0 = vpack.c.bf16 %v2668_v61, %v2667_v62 }
 0x795   :  { %4718 = vmatpush3.bf16.msra.mxu0 %v4717_v0 }
 0x796   :  { %4712 = vmatpush3.bf16.msra.mxu1 %v4711_v31  ;;  %4719 = vmatprep.subr.bf16.mxu0 %v5015_v63 }
 0x797   :  { %4725 = vmatprep.subr.bf16.mxu1 %v5015_v63 }
 0x799   :  { %4447 = vmatmul.mubr.msk.f32.vlgmr.msra.gmra.mrb[6].mxu1 %vm28_vm1, %v5583_v43  ;;  %4721 = vmatpush3.bf16.msra.mxu0 %v4720_v35 }
 0x79a   :  { %4476 = vmatprep.mubr.msk.f32.mxu1 %vm5016_vm4, %v5013_v17  ;;  %4722 = vmatprep.subr.bf16.mxu0 %v5015_v63 }
 0x85c   :  { %v4418_v9 = vpop.f32.mrb[4].mxu1 }
 0x85d   :  { %v2103_v46 = vpop.f32.mrb[5].mxu1 }
 0x85e   :  { %4920 = vtanh.f32 %v2103_v46 }
 0x85f   :  { %4922 = vtanh.f32 %v4418_v9  ;;  %v2672_v9 = vld [vmem:[#allocation4 + $0x1f8] sm:$0xff] }
 0x860   :  { %4924 = vtanh.f32 %v2655_v38 }
 0x868   :  { %v4921_v51 = vpop.eup %4920 }
 0x869   :  { %v3376_v49 = vrot.slane %v4921_v51, 2  ;;  %v3379_v6 = vrot.slane %v4921_v51, 4  ;;  %v3382_v55 = vrot.slane %v4921_v51, 6  ;;  %v4923_v58 = vpop.eup %4922 }
 0x86a   :  { %v3387_v32 = vrot.slane %v4923_v58, 2  ;;  %v3390_v60 = vrot.slane %v4923_v58, 4  ;;  %v3393_v11 = vrot.slane %v4923_v58, 6  ;;  %v4925_v10 = vpop.eup %4924 }
 0x86b   :  { %v3378_v48 = vadd.f32 %v4921_v51, %v3376_v49  ;;  %v2657_v1 = vadd.f32 1.0, %v4925_v10 }
 0x86c   :  { %v5590_v27 = vpop.f32.mrb[6].mxu1 }
 0x86d   :  { %v4448_v7 = vpop.f32.mrb[7].mxu1  ;;  %v2353_v41 = vrot.slane %v5590_v27, %v5076_v37  ;;  %v2336_v52 = vrot.slane %v5590_v27, %v5081_v40  ;;  %v3381_v23 = vadd.f32 %v3379_v6, %v3378_v48  ;;  %v2401_v53 = vrot.slane %v5590_v27, %v5068_v34 }
 0x86e   :  { %v2377_v12 = vrot.slane %v5590_v27, %v5073_v36  ;;  %v2449_v28 = vrot.slane %v5590_v27, %v5098_v21  ;;  %v2425_v33 = vrot.slane %v5590_v27, %v5101_v22  ;;  %v2497_v4 = vrot.slane %v5590_v27, %v5106_v25 }
 0x86f   :  { %2365 = vbcast.lane.b32.xlu1 %v2353_v41, 328  ;;  %2348 = vbcast.lane.b32.xlu0 %v2336_v52, 328  ;;  %v3384_v3 = vadd.f32 %v3382_v55, %v3381_v23  ;;  %v2473_v14 = vrot.slane %v5590_v27, %v5109_v26  ;;  %v2658_v57 = vmul.f32 0.5, %v2657_v1  ;;  %v2321_v19 = vadd.f32 %v4156_v29, %v5590_v27  ;;  %v2332_v55 = vld [vmem:[#allocation4 + $0x200] sm:$0xff] }
 0x871   :  { %v3385_v50 = vadd.f32 %v4923_v58, %v3384_v3  ;;  %v2659_v24 = vmul.f32 %v2658_v57, %v5353_v8  ;;  %v2323_v31 = vand.u32 2147483647, %v2321_v19  ;;  %v2671_v8 = vld [vmem:[#allocation4 + $0x1f0] sm:$0xff] }
 0x872   :  { %v4723_v51 = vpack.c.bf16 %v2672_v9, %v2671_v8 }
 0x873   :  { %2413 = vbcast.lane.b32.xlu1 %v2401_v53, 328  ;;  %2389 = vbcast.lane.b32.xlu0 %v2377_v12, 328  ;;  %v3389_v59 = vadd.f32 %v3387_v32, %v3385_v50  ;;  %v2324_v46 = vsub.f32 0.0, %v2323_v31 }
 0x874   :  { %4724 = vmatpush3.bf16.msra.mxu0 %v4723_v51 }
 0x875   :  { %v3392_v56 = vadd.f32 %v3390_v60, %v3389_v59  ;;  %v2325_v49 = vmul.f32 1.442695, %v2324_v46  ;;  %4731 = vmatprep.subr.bf16.mxu0 %v5015_v63 }
 0x877   :  { %2461 = vbcast.lane.b32.xlu1 %v2449_v28, 328  ;;  %2437 = vbcast.lane.b32.xlu0 %v2425_v33, 328  ;;  %v5608_v16 = vadd.f32 %v3393_v11, %v3392_v56  ;;  %4926 = vpow2.f32 %v2325_v49 }
 0x87b   :  { %2509 = vbcast.lane.b32.xlu1 %v2497_v4, 328  ;;  %2485 = vbcast.lane.b32.xlu0 %v2473_v14, 328 }
 0x87f   :  { %2356 = vbcast.lane.b32.xlu1 %v2353_v41, 320  ;;  %2339 = vbcast.lane.b32.xlu0 %v2336_v52, 320  ;;  %v2322_v52 = vmax.f32 %v2321_v19, 0.0 }
 0x881   :  { %v4927_v48 = vpop.eup %4926 }
 0x882   :  { %v2327_v27 = vadd.f32 1.0, %v4927_v48 }
 0x883   :  { %2404 = vbcast.lane.b32.xlu1 %v2401_v53, 320  ;;  %2380 = vbcast.lane.b32.xlu0 %v2377_v12, 320 }
 0x884   :  { %4928 = vlog2.f32 %v2327_v27 }
 0x887   :  { %2452 = vbcast.lane.b32.xlu1 %v2449_v28, 320  ;;  %2428 = vbcast.lane.b32.xlu0 %v2425_v33, 320 }
 0x88e   :  { %v4929_v7 = vpop.eup %4928 }
 0x88f   :  { %v2329_v41 = vmul.f32 0.6931472, %v4929_v7 }
 0x891   :  { %v2330_v6 = vadd.f32 %v2329_v41, %v2322_v52 }
 0x893   :  { %v2394_v23 = vrot.slane %v2330_v6, %v5068_v34  ;;  %v2370_v58 = vrot.slane %v2330_v6, %v5073_v36  ;;  %v2442_v3 = vrot.slane %v2330_v6, %v5098_v21  ;;  %v2418_v50 = vrot.slane %v2330_v6, %v5101_v22 }
 0x894   :  { %v5623_v11 = vmul.f32 %v2330_v6, %v5583_v43  ;;  %v2466_v10 = vrot.slane %v2330_v6, %v5109_v26 }
 0x895   :  { %v2395_v53 = vmul.f32 %v2394_v23, %v2332_v55  ;;  %v2371_v12 = vmul.f32 %v2370_v58, %v2332_v55  ;;  %v2443_v33 = vmul.f32 %v2442_v3, %v2332_v55  ;;  %v2419_v56 = vmul.f32 %v2418_v50, %v2332_v55 }
 0x896   :  { %v2409_v1 = vrot.slane %v5623_v11, %v5068_v34  ;;  %v2467_v61 = vmul.f32 %v2466_v10, %v2332_v55  ;;  %v2457_v15 = vrot.slane %v5623_v11, %v5098_v21  ;;  %v2433_v31 = vrot.slane %v5623_v11, %v5101_v22 }
 0x897   :  { %v2396_v32 = vmul.f32 1.442695, %v2395_v53  ;;  %v2372_v28 = vmul.f32 1.442695, %v2371_v12 }
 0x898   :  { %v2468_v48 = vmul.f32 1.442695, %v2467_v61 }
 0x899   :  { %4930 = vpow2.f32 %v2396_v32 }
 0x89a   :  { %4932 = vpow2.f32 %v2372_v28 }
 0x8e1   :  { %v2366_v39 = vpop.permute.xlu1 %2365  ;;  %v2349_v5 = vpop.permute.xlu0 %2348 }
 0x8e2   :  { %2518 = vperm.xlu1 %4825, %v2366_v39   ;;  %2513 = vperm.xlu0 %4824, %v2349_v5   ;;  %v2361_v5 = vrot.slane %v5623_v11, %v5076_v37 }
 0x8e5   :  { %v2414_v47 = vpop.permute.xlu1 %2413  ;;  %v2390_v45 = vpop.permute.xlu0 %2389 }
 0x8e6   :  { %2553 = vperm.xlu1 %4825, %v2414_v47   ;;  %2548 = vperm.xlu0 %4824, %v2390_v45   ;;  %v2344_v47 = vrot.slane %v5623_v11, %v5081_v40  ;;  %v2490_v45 = vrot.slane %v2330_v6, %v5106_v25 }
 0x8e8   :  { %v2491_v2 = vmul.f32 %v2490_v45, %v2332_v55 }
 0x8e9   :  { %v2462_v44 = vpop.permute.xlu1 %2461  ;;  %v2438_v18 = vpop.permute.xlu0 %2437 }
 0x8ea   :  { %2588 = vperm.xlu1 %4825, %v2462_v44   ;;  %2583 = vperm.xlu0 %4824, %v2438_v18   ;;  %v2492_v9 = vmul.f32 1.442695, %v2491_v2 }
 0x8ed   :  { %v2510_v13 = vpop.permute.xlu1 %2509  ;;  %v2486_v20 = vpop.permute.xlu0 %2485 }
 0x8ee   :  { %2623 = vperm.xlu1 %4825, %v2510_v13   ;;  %2618 = vperm.xlu0 %4824, %v2486_v20   ;;  %v2385_v13 = vrot.slane %v5623_v11, %v5073_v36  ;;  %v4931_v20 = vpop.eup %4930 }
 0x8ef   :  { %v4933_v29 = vpop.eup %4932 }
 0x8f1   :  { %v2357_v59 = vpop.permute.xlu1 %2356  ;;  %v2340_v60 = vpop.permute.xlu0 %2339 }
 0x8f2   :  { %2500 = vbcast.lane.b32.xlu1 %v2497_v4, 320  ;;  %2476 = vbcast.lane.b32.xlu0 %v2473_v14, 320  ;;  %v2444_v4 = vmul.f32 1.442695, %v2443_v33  ;;  %v2420_v14 = vmul.f32 1.442695, %v2419_v56  ;;  %v2362_v44 = vmul.f32 %v2361_v5, %v2357_v59  ;;  %v2345_v18 = vmul.f32 %v2344_v47, %v2340_v60 }
 0x8f4   :  { %4934 = vpow2.f32 %v2444_v4  ;;  %v2543_v19 = vmul.f32 %v4931_v20, %v2362_v44  ;;  %v2542_v62 = vmul.f32 %v4933_v29, %v2345_v18 }
 0x8f5   :  { %v2405_v38 = vpop.permute.xlu1 %2404  ;;  %v2381_v39 = vpop.permute.xlu0 %2380  ;;  %4936 = vpow2.f32 %v2420_v14 }
 0x8f6   :  { %2661 = vrot.lane.b32.xlu0 %v2659_v24, %s5014_s0  ;;  %v2410_v57 = vmul.f32 %v2409_v1, %v2405_v38  ;;  %v2386_v24 = vmul.f32 %v2385_v13, %v2381_v39  ;;  %4938 = vpow2.f32 %v2492_v9 }
 0x8f7   :  { %4940 = vpow2.f32 %v2468_v48 }
 0x8f8   :  { %v2545_v0 = vadd.f32 %v2543_v19, %v2410_v57  ;;  %v2544_v30 = vadd.f32 %v2542_v62, %v2386_v24 }
 0x8f9   :  { %v2453_v42 = vpop.permute.xlu1 %2452  ;;  %v2429_v54 = vpop.permute.xlu0 %2428 }
 0x8fa   :  { %v2458_v7 = vmul.f32 %v2457_v15, %v2453_v42  ;;  %v2434_v41 = vmul.f32 %v2433_v31, %v2429_v54 }
 0x8fe   :  { %v4935_v46 = vpop.eup %4934 }
 0x8ff   :  { %v4937_v27 = vpop.eup %4936  ;;  %v2578_v23 = vmul.f32 %v4935_v46, %v2545_v0 }
 0x900   :  { %v2577_v55 = vmul.f32 %v4937_v27, %v2544_v30  ;;  %v4939_v15 = vpop.eup %4938  ;;  %v2481_v27 = vrot.slane %v5623_v11, %v5109_v26 }
 0x901   :  { %v2580_v56 = vadd.f32 %v2578_v23, %v2458_v7  ;;  %v4941_v46 = vpop.eup %4940 }
 0x902   :  { %v2579_v4 = vadd.f32 %v2577_v55, %v2434_v41 }
 0x903   :  { %v2613_v48 = vmul.f32 %v4939_v15, %v2580_v56 }
 0x904   :  { %v2612_v55 = vmul.f32 %v4941_v46, %v2579_v4  ;;  %v2749_v46 = vld [vmem:[#allocation4 + $0x220] sm:$0xff] }
 0x961   :  { %v2519_v35 = vpop.permute.xlu1 %2518  ;;  %v2514_v8 = vpop.permute.xlu0 %2513 }
 0x962   :  { %v2522_v51 = vmul.f32 %v2519_v35, %v2362_v44  ;;  %v2521_v49 = vmul.f32 %v2514_v8, %v2345_v18 }
 0x964   :  { %v2530_v52 = vsel %vm28_vm1, %v2522_v51, 0.0  ;;  %v2523_v6 = vsel %vm28_vm1, %v2521_v49, 0.0 }
 0x965   :  { %v2531_v58 = vrot.slane %v2530_v52, 4  ;;  %v2524_v53 = vrot.slane %v2523_v6, 4  ;;  %v2554_v12 = vpop.permute.xlu1 %2553  ;;  %v2549_v3 = vpop.permute.xlu0 %2548 }
 0x966   :  { %v2557_v50 = vmul.f32 %v2554_v12, %v2545_v0  ;;  %v2556_v32 = vmul.f32 %v2549_v3, %v2544_v30  ;;  %v2505_v30 = vrot.slane %v5623_v11, %v5106_v25 }
 0x967   :  { %v2532_v28 = vadd.f32 %v2531_v58, %v2530_v52  ;;  %v2525_v33 = vadd.f32 %v2524_v53, %v2523_v6 }
 0x968   :  { %v2565_v59 = vsel %vm28_vm1, %v2557_v50, 0.0  ;;  %v2558_v60 = vsel %vm28_vm1, %v2556_v32, 0.0 }
 0x969   :  { %v2533_v14 = vrot.slane %v2532_v28, 2  ;;  %v2526_v38 = vrot.slane %v2525_v33, 2  ;;  %v2566_v39 = vrot.slane %v2565_v59, 4  ;;  %v2559_v5 = vrot.slane %v2558_v60, 4  ;;  %v2589_v47 = vpop.permute.xlu1 %2588  ;;  %v2584_v45 = vpop.permute.xlu0 %2583 }
 0x96a   :  { %v2592_v10 = vmul.f32 %v2589_v47, %v2580_v56  ;;  %v2591_v44 = vmul.f32 %v2584_v45, %v2579_v4 }
 0x96b   :  { %v2534_v18 = vadd.f32 %v2533_v14, %v2532_v28  ;;  %v2527_v1 = vadd.f32 %v2526_v38, %v2525_v33  ;;  %v2567_v13 = vadd.f32 %v2566_v39, %v2565_v59  ;;  %v2560_v20 = vadd.f32 %v2559_v5, %v2558_v60 }
 0x96c   :  { %v2600_v57 = vsel %vm28_vm1, %v2592_v10, 0.0  ;;  %v2593_v24 = vsel %vm28_vm1, %v2591_v44, 0.0 }
 0x96d   :  { %v2535_v29 = vrot.slane %v2534_v18, 1  ;;  %v2528_v42 = vrot.slane %v2527_v1, 1  ;;  %v2568_v54 = vrot.slane %v2567_v13, 2  ;;  %v2561_v2 = vrot.slane %v2560_v20, 2  ;;  %v2624_v19 = vpop.permute.xlu1 %2623  ;;  %v2619_v62 = vpop.permute.xlu0 %2618 }
 0x96e   :  { %v2601_v61 = vrot.slane %v2600_v57, 4  ;;  %v2594_v0 = vrot.slane %v2593_v24, 4 }
 0x96f   :  { %v2536_v31 = vadd.f32 %v2535_v29, %v2534_v18  ;;  %v2529_v35 = vadd.f32 %v2528_v42, %v2527_v1  ;;  %v2569_v8 = vadd.f32 %v2568_v54, %v2567_v13  ;;  %v2562_v9 = vadd.f32 %v2561_v2, %v2560_v20 }
 0x970   :  { %v2602_v51 = vadd.f32 %v2601_v61, %v2600_v57  ;;  %v2595_v49 = vadd.f32 %v2594_v0, %v2593_v24  ;;  %v4157_v61 = vld [vmem:[#allocation4 + $0x20e] ss:$0 sm:$0xff] }
 0x971   :  { %v2539_v7 = vsel %vm714_vm2, %v2536_v31, %v2529_v35  ;;  %v2570_v41 = vrot.slane %v2569_v8, 1  ;;  %v2563_v52 = vrot.slane %v2562_v9, 1  ;;  %v2501_v6 = vpop.permute.xlu1 %2500  ;;  %v2477_v23 = vpop.permute.xlu0 %2476  ;;  %v2653_v0 = vmul.f32 %v4157_v61, %v5583_v43 }
 0x972   :  { %2541 = vst.msk [vmem:[#allocation3] sm:$0x3] %vm717_vm3, %v2539_v7  ;;  %v2603_v58 = vrot.slane %v2602_v51, 2  ;;  %v2596_v53 = vrot.slane %v2595_v49, 2  ;;  %v2506_v12 = vmul.f32 %v2505_v30, %v2501_v6  ;;  %v2482_v3 = vmul.f32 %v2481_v27, %v2477_v23  ;;  %v2866_v6 = vld [vmem:[#allocation4 + $0x240] sm:$0xff] }
 0x973   :  { %v2571_v50 = vadd.f32 %v2570_v41, %v2569_v8  ;;  %v2564_v32 = vadd.f32 %v2563_v52, %v2562_v9  ;;  %v2747_v8 = vld [vmem:[#allocation4 + $0x210] sm:$0xff]  ;;  %v2748_v9 = vld [vmem:[#allocation4 + $0x218] sm:$0xff] }
 0x974   :  { %v2604_v28 = vadd.f32 %v2603_v58, %v2602_v51  ;;  %v2597_v33 = vadd.f32 %v2596_v53, %v2595_v49  ;;  %v2615_v59 = vadd.f32 %v2613_v48, %v2506_v12  ;;  %v2614_v60 = vadd.f32 %v2612_v55, %v2482_v3  ;;  %v2750_v49 = vld [vmem:[#allocation4 + $0x228] sm:$0xff]  ;;  %v2864_v41 = vld [vmem:[#allocation4 + $0x230] sm:$0xff]  ;;  %v2865_v52 = vld [vmem:[#allocation4 + $0x238] sm:$0xff] }
 0x975   :  { %v2574_v11 = vsel %vm714_vm2, %v2571_v50, %v2564_v32  ;;  %v2662_v31 = vpop.permute.xlu0 %2661  ;;  %v4726_v51 = vpack.c.bf16 %v2748_v9, %v2747_v8  ;;  %v4729_v48 = vpack.c.bf16 %v2750_v49, %v2749_v46  ;;  %v4732_v23 = vpack.c.bf16 %v2865_v52, %v2864_v41  ;;  %v2867_v55 = vld [vmem:[#allocation4 + $0x248] sm:$0xff]  ;;  %v2868_v53 = vld [vmem:[#allocation4 + $0x250] sm:$0xff]  ;;  %v2869_v12 = vld [vmem:[#allocation4 + $0x258] sm:$0xff] }
 0x976   :  { %2576 = vst.msk [vmem:[#allocation3 + $0x2] sm:$0x3] %vm717_vm3, %v2574_v11  ;;  %v2605_v56 = vrot.slane %v2604_v28, 1  ;;  %v2598_v14 = vrot.slane %v2597_v33, 1  ;;  %v2627_v38 = vmul.f32 %v2624_v19, %v2615_v59  ;;  %v2626_v4 = vmul.f32 %v2619_v62, %v2614_v60  ;;  %v2870_v50 = vld [vmem:[#allocation4 + $0x260] sm:$0xff]  ;;  %v2871_v32 = vld [vmem:[#allocation4 + $0x268] sm:$0xff] }
 0x977   :  { %4727 = vmatpush3.bf16.msra.mxu1 %v4726_v51  ;;  %v4735_v58 = vpack.c.bf16 %v2867_v55, %v2866_v6  ;;  %v4738_v3 = vpack.c.bf16 %v2869_v12, %v2868_v53  ;;  %v2824_v60 = vld [vmem:[#allocation4 + $0x2b8] sm:$0xf]  ;;  %v4162_v12 = vld [vmem:[#allocation4 + $0x2bd] ss:$0 sm:$0xff] }
 0x978   :  { %v2606_v39 = vadd.f32 %v2605_v56, %v2604_v28  ;;  %v2599_v5 = vadd.f32 %v2598_v14, %v2597_v33  ;;  %v2635_v47 = vsel %vm28_vm1, %v2627_v38, 0.0  ;;  %v2628_v45 = vsel %vm28_vm1, %v2626_v4, 0.0  ;;  %4728 = vmatprep.subr.bf16.mxu1 %v5015_v63 }
 0x979   :  { %v2636_v10 = vrot.slane %v2635_v47, 4  ;;  %v2629_v44 = vrot.slane %v2628_v45, 4  ;;  %v4741_v28 = vpack.c.bf16 %v2871_v32, %v2870_v50  ;;  %v2831_v11 = vrot.slane %v2824_v60, %v5068_v34  ;;  %v3295_v50 = vld [vmem:[#allocation4 + $0x278] sm:$0xff] }
 0x97a   :  { %v2609_v18 = vsel %vm714_vm2, %v2606_v39, %v2599_v5  ;;  %v2837_v56 = vrot.slane %v2824_v60, %v5073_v36  ;;  %v2844_v14 = vrot.slane %v2824_v60, %v5076_v37 }
 0x97b   :  { %2611 = vst.msk [vmem:[#allocation3 + $0x4] sm:$0x3] %vm717_vm3, %v2609_v18  ;;  %v2637_v1 = vadd.f32 %v2636_v10, %v2635_v47  ;;  %v2630_v13 = vadd.f32 %v2629_v44, %v2628_v45  ;;  %4730 = vmatpush3.bf16.msra.mxu1 %v4729_v48  ;;  %v2851_v45 = vrot.slane %v2824_v60, %v5081_v40  ;;  %v3297_v60 = vld [vmem:[#allocation4 + $0x288] sm:$0xff] }
 0x97c   :  { %4743 = vmatprep.subr.bf16.mxu1 %v5015_v63 }
 0x97d   :  { %v2638_v20 = vrot.slane %v2637_v1, 2  ;;  %v2631_v57 = vrot.slane %v2630_v13, 2 }
 0x97f   :  { %v2639_v24 = vadd.f32 %v2638_v20, %v2637_v1  ;;  %v2632_v29 = vadd.f32 %v2631_v57, %v2630_v13  ;;  %v4160_v20 = vld [vmem:[#allocation4 + $0x2bc] ss:$0 sm:$0xff] }
 0x981   :  { %v2640_v42 = vrot.slane %v2639_v24, 1  ;;  %v2633_v54 = vrot.slane %v2632_v29, 1 }
 0x983   :  { %v2641_v2 = vadd.f32 %v2640_v42, %v2639_v24  ;;  %v2634_v19 = vadd.f32 %v2633_v54, %v2632_v29 }
 0x985   :  { %v2644_v62 = vsel %vm714_vm2, %v2641_v2, %v2634_v19 }
 0x986   :  { %2646 = vst.msk [vmem:[#allocation3 + $0x6] sm:$0x3] %vm717_vm3, %v2644_v62 }
 0x98d   :  { %v2647_v30 = vld [vmem:[#allocation3] sm:$0xff] }
 0x98e   :  { %v2654_v15 = vadd.f32 %v2653_v0, %v2647_v30 }
 0x990   :  { %v2664_v35 = vmul.f32 %v2662_v31, %v2654_v15 }
 0x992   :  { %4466 = vmatmul.mubr.msk.f32.vlgmr.msra.gmra.mrb[8].mxu0 %vm28_vm1, %v2664_v35 }
 0x993   :  { %4495 = vmatprep.mubr.msk.f32.mxu0 %vm5016_vm4, %v5013_v17  ;;  %4733 = vmatpush3.bf16.msra.mxu0 %v4732_v23 }
 0x994   :  { %4734 = vmatprep.subr.bf16.mxu0 %v5015_v63 }
 0x997   :  { %4736 = vmatpush3.bf16.msra.mxu0 %v4735_v58 }
 0x998   :  { %4737 = vmatprep.subr.bf16.mxu0 %v5015_v63 }
 0x99b   :  { %4739 = vmatpush3.bf16.msra.mxu0 %v4738_v3  ;;  %v3294_v3 = vld [vmem:[#allocation4 + $0x270] sm:$0xff] }
 0x99c   :  { %4740 = vmatprep.subr.bf16.mxu0 %v5015_v63  ;;  %v4744_v32 = vpack.c.bf16 %v3295_v50, %v3294_v3 }
 0x99f   :  { %4742 = vmatpush3.bf16.msra.mxu0 %v4741_v28 }
 0x9a0   :  { %4755 = vmatprep.subr.bf16.mxu0 %v5015_v63 }
 0xa65   :  { %v2742_v43 = vpop.f32.mrb[8].mxu0 }
 0xa66   :  { %4942 = vtanh.f32 %v2742_v43  ;;  %v4467_v27 = vpop.f32.mrb[9].mxu0 }
 0xa70   :  { %v4943_v7 = vpop.eup %4942 }
 0xa71   :  { %4477 = vmatmul.mubr.msk.f32.vlgmr.msra.gmra.mrb[8].mxu1 %vm59_vm0, %v4943_v7 }
 0xa72   :  { %4514 = vmatprep.mubr.msk.f32.mxu1 %vm5016_vm4, %v5013_v17  ;;  %4745 = vmatpush3.bf16.msra.mxu1 %v4744_v32 }
 0xa73   :  { %4746 = vmatprep.subr.bf16.mxu1 %v5015_v63 }
 0xb44   :  { %v5672_v33 = vpop.f32.mrb[8].mxu1 }
 0xb45   :  { %2826 = vst.msk [vmem:[#allocation2 + $0x8] sm:$0xff] %vm28_vm1, %v5672_v33  ;;  %v4478_v59 = vpop.f32.mrb[9].mxu1  ;;  %v3284_v51 = vmul.f32 0.5, %v5672_v33 }
 0xb46   :  { %v3296_v59 = vld [vmem:[#allocation4 + $0x280] sm:$0xff] }
 0xb4c   :  { %v2827_v38 = vld [vmem:[#allocation2 + $0x8] sm:$0xff] }
 0xb4d   :  { %v2833_v4 = vld [vmem:[#allocation2 + $0x6] sm:$0xff]  ;;  %v2832_v5 = vmul.f32 %v2831_v11, %v2827_v38  ;;  %v4747_v11 = vpack.c.bf16 %v3297_v60, %v3296_v59 }
 0xb4e   :  { %v2840_v39 = vld [vmem:[#allocation2 + $0x4] sm:$0xff]  ;;  %v2838_v47 = vmul.f32 %v2837_v56, %v2833_v4  ;;  %v3298_v56 = vld [vmem:[#allocation4 + $0x290] sm:$0xff] }
 0xb4f   :  { %v2847_v10 = vld [vmem:[#allocation2 + $0x2] sm:$0xff]  ;;  %v2845_v18 = vmul.f32 %v2844_v14, %v2840_v39  ;;  %4748 = vmatpush3.bf16.msra.mxu1 %v4747_v11  ;;  %v3301_v39 = vld [vmem:[#allocation4 + $0x2a8] sm:$0xff] }
 0xb50   :  { %v2839_v44 = vadd.f32 %v2838_v47, %v2832_v5  ;;  %v2852_v13 = vmul.f32 %v2851_v45, %v2847_v10  ;;  %v3299_v14 = vld [vmem:[#allocation4 + $0x298] sm:$0xff]  ;;  %4749 = vmatprep.subr.bf16.mxu1 %v5015_v63 }
 0xb51   :  { %v4750_v4 = vpack.c.bf16 %v3299_v14, %v3298_v56 }
 0xb52   :  { %v2846_v1 = vadd.f32 %v2845_v18, %v2839_v44 }
 0xb53   :  { %4751 = vmatpush3.bf16.msra.mxu1 %v4750_v4 }
 0xb54   :  { %v2853_v57 = vadd.f32 %v2852_v13, %v2846_v1  ;;  %4752 = vmatprep.subr.bf16.mxu1 %v5015_v63 }
 0xb56   :  { %v2858_v24 = vadd.f32 %v4160_v20, %v2853_v57 }
 0xb58   :  { %v2859_v29 = vmul.f32 0.5, %v2858_v24 }
 0xb5a   :  { %4944 = vtanh.f32 %v2859_v29 }
 0xb5b   :  { %4946 = vtanh.f32 %v3284_v51 }
 0xb64   :  { %v4945_v42 = vpop.eup %4944 }
 0xb65   :  { %v2861_v54 = vadd.f32 1.0, %v4945_v42  ;;  %v4947_v7 = vpop.eup %4946 }
 0xb66   :  { %v3286_v6 = vadd.f32 1.0, %v4947_v7 }
 0xb67   :  { %v2862_v2 = vmul.f32 0.5, %v2861_v54 }
 0xb68   :  { %v3287_v58 = vmul.f32 0.5, %v3286_v6 }
 0xb69   :  { %v5680_v19 = vmul.f32 %v2862_v2, %v2858_v24  ;;  %v2961_v24 = vld [vmem:[#allocation4 + $0x2b0] sm:$0xff] }
 0xb6a   :  { %v3288_v53 = vmul.f32 %v3287_v58, %v5672_v33  ;;  %v3300_v33 = vld [vmem:[#allocation4 + $0x2a0] sm:$0xff] }
 0xb6b   :  { %4496 = vmatmul.mubr.msk.f32.vlgmr.msra.gmra.mrb[10].mxu0 %vm28_vm1, %v5680_v19  ;;  %v4753_v47 = vpack.c.bf16 %v3301_v39, %v3300_v33 }
 0xb6c   :  { %4525 = vmatprep.mubr.msk.f32.mxu0 %vm5016_vm4, %v5013_v17 }
 0xb6d   :  { %4754 = vmatpush3.bf16.msra.mxu1 %v4753_v47 }
 0xb6e   :  { %4761 = vmatprep.subr.bf16.mxu1 %v5015_v63 }
 0xc3e   :  { %v2941_v62 = vpop.f32.mrb[10].mxu0 }
 0xc3f   :  { %v4497_v61 = vpop.f32.mrb[11].mxu0  ;;  %v2982_v0 = vrot.slane %v2941_v62, %v5076_v37  ;;  %v2965_v30 = vrot.slane %v2941_v62, %v5081_v40  ;;  %v3030_v15 = vrot.slane %v2941_v62, %v5068_v34  ;;  %v3006_v31 = vrot.slane %v2941_v62, %v5073_v36 }
 0xc40   :  { %v3078_v35 = vrot.slane %v2941_v62, %v5098_v21  ;;  %v3054_v8 = vrot.slane %v2941_v62, %v5101_v22  ;;  %v3126_v9 = vrot.slane %v2941_v62, %v5106_v25  ;;  %v3102_v46 = vrot.slane %v2941_v62, %v5109_v26 }
 0xc41   :  { %2994 = vbcast.lane.b32.xlu0 %v2982_v0, 328  ;;  %2977 = vbcast.lane.b32.xlu1 %v2965_v30, 328  ;;  %v2950_v28 = vadd.f32 %v4162_v12, %v2941_v62 }
 0xc43   :  { %v2952_v38 = vand.u32 2147483647, %v2950_v28  ;;  %v2951_v13 = vmax.f32 %v2950_v28, 0.0 }
 0xc45   :  { %3042 = vbcast.lane.b32.xlu0 %v3030_v15, 328  ;;  %3018 = vbcast.lane.b32.xlu1 %v3006_v31, 328  ;;  %v2953_v5 = vsub.f32 0.0, %v2952_v38 }
 0xc47   :  { %v2954_v45 = vmul.f32 1.442695, %v2953_v5 }
 0xc49   :  { %3090 = vbcast.lane.b32.xlu0 %v3078_v35, 328  ;;  %3066 = vbcast.lane.b32.xlu1 %v3054_v8, 328  ;;  %4948 = vpow2.f32 %v2954_v45 }
 0xc4d   :  { %3138 = vbcast.lane.b32.xlu0 %v3126_v9, 328  ;;  %3114 = vbcast.lane.b32.xlu1 %v3102_v46, 328 }
 0xc51   :  { %2985 = vbcast.lane.b32.xlu0 %v2982_v0, 320  ;;  %2968 = vbcast.lane.b32.xlu1 %v2965_v30, 320 }
 0xc53   :  { %v4949_v10 = vpop.eup %4948 }
 0xc54   :  { %v2956_v44 = vadd.f32 1.0, %v4949_v10 }
 0xc55   :  { %3033 = vbcast.lane.b32.xlu0 %v3030_v15, 320  ;;  %3009 = vbcast.lane.b32.xlu1 %v3006_v31, 320 }
 0xc56   :  { %4950 = vlog2.f32 %v2956_v44 }
 0xc59   :  { %3081 = vbcast.lane.b32.xlu0 %v3078_v35, 320  ;;  %3057 = vbcast.lane.b32.xlu1 %v3054_v8, 320 }
 0xc60   :  { %v4951_v18 = vpop.eup %4950 }
 0xc61   :  { %v2958_v1 = vmul.f32 0.6931472, %v4951_v18 }
 0xc63   :  { %v2959_v20 = vadd.f32 %v2958_v1, %v2951_v13 }
 0xc65   :  { %v3023_v57 = vrot.slane %v2959_v20, %v5068_v34  ;;  %v2999_v29 = vrot.slane %v2959_v20, %v5073_v36  ;;  %v3071_v2 = vrot.slane %v2959_v20, %v5098_v21  ;;  %v3047_v62 = vrot.slane %v2959_v20, %v5101_v22 }
 0xc66   :  { %v5706_v8 = vmul.f32 %v2959_v20, %v5680_v19  ;;  %v3095_v7 = vrot.slane %v2959_v20, %v5109_v26 }
 0xc67   :  { %v3024_v42 = vmul.f32 %v3023_v57, %v2961_v24  ;;  %v3000_v54 = vmul.f32 %v2999_v29, %v2961_v24  ;;  %v3072_v30 = vmul.f32 %v3071_v2, %v2961_v24  ;;  %v3048_v35 = vmul.f32 %v3047_v62, %v2961_v24 }
 0xc68   :  { %v3038_v6 = vrot.slane %v5706_v8, %v5068_v34  ;;  %v3096_v60 = vmul.f32 %v3095_v7, %v2961_v24  ;;  %v3086_v14 = vrot.slane %v5706_v8, %v5098_v21  ;;  %v3062_v38 = vrot.slane %v5706_v8, %v5101_v22 }
 0xc69   :  { %v3025_v61 = vmul.f32 1.442695, %v3024_v42  ;;  %v3001_v0 = vmul.f32 1.442695, %v3000_v54 }
 0xc6a   :  { %v3097_v45 = vmul.f32 1.442695, %v3096_v60 }
 0xc6b   :  { %4952 = vpow2.f32 %v3025_v61 }
 0xc6c   :  { %4954 = vpow2.f32 %v3001_v0 }
 0xcb3   :  { %v2995_v49 = vpop.permute.xlu0 %2994  ;;  %v2978_v48 = vpop.permute.xlu1 %2977 }
 0xcb4   :  { %3147 = vperm.xlu0 %4824, %v2995_v49   ;;  %3142 = vperm.xlu1 %4825, %v2978_v48   ;;  %v2990_v48 = vrot.slane %v5706_v8, %v5076_v37 }
 0xcb7   :  { %v3043_v43 = vpop.permute.xlu0 %3042  ;;  %v3019_v27 = vpop.permute.xlu1 %3018 }
 0xcb8   :  { %3182 = vperm.xlu0 %4824, %v3043_v43   ;;  %3177 = vperm.xlu1 %4825, %v3019_v27   ;;  %v2973_v43 = vrot.slane %v5706_v8, %v5081_v40  ;;  %v3119_v27 = vrot.slane %v2959_v20, %v5106_v25 }
 0xcba   :  { %v3120_v32 = vmul.f32 %v3119_v27, %v2961_v24 }
 0xcbb   :  { %v3091_v41 = vpop.permute.xlu0 %3090  ;;  %v3067_v52 = vpop.permute.xlu1 %3066 }
 0xcbc   :  { %3217 = vperm.xlu0 %4824, %v3091_v41   ;;  %3212 = vperm.xlu1 %4825, %v3067_v52   ;;  %v3121_v33 = vmul.f32 1.442695, %v3120_v32 }
 0xcbf   :  { %v3139_v23 = vpop.permute.xlu0 %3138  ;;  %v3115_v55 = vpop.permute.xlu1 %3114 }
 0xcc0   :  { %3252 = vperm.xlu0 %4824, %v3139_v23   ;;  %3247 = vperm.xlu1 %4825, %v3115_v55   ;;  %v3014_v23 = vrot.slane %v5706_v8, %v5073_v36  ;;  %v4953_v55 = vpop.eup %4952 }
 0xcc1   :  { %v4955_v12 = vpop.eup %4954 }
 0xcc3   :  { %v2986_v15 = vpop.permute.xlu0 %2985  ;;  %v2969_v31 = vpop.permute.xlu1 %2968 }
 0xcc4   :  { %3129 = vbcast.lane.b32.xlu0 %v3126_v9, 320  ;;  %3105 = vbcast.lane.b32.xlu1 %v3102_v46, 320  ;;  %v3073_v9 = vmul.f32 1.442695, %v3072_v30  ;;  %v3049_v46 = vmul.f32 1.442695, %v3048_v35  ;;  %v2991_v41 = vmul.f32 %v2990_v48, %v2986_v15  ;;  %v2974_v52 = vmul.f32 %v2973_v43, %v2969_v31 }
 0xcc6   :  { %4956 = vpow2.f32 %v3073_v9  ;;  %v3172_v28 = vmul.f32 %v4953_v55, %v2991_v41  ;;  %v3171_v59 = vmul.f32 %v4955_v12, %v2974_v52 }
 0xcc7   :  { %v3034_v51 = vpop.permute.xlu0 %3033  ;;  %v3010_v49 = vpop.permute.xlu1 %3009  ;;  %4958 = vpow2.f32 %v3049_v46 }
 0xcc8   :  { %3290 = vrot.lane.b32.xlu1 %v3288_v53, %s5014_s0  ;;  %v3039_v58 = vmul.f32 %v3038_v6, %v3034_v51  ;;  %v3015_v53 = vmul.f32 %v3014_v23, %v3010_v49  ;;  %4960 = vpow2.f32 %v3121_v33 }
 0xcc9   :  { %4962 = vpow2.f32 %v3097_v45 }
 0xcca   :  { %v3174_v11 = vadd.f32 %v3172_v28, %v3039_v58  ;;  %v3173_v56 = vadd.f32 %v3171_v59, %v3015_v53  ;;  %v3134_v59 = vrot.slane %v5706_v8, %v5106_v25 }
 0xccb   :  { %v3082_v3 = vpop.permute.xlu0 %3081  ;;  %v3058_v50 = vpop.permute.xlu1 %3057 }
 0xccc   :  { %v3087_v44 = vmul.f32 %v3086_v14, %v3082_v3  ;;  %v3063_v18 = vmul.f32 %v3062_v38, %v3058_v50 }
 0xcd0   :  { %v4957_v39 = vpop.eup %4956 }
 0xcd1   :  { %v4959_v10 = vpop.eup %4958  ;;  %v3207_v20 = vmul.f32 %v4957_v39, %v3174_v11 }
 0xcd2   :  { %v3206_v57 = vmul.f32 %v4959_v10, %v3173_v56  ;;  %v4961_v60 = vpop.eup %4960 }
 0xcd3   :  { %v3209_v30 = vadd.f32 %v3207_v20, %v3087_v44 }
 0xcd4   :  { %v3208_v15 = vadd.f32 %v3206_v57, %v3063_v18 }
 0xcd5   :  { %v3242_v39 = vmul.f32 %v4961_v60, %v3209_v30  ;;  %v3412_v60 = vld [vmem:[#allocation4 + $0x2d0] sm:$0xff] }
 0xd33   :  { %v3148_v4 = vpop.permute.xlu0 %3147  ;;  %v3143_v36 = vpop.permute.xlu1 %3142 }
 0xd34   :  { %v3151_v5 = vmul.f32 %v3148_v4, %v2991_v41  ;;  %v3150_v47 = vmul.f32 %v3143_v36, %v2974_v52  ;;  %v4963_v4 = vpop.eup %4962 }
 0xd36   :  { %v3159_v1 = vsel %vm28_vm1, %v3151_v5, 0.0  ;;  %v3152_v13 = vsel %vm28_vm1, %v3150_v47, 0.0  ;;  %v3110_v5 = vrot.slane %v5706_v8, %v5109_v26 }
 0xd37   :  { %v3160_v21 = vrot.slane %v3159_v1, 4  ;;  %v3153_v24 = vrot.slane %v3152_v13, 4  ;;  %v3183_v29 = vpop.permute.xlu0 %3182  ;;  %v3178_v22 = vpop.permute.xlu1 %3177 }
 0xd38   :  { %v3186_v42 = vmul.f32 %v3183_v29, %v3174_v11  ;;  %v3185_v54 = vmul.f32 %v3178_v22, %v3173_v56 }
 0xd39   :  { %v3161_v2 = vadd.f32 %v3160_v21, %v3159_v1  ;;  %v3154_v62 = vadd.f32 %v3153_v24, %v3152_v13  ;;  %v3241_v1 = vmul.f32 %v4963_v4, %v3208_v15 }
 0xd3a   :  { %v3194_v61 = vsel %vm28_vm1, %v3186_v42, 0.0  ;;  %v3187_v0 = vsel %vm28_vm1, %v3185_v54, 0.0 }
 0xd3b   :  { %v3162_v31 = vrot.slane %v3161_v2, 2  ;;  %v3155_v35 = vrot.slane %v3154_v62, 2  ;;  %v3195_v9 = vrot.slane %v3194_v61, 4  ;;  %v3188_v46 = vrot.slane %v3187_v0, 4  ;;  %v3218_v51 = vpop.permute.xlu0 %3217  ;;  %v3213_v49 = vpop.permute.xlu1 %3212 }
 0xd3c   :  { %v3221_v48 = vmul.f32 %v3218_v51, %v3209_v30  ;;  %v3220_v43 = vmul.f32 %v3213_v49, %v3208_v15 }
 0xd3d   :  { %v3163_v27 = vadd.f32 %v3162_v31, %v3161_v2  ;;  %v3156_v7 = vadd.f32 %v3155_v35, %v3154_v62  ;;  %v3196_v41 = vadd.f32 %v3195_v9, %v3194_v61  ;;  %v3189_v52 = vadd.f32 %v3188_v46, %v3187_v0 }
 0xd3e   :  { %v3229_v6 = vsel %vm28_vm1, %v3221_v48, 0.0  ;;  %v3222_v23 = vsel %vm28_vm1, %v3220_v43, 0.0 }
 0xd3f   :  { %v3164_v55 = vrot.slane %v3163_v27, 1  ;;  %v3157_v58 = vrot.slane %v3156_v7, 1  ;;  %v3197_v53 = vrot.slane %v3196_v41, 2  ;;  %v3190_v12 = vrot.slane %v3189_v52, 2  ;;  %v3253_v3 = vpop.permute.xlu0 %3252  ;;  %v3248_v50 = vpop.permute.xlu1 %3247 }
 0xd40   :  { %v3230_v32 = vrot.slane %v3229_v6, 4  ;;  %v3223_v28 = vrot.slane %v3222_v23, 4 }
 0xd41   :  { %v3165_v11 = vadd.f32 %v3164_v55, %v3163_v27  ;;  %v3158_v56 = vadd.f32 %v3157_v58, %v3156_v7  ;;  %v3198_v14 = vadd.f32 %v3197_v53, %v3196_v41  ;;  %v3191_v38 = vadd.f32 %v3190_v12, %v3189_v52  ;;  %v4163_v58 = vld [vmem:[#allocation4 + $0x2be] ss:$0 sm:$0xff] }
 0xd42   :  { %v3231_v36 = vadd.f32 %v3230_v32, %v3229_v6  ;;  %v3224_v33 = vadd.f32 %v3223_v28, %v3222_v23  ;;  %v3282_v53 = vmul.f32 %v4163_v58, %v5680_v19  ;;  %v3410_v28 = vld [vmem:[#allocation4 + $0x2c0] sm:$0xff] }
 0xd43   :  { %v3168_v47 = vsel %vm714_vm2, %v3165_v11, %v3158_v56  ;;  %v3199_v45 = vrot.slane %v3198_v14, 1  ;;  %v3192_v10 = vrot.slane %v3191_v38, 1  ;;  %v3130_v44 = vpop.permute.xlu0 %3129  ;;  %v3106_v18 = vpop.permute.xlu1 %3105  ;;  %v3413_v56 = vld [vmem:[#allocation4 + $0x2d8] sm:$0xff]  ;;  %v3684_v58 = vld [vmem:[#allocation4 + $0x320] sm:$0xff] }
 0xd44   :  { %3170 = vst.msk [vmem:[#allocation3] sm:$0x3] %vm717_vm3, %v3168_v47  ;;  %v3232_v25 = vrot.slane %v3231_v36, 2  ;;  %v3225_v13 = vrot.slane %v3224_v33, 2  ;;  %v3135_v20 = vmul.f32 %v3134_v59, %v3130_v44  ;;  %v3111_v57 = vmul.f32 %v3110_v5, %v3106_v18  ;;  %v3411_v59 = vld [vmem:[#allocation4 + $0x2c8] sm:$0xff] }
 0xd45   :  { %v3200_v21 = vadd.f32 %v3199_v45, %v3198_v14  ;;  %v3193_v24 = vadd.f32 %v3192_v10, %v3191_v38  ;;  %v4756_v11 = vpack.c.bf16 %v3411_v59, %v3410_v28  ;;  %v4759_v14 = vpack.c.bf16 %v3413_v56, %v3412_v60  ;;  %v3688_v28 = vld [vmem:[#allocation4 + $0x340] sm:$0xff]  ;;  %v3689_v59 = vld [vmem:[#allocation4 + $0x348] sm:$0xff]  ;;  %v3691_v56 = vld [vmem:[#allocation4 + $0x358] sm:$0xff] }
 0xd46   :  { %v3233_v29 = vadd.f32 %v3232_v25, %v3231_v36  ;;  %v3226_v22 = vadd.f32 %v3225_v13, %v3224_v33  ;;  %v3244_v42 = vadd.f32 %v3242_v39, %v3135_v20  ;;  %v3243_v54 = vadd.f32 %v3241_v1, %v3111_v57  ;;  %v3504_v1 = vld [vmem:[#allocation4 + $0x2e0] sm:$0xff]  ;;  %v3505_v25 = vld [vmem:[#allocation4 + $0x2e8] sm:$0xff]  ;;  %v3506_v20 = vld [vmem:[#allocation4 + $0x2f0] sm:$0xff] }
 0xd47   :  { %v3203_v26 = vsel %vm714_vm2, %v3200_v21, %v3193_v24  ;;  %4757 = vmatpush3.bf16.msra.mxu0 %v4756_v11  ;;  %v3406_v45 = vmul.f32 0.125, %v5608_v16  ;;  %v4762_v13 = vpack.c.bf16 %v3505_v25, %v3504_v1  ;;  %v3507_v57 = vld [vmem:[#allocation4 + $0x2f8] sm:$0xff]  ;;  %v3508_v24 = vld [vmem:[#allocation4 + $0x300] sm:$0xff]  ;;  %v3509_v16 = vld [vmem:[#allocation4 + $0x308] sm:$0xff]  ;;  %v4780_v60 = vpack.c.bf16 %v3689_v59, %v3688_v28 }
 0xd48   :  { %3205 = vst.msk [vmem:[#allocation3 + $0x2] sm:$0x3] %vm717_vm3, %v3203_v26  ;;  %v3234_v8 = vrot.slane %v3233_v29, 1  ;;  %v3227_v2 = vrot.slane %v3226_v22, 1  ;;  %v3256_v62 = vmul.f32 %v3253_v3, %v3244_v42  ;;  %v3255_v61 = vmul.f32 %v3248_v50, %v3243_v54  ;;  %v3291_v50 = vpop.permute.xlu1 %3290  ;;  %4758 = vmatprep.subr.bf16.mxu0 %v5015_v63  ;;  %v3511_v42 = vld [vmem:[#allocation4 + $0x318] sm:$0xff]  ;;  %v3690_v11 = vld [vmem:[#allocation4 + $0x350] sm:$0xff] }
 0xd49   :  { %v4765_v21 = vpack.c.bf16 %v3507_v57, %v3506_v20  ;;  %v3487_v26 = vld [vmem:[#allocation4 + $0x368] sm:$0xf]  ;;  %v3861_v28 = vld [vmem:[#allocation4 + $0x398] sm:$0xff] }
 0xd4a   :  { %v3235_v0 = vadd.f32 %v3234_v8, %v3233_v29  ;;  %v3228_v30 = vadd.f32 %v3227_v2, %v3226_v22  ;;  %v3264_v15 = vsel %vm28_vm1, %v3256_v62, 0.0  ;;  %v3257_v31 = vsel %vm28_vm1, %v3255_v61, 0.0  ;;  %v3510_v22 = vld [vmem:[#allocation4 + $0x310] sm:$0xff]  ;;  %v4166_v62 = vld [vmem:[#allocation4 + $0x36c] ss:$0 sm:$0xff] }
 0xd4b   :  { %v3265_v35 = vrot.slane %v3264_v15, 4  ;;  %v3258_v9 = vrot.slane %v3257_v31, 4  ;;  %4760 = vmatpush3.bf16.msra.mxu0 %v4759_v14  ;;  %v4768_v29 = vpack.c.bf16 %v3509_v16, %v3508_v24  ;;  %v4771_v54 = vpack.c.bf16 %v3511_v42, %v3510_v22 }
 0xd4c   :  { %v3238_v46 = vsel %vm714_vm2, %v3235_v0, %v3228_v30  ;;  %4773 = vmatprep.subr.bf16.mxu0 %v5015_v63  ;;  %v3492_v8 = vrot.slane %v3487_v26, %v5068_v34  ;;  %v4783_v14 = vpack.c.bf16 %v3691_v56, %v3690_v11  ;;  %v3863_v11 = vld [vmem:[#allocation4 + $0x3a8] sm:$0xff] }
 0xd4d   :  { %3240 = vst.msk [vmem:[#allocation3 + $0x4] sm:$0x3] %vm717_vm3, %v3238_v46  ;;  %v3266_v51 = vadd.f32 %v3265_v35, %v3264_v15  ;;  %v3259_v49 = vadd.f32 %v3258_v9, %v3257_v31 }
 0xd4f   :  { %v3267_v48 = vrot.slane %v3266_v51, 2  ;;  %v3260_v43 = vrot.slane %v3259_v49, 2 }
 0xd51   :  { %v3268_v27 = vadd.f32 %v3267_v48, %v3266_v51  ;;  %v3261_v7 = vadd.f32 %v3260_v43, %v3259_v49 }
 0xd53   :  { %v3269_v41 = vrot.slane %v3268_v27, 1  ;;  %v3262_v52 = vrot.slane %v3261_v7, 1 }
 0xd55   :  { %v3270_v6 = vadd.f32 %v3269_v41, %v3268_v27  ;;  %v3263_v23 = vadd.f32 %v3262_v52, %v3261_v7 }
 0xd57   :  { %v3273_v55 = vsel %vm714_vm2, %v3270_v6, %v3263_v23 }
 0xd58   :  { %3275 = vst.msk [vmem:[#allocation3 + $0x6] sm:$0x3] %vm717_vm3, %v3273_v55 }
 0xd5f   :  { %v3276_v12 = vld [vmem:[#allocation3] sm:$0xff] }
 0xd60   :  { %v3283_v3 = vadd.f32 %v3282_v53, %v3276_v12  ;;  %v3685_v53 = vld [vmem:[#allocation4 + $0x328] sm:$0xff] }
 0xd61   :  { %v4774_v12 = vpack.c.bf16 %v3685_v53, %v3684_v58  ;;  %v3769_v53 = vld [vmem:[#allocation4 + $0x388] sm:$0xff] }
 0xd62   :  { %v3293_v32 = vmul.f32 %v3291_v50, %v3283_v3  ;;  %v3686_v3 = vld [vmem:[#allocation4 + $0x330] sm:$0xff]  ;;  %v3687_v50 = vld [vmem:[#allocation4 + $0x338] sm:$0xff] }
 0xd64   :  { %4515 = vmatmul.mubr.msk.f32.vlgmr.msra.gmra.mrb[10].mxu1 %vm28_vm1, %v3293_v32  ;;  %v4777_v32 = vpack.c.bf16 %v3687_v50, %v3686_v3 }
 0xd65   :  { %4544 = vmatprep.mubr.msk.f32.mxu1 %vm5016_vm4, %v5013_v17  ;;  %4763 = vmatpush3.bf16.msra.mxu1 %v4762_v13 }
 0xd66   :  { %4764 = vmatprep.subr.bf16.mxu1 %v5015_v63 }
 0xd69   :  { %4766 = vmatpush3.bf16.msra.mxu1 %v4765_v21 }
 0xd6a   :  { %4767 = vmatprep.subr.bf16.mxu1 %v5015_v63 }
 0xd6d   :  { %4769 = vmatpush3.bf16.msra.mxu1 %v4768_v29 }
 0xd6e   :  { %4770 = vmatprep.subr.bf16.mxu1 %v5015_v63 }
 0xd71   :  { %4772 = vmatpush3.bf16.msra.mxu1 %v4771_v54 }
 0xd72   :  { %4785 = vmatprep.subr.bf16.mxu1 %v5015_v63 }
 0xe37   :  { %v3371_v19 = vpop.f32.mrb[10].mxu1 }
 0xe38   :  { %v3397_v38 = vrot.slane %v3371_v19, 2  ;;  %v4516_v4 = vpop.f32.mrb[11].mxu1  ;;  %v3400_v33 = vrot.slane %v3371_v19, 4  ;;  %v3403_v5 = vrot.slane %v3371_v19, 6 }
 0xe3a   :  { %v3399_v36 = vadd.f32 %v3397_v38, %v3371_v19  ;;  %v4168_v19 = vld [vmem:[#allocation4 + $0x36d] ss:$0 sm:$0xff] }
 0xe3c   :  { %v3402_v39 = vadd.f32 %v3400_v33, %v3399_v36 }
 0xe3e   :  { %v3405_v47 = vadd.f32 %v3403_v5, %v3402_v39 }
 0xe40   :  { %v3407_v10 = vmul.f32 0.25, %v3405_v47 }
 0xe42   :  { %v3408_v44 = vadd.f32 %v3407_v10, %v3406_v45 }
 0xe44   :  { %4964 = vtanh.f32 %v3408_v44 }
 0xe4e   :  { %v4965_v18 = vpop.eup %4964 }
 0xe4f   :  { %4526 = vmatmul.mubr.msk.f32.vlgmr.msra.gmra.mrb[12].mxu0 %vm59_vm0, %v4965_v18 }
 0xe50   :  { %4563 = vmatprep.mubr.msk.f32.mxu0 %vm5016_vm4, %v5013_v17  ;;  %4775 = vmatpush3.bf16.msra.mxu0 %v4774_v12 }
 0xe51   :  { %4776 = vmatprep.subr.bf16.mxu0 %v5015_v63 }
 0xe54   :  { %4778 = vmatpush3.bf16.msra.mxu0 %v4777_v32  ;;  %v3860_v32 = vld [vmem:[#allocation4 + $0x390] sm:$0xff] }
 0xe55   :  { %4779 = vmatprep.subr.bf16.mxu0 %v5015_v63  ;;  %v4792_v59 = vpack.c.bf16 %v3861_v28, %v3860_v32 }
 0xe58   :  { %4781 = vmatpush3.bf16.msra.mxu0 %v4780_v60  ;;  %v3862_v60 = vld [vmem:[#allocation4 + $0x3a0] sm:$0xff] }
 0xe59   :  { %4782 = vmatprep.subr.bf16.mxu0 %v5015_v63  ;;  %v4795_v56 = vpack.c.bf16 %v3863_v11, %v3862_v60 }
 0xe5c   :  { %4784 = vmatpush3.bf16.msra.mxu0 %v4783_v14  ;;  %v3864_v14 = vld [vmem:[#allocation4 + $0x3b0] sm:$0xff] }
 0xe5d   :  { %4791 = vmatprep.subr.bf16.mxu0 %v5015_v63 }
 0xf22   :  { %v3483_v2 = vpop.f32.mrb[12].mxu0 }
 0xf23   :  { %v3493_v61 = vmul.f32 %v3492_v8, %v3483_v2  ;;  %v4527_v0 = vpop.f32.mrb[13].mxu0  ;;  %v3674_v27 = vmul.f32 0.5, %v3483_v2 }
 0xf25   :  { %v3498_v30 = vadd.f32 %v4166_v62, %v3493_v61 }
 0xf27   :  { %v3499_v15 = vmul.f32 0.5, %v3498_v30 }
 0xf29   :  { %4966 = vtanh.f32 %v3499_v15 }
 0xf2a   :  { %4968 = vtanh.f32 %v3674_v27 }
 0xf33   :  { %v4967_v31 = vpop.eup %4966 }
 0xf34   :  { %v3501_v35 = vadd.f32 1.0, %v4967_v31  ;;  %v4969_v7 = vpop.eup %4968 }
 0xf35   :  { %v3676_v41 = vadd.f32 1.0, %v4969_v7 }
 0xf36   :  { %v3502_v9 = vmul.f32 0.5, %v3501_v35 }
 0xf37   :  { %v3677_v23 = vmul.f32 0.5, %v3676_v41 }
 0xf38   :  { %v5757_v46 = vmul.f32 %v3502_v9, %v3498_v30 }
 0xf39   :  { %v3678_v55 = vmul.f32 %v3677_v23, %v3483_v2  ;;  %v3767_v23 = vld [vmem:[#allocation4 + $0x378] sm:$0xff] }
 0xf3a   :  { %4545 = vmatmul.mubr.msk.f32.vlgmr.msra.gmra.mrb[12].mxu1 %vm28_vm1, %v5757_v46 }
 0xf3b   :  { %4574 = vmatprep.mubr.msk.f32.mxu1 %vm5016_vm4, %v5013_v17 }
0x100d   :  { %v3581_v51 = vpop.f32.mrb[12].mxu1 }
0x100e   :  { %v3604_v49 = vrot.slane %v3581_v51, %v5081_v40  ;;  %v3621_v48 = vrot.slane %v3581_v51, %v5076_v37  ;;  %v4546_v43 = vpop.f32.mrb[13].mxu1  ;;  %v3590_v38 = vadd.f32 %v4168_v19, %v3581_v51  ;;  %v3865_v19 = vld [vmem:[#allocation4 + $0x3b8] sm:$0xff] }
0x1010   :  { %3633 = vbcast.lane.b32.xlu1 %v3621_v48, 328  ;;  %3616 = vbcast.lane.b32.xlu0 %v3604_v49, 328  ;;  %v3592_v4 = vand.u32 2147483647, %v3590_v38  ;;  %v3591_v10 = vmax.f32 %v3590_v38, 0.0  ;;  %v4798_v38 = vpack.c.bf16 %v3865_v19, %v3864_v14 }
0x1012   :  { %v3593_v36 = vsub.f32 0.0, %v3592_v4  ;;  %v3866_v4 = vld [vmem:[#allocation4 + $0x3c0] sm:$0xff] }
0x1014   :  { %v3594_v33 = vmul.f32 1.442695, %v3593_v36  ;;  %v3867_v36 = vld [vmem:[#allocation4 + $0x3c8] sm:$0xff] }
0x1016   :  { %4970 = vpow2.f32 %v3594_v33  ;;  %v4801_v33 = vpack.c.bf16 %v3867_v36, %v3866_v4 }
0x1020   :  { %v4971_v39 = vpop.eup %4970 }
0x1021   :  { %v3596_v5 = vadd.f32 1.0, %v4971_v39 }
0x1023   :  { %4972 = vlog2.f32 %v3596_v5 }
0x102d   :  { %v4973_v47 = vpop.eup %4972 }
0x102e   :  { %v3598_v45 = vmul.f32 0.6931472, %v4973_v47  ;;  %v4172_v47 = vld [vmem:[#allocation4 + $0x41c] ss:$0 sm:$0xff] }
0x1030   :  { %v3599_v44 = vadd.f32 %v3598_v45, %v3591_v10 }
0x1032   :  { %v3600_v18 = vmul.f32 %v3599_v44, %v5757_v46 }
0x1034   :  { %v3629_v13 = vrot.slane %v3600_v18, %v5076_v37  ;;  %v3612_v20 = vrot.slane %v3600_v18, %v5081_v40 }
0x1082   :  { %v3634_v52 = vpop.permute.xlu1 %3633  ;;  %v3617_v6 = vpop.permute.xlu0 %3616 }
0x1083   :  { %3642 = vperm.xlu1 %4825, %v3634_v52   ;;  %3637 = vperm.xlu0 %4824, %v3617_v6   ;;  %v3766_v6 = vld [vmem:[#allocation4 + $0x370] sm:$0xff] }
0x1084   :  { %v4786_v58 = vpack.c.bf16 %v3767_v23, %v3766_v6 }
0x1086   :  { %4787 = vmatpush3.bf16.msra.mxu1 %v4786_v58 }
0x1087   :  { %3624 = vbcast.lane.b32.xlu1 %v3621_v48, 320  ;;  %3607 = vbcast.lane.b32.xlu0 %v3604_v49, 320  ;;  %v4169_v48 = vld [vmem:[#allocation4 + $0x36e] ss:$0 sm:$0xff] }
0x1088   :  { %v3672_v43 = vmul.f32 %v4169_v48, %v5757_v46  ;;  %4788 = vmatprep.subr.bf16.mxu1 %v5015_v63 }
0x108b   :  { %3680 = vrot.lane.b32.xlu0 %v3678_v55, %s5014_s0  ;;  %v3768_v55 = vld [vmem:[#allocation4 + $0x380] sm:$0xff] }
0x108c   :  { %v4789_v12 = vpack.c.bf16 %v3769_v53, %v3768_v55 }
0x108e   :  { %4790 = vmatpush3.bf16.msra.mxu1 %v4789_v12 }
0x108f   :  { %4803 = vmatprep.subr.bf16.mxu1 %v5015_v63 }
0x1102   :  { %v3643_v1 = vpop.permute.xlu1 %3642  ;;  %v3638_v25 = vpop.permute.xlu0 %3637 }
0x1106   :  { %v3625_v57 = vpop.permute.xlu1 %3624  ;;  %v3608_v21 = vpop.permute.xlu0 %3607 }
0x1107   :  { %v3630_v24 = vmul.f32 %v3629_v13, %v3625_v57  ;;  %v3613_v16 = vmul.f32 %v3612_v20, %v3608_v21 }
0x1109   :  { %v3646_v29 = vmul.f32 %v3643_v1, %v3630_v24  ;;  %v3645_v22 = vmul.f32 %v3638_v25, %v3613_v16 }
0x110a   :  { %v3681_v41 = vpop.permute.xlu0 %3680 }
0x110b   :  { %v3654_v42 = vsel %vm28_vm1, %v3646_v29, 0.0  ;;  %v3647_v54 = vsel %vm28_vm1, %v3645_v22, 0.0 }
0x110c   :  { %v3655_v26 = vrot.slane %v3654_v42, 4  ;;  %v3648_v8 = vrot.slane %v3647_v54, 4 }
0x110e   :  { %v3656_v2 = vadd.f32 %v3655_v26, %v3654_v42  ;;  %v3649_v62 = vadd.f32 %v3648_v8, %v3647_v54 }
0x1110   :  { %v3657_v61 = vrot.slane %v3656_v2, 2  ;;  %v3650_v0 = vrot.slane %v3649_v62, 2 }
0x1112   :  { %v3658_v30 = vadd.f32 %v3657_v61, %v3656_v2  ;;  %v3651_v15 = vadd.f32 %v3650_v0, %v3649_v62  ;;  %v4040_v2 = vld [vmem:[#allocation4 + $0x3d0] sm:$0xff]  ;;  %v4041_v62 = vld [vmem:[#allocation4 + $0x3d8] sm:$0xff]  ;;  %v4042_v0 = vld [vmem:[#allocation4 + $0x3e0] sm:$0xff] }
0x1113   :  { %v4804_v61 = vpack.c.bf16 %v4041_v62, %v4040_v2 }
0x1114   :  { %v3659_v31 = vrot.slane %v3658_v30, 1  ;;  %v3652_v35 = vrot.slane %v3651_v15, 1 }
0x1116   :  { %v3660_v9 = vadd.f32 %v3659_v31, %v3658_v30  ;;  %v3653_v51 = vadd.f32 %v3652_v35, %v3651_v15  ;;  %v4043_v30 = vld [vmem:[#allocation4 + $0x3e8] sm:$0xff]  ;;  %v4044_v31 = vld [vmem:[#allocation4 + $0x3f0] sm:$0xff]  ;;  %v4045_v35 = vld [vmem:[#allocation4 + $0x3f8] sm:$0xff] }
0x1117   :  { %v4807_v15 = vpack.c.bf16 %v4043_v30, %v4042_v0 }
0x1118   :  { %v3663_v49 = vsel %vm714_vm2, %v3660_v9, %v3653_v51  ;;  %v4810_v9 = vpack.c.bf16 %v4045_v35, %v4044_v31  ;;  %v4046_v51 = vld [vmem:[#allocation4 + $0x400] sm:$0xff] }
0x1119   :  { %3665 = vst.msk [vmem:[#allocation3] sm:$0x3] %vm717_vm3, %v3663_v49  ;;  %v4047_v49 = vld [vmem:[#allocation4 + $0x408] sm:$0xff] }
0x111a   :  { %v4813_v48 = vpack.c.bf16 %v4047_v49, %v4046_v51 }
0x1120   :  { %v3666_v27 = vld [vmem:[#allocation3] sm:$0x3] }
0x1121   :  { %v3673_v7 = vadd.f32 %v3672_v43, %v3666_v27  ;;  %v4174_v43 = vld [vmem:[#allocation4 + $0x41d] ss:$0 sm:$0xff] }
0x1123   :  { %v3683_v52 = vmul.f32 %v3681_v41, %v3673_v7 }
0x1125   :  { %4564 = vmatmul.mubr.msk.f32.vlgmr.msra.gmra.mrb[14].mxu0 %vm28_vm1, %v3683_v52 }
0x1126   :  { %4593 = vmatprep.mubr.msk.f32.mxu0 %vm5016_vm4, %v5013_v17  ;;  %4793 = vmatpush3.bf16.msra.mxu0 %v4792_v59 }
0x1127   :  { %4794 = vmatprep.subr.bf16.mxu0 %v5015_v63 }
0x112a   :  { %4796 = vmatpush3.bf16.msra.mxu0 %v4795_v56 }
0x112b   :  { %4797 = vmatprep.subr.bf16.mxu0 %v5015_v63 }
0x112e   :  { %4799 = vmatpush3.bf16.msra.mxu0 %v4798_v38 }
0x112f   :  { %4800 = vmatprep.subr.bf16.mxu0 %v5015_v63 }
0x1132   :  { %4802 = vmatpush3.bf16.msra.mxu0 %v4801_v33 }
0x11f8   :  { %v3761_v46 = vpop.f32.mrb[14].mxu0 }
0x11f9   :  { %4974 = vtanh.f32 %v3761_v46  ;;  %v4565_v3 = vpop.f32.mrb[15].mxu0 }
0x1203   :  { %v4975_v50 = vpop.eup %4974 }
0x1204   :  { %4575 = vmatmul.mubr.msk.f32.vlgmr.msra.gmra.mrb[14].mxu1 %vm59_vm0, %v4975_v50 }
0x1205   :  { %4612 = vmatprep.mubr.msk.f32.mxu1 %vm5016_vm4, %v5013_v17  ;;  %v3843_v17 = vld [vmem:[#allocation4 + $0x418] sm:$0xf]  ;;  %4805 = vmatpush3.bf16.msra.mxu1 %v4804_v61 }
0x1206   :  { %v3848_v39 = vrot.slane %v3843_v17, %v5068_v34  ;;  %4806 = vmatprep.subr.bf16.mxu1 %v5015_v63 }
0x1209   :  { %4808 = vmatpush3.bf16.msra.mxu1 %v4807_v15 }
0x120a   :  { %4809 = vmatprep.subr.bf16.mxu1 %v5015_v63 }
0x120d   :  { %4811 = vmatpush3.bf16.msra.mxu1 %v4810_v9 }
0x120e   :  { %4812 = vmatprep.subr.bf16.mxu1 %v5015_v63 }
0x1211   :  { %4814 = vmatpush3.bf16.msra.mxu1 %v4813_v48 }
0x12d7   :  { %v3839_v5 = vpop.f32.mrb[14].mxu1 }
0x12d8   :  { %v3849_v45 = vmul.f32 %v3848_v39, %v3839_v5  ;;  %v4576_v10 = vpop.f32.mrb[15].mxu1  ;;  %v4030_v16 = vmul.f32 0.5, %v3839_v5 }
0x12da   :  { %v3854_v44 = vadd.f32 %v4172_v47, %v3849_v45 }
0x12dc   :  { %v3855_v18 = vmul.f32 0.5, %v3854_v44 }
0x12de   :  { %4976 = vtanh.f32 %v3855_v18 }
0x12df   :  { %4978 = vtanh.f32 %v4030_v16 }
0x12e8   :  { %v4977_v1 = vpop.eup %4976 }
0x12e9   :  { %v3857_v25 = vadd.f32 1.0, %v4977_v1  ;;  %v4979_v29 = vpop.eup %4978  ;;  %v4175_v1 = vld [vmem:[#allocation4 + $0x41e] ss:$0 sm:$0xff] }
0x12ea   :  { %v4032_v22 = vadd.f32 1.0, %v4979_v29 }
0x12eb   :  { %v3858_v13 = vmul.f32 0.5, %v3857_v25 }
0x12ec   :  { %v4033_v26 = vmul.f32 0.5, %v4032_v22 }
0x12ed   :  { %v5790_v20 = vmul.f32 %v3858_v13, %v3854_v44 }
0x12ee   :  { %v4034_v8 = vmul.f32 %v4033_v26, %v3839_v5 }
0x12ef   :  { %4594 = vmatmul.mubr.msk.f32.vlgmr.msra.gmra.mrb[16].mxu0 %vm28_vm1, %v5790_v20  ;;  %v4028_v25 = vmul.f32 %v4175_v1, %v5790_v20 }
0x13c2   :  { %v3937_v57 = vpop.f32.mrb[16].mxu0 }
0x13c3   :  { %v3960_v21 = vrot.slane %v3937_v57, %v5081_v40  ;;  %v3977_v34 = vrot.slane %v3937_v57, %v5076_v37  ;;  %v4595_v24 = vpop.f32.mrb[17].mxu0  ;;  %v3946_v27 = vadd.f32 %v4174_v43, %v3937_v57 }
0x13c5   :  { %3989 = vbcast.lane.b32.xlu0 %v3977_v34, 328  ;;  %3972 = vbcast.lane.b32.xlu1 %v3960_v21, 328  ;;  %v3948_v7 = vand.u32 2147483647, %v3946_v27  ;;  %v3947_v53 = vmax.f32 %v3946_v27, 0.0 }
0x13c7   :  { %v3949_v41 = vsub.f32 0.0, %v3948_v7 }
0x13c9   :  { %v3950_v52 = vmul.f32 1.442695, %v3949_v41 }
0x13cb   :  { %4980 = vpow2.f32 %v3950_v52 }
0x13d5   :  { %v4981_v6 = vpop.eup %4980 }
0x13d6   :  { %v3952_v23 = vadd.f32 1.0, %v4981_v6 }
0x13d8   :  { %4982 = vlog2.f32 %v3952_v23 }
0x13e2   :  { %v4983_v55 = vpop.eup %4982 }
0x13e3   :  { %v3954_v58 = vmul.f32 0.6931472, %v4983_v55 }
0x13e5   :  { %v3955_v12 = vadd.f32 %v3954_v58, %v3947_v53 }
0x13e7   :  { %v3956_v46 = vmul.f32 %v3955_v12, %v5790_v20 }
0x13e9   :  { %v3985_v63 = vrot.slane %v3956_v46, %v5076_v37  ;;  %v3968_v32 = vrot.slane %v3956_v46, %v5081_v40 }
0x1437   :  { %v3990_v42 = vpop.permute.xlu0 %3989  ;;  %v3973_v54 = vpop.permute.xlu1 %3972 }
0x1438   :  { %3998 = vperm.xlu0 %4824, %v3990_v42   ;;  %3993 = vperm.xlu1 %4825, %v3973_v54  }
0x143c   :  { %3980 = vbcast.lane.b32.xlu0 %v3977_v34, 320  ;;  %3963 = vbcast.lane.b32.xlu1 %v3960_v21, 320 }
0x1440   :  { %4036 = vrot.lane.b32.xlu1 %v4034_v8, %s5014_s0 }
0x14b7   :  { %v3999_v3 = vpop.permute.xlu0 %3998  ;;  %v3994_v50 = vpop.permute.xlu1 %3993 }
0x14bb   :  { %v3981_v28 = vpop.permute.xlu0 %3980  ;;  %v3964_v59 = vpop.permute.xlu1 %3963 }
0x14bc   :  { %v3986_v60 = vmul.f32 %v3985_v63, %v3981_v28  ;;  %v3969_v11 = vmul.f32 %v3968_v32, %v3964_v59 }
0x14be   :  { %v4002_v56 = vmul.f32 %v3999_v3, %v3986_v60  ;;  %v4001_v14 = vmul.f32 %v3994_v50, %v3969_v11 }
0x14bf   :  { %v4037_v21 = vpop.permute.xlu1 %4036 }
0x14c0   :  { %v4010_v19 = vsel %vm28_vm1, %v4002_v56, 0.0  ;;  %v4003_v38 = vsel %vm28_vm1, %v4001_v14, 0.0 }
0x14c1   :  { %v4011_v4 = vrot.slane %v4010_v19, 4  ;;  %v4004_v36 = vrot.slane %v4003_v38, 4 }
0x14c3   :  { %v4012_v33 = vadd.f32 %v4011_v4, %v4010_v19  ;;  %v4005_v17 = vadd.f32 %v4004_v36, %v4003_v38 }
0x14c5   :  { %v4013_v39 = vrot.slane %v4012_v33, 2  ;;  %v4006_v5 = vrot.slane %v4005_v17, 2 }
0x14c7   :  { %v4014_v47 = vadd.f32 %v4013_v39, %v4012_v33  ;;  %v4007_v37 = vadd.f32 %v4006_v5, %v4005_v17 }
0x14c9   :  { %v4015_v45 = vrot.slane %v4014_v47, 1  ;;  %v4008_v40 = vrot.slane %v4007_v37, 1 }
0x14cb   :  { %v4016_v10 = vadd.f32 %v4015_v45, %v4014_v47  ;;  %v4009_v44 = vadd.f32 %v4008_v40, %v4007_v37 }
0x14cd   :  { %v4019_v18 = vsel %vm714_vm2, %v4016_v10, %v4009_v44 }
0x14ce   :  { %4021 = vst.msk [vmem:[#allocation3] sm:$0x3] %vm717_vm3, %v4019_v18 }
0x14d5   :  { %v4022_v13 = vld [vmem:[#allocation3] sm:$0x3] }
0x14d6   :  { %v4029_v57 = vadd.f32 %v4028_v25, %v4022_v13 }
0x14d8   :  { %v4039_v34 = vmul.f32 %v4037_v21, %v4029_v57 }
0x14da   :  { %4613 = vmatmul.mubr.msk.f32.vlgmr.msra.gmra.mrb[16].mxu1 %vm28_vm1, %v4039_v34 }
0x15ad   :  { %v4117_v24 = vpop.f32.mrb[16].mxu1 }
0x15ae   :  { %v4122_v16 = vsel %vm4121_vm5, %v4117_v24, 0.0  ;;  %v4614_v29 = vpop.f32.mrb[17].mxu1 }
0x15af   :  { %4123 = vadd.xlane.f32.xlu0 %v4122_v16 }
0x163c   :  { %v4124_v22 = vpop.xlane.xlu0 %4123 }
0x163d   :  { %v4126_v42 = vmul.f32 0.03125, %v4124_v22 }
0x163f   :  { %4128 = vst.msk [vmem:[%s5815_s3] sm:$0x3] %vm4127_vm6, %v4126_v42 }
0x1640   :  { %4133 = vsyncpa [#allocation5], 1 }

</bundles_post_ra>
